<compile_context>
chip_gen: v6e
topology: v6e:2x2x1
jax: 0.10.0
libtpu: 0.0.40
codegen_flags: <defaults>
</compile_context>

<pallas_src>
import functools

import jax
import jax.numpy as jnp
from jax.experimental import pallas as pl
from jax.experimental.pallas import tpu as pltpu

K = 7
PAD = (K - 1) // 2  # 3


def spatial_gate_kernel(w_ref, bias_ref, x_ref, out_ref, mxpad_ref, smpad_ref, *, H, W):
    # x_ref:    (NB, C, H, W) unpadded input block (NB batch elements per grid step)
    # w_ref:    (2*K*K,) f32 in SMEM; BN scale (and 1/C for the mean channel) folded in
    # bias_ref: (1,)     f32 in SMEM; folded BN bias
    # mxpad_ref/smpad_ref: (NB, H+2*PAD, W+2*PAD) f32 VMEM scratch for the padded pooled maps
    xv = x_ref[...]                                          # native dtype, read once

    # ---- ChannelPool: max and (sum-for-)mean over the channel axis ----
    mx = jnp.max(xv, axis=1).astype(jnp.float32)             # (NB, H, W)
    sm = jnp.sum(xv, axis=1, dtype=jnp.float32)              # (NB, H, W); 1/C folded into weights

    # Zero-padded pooled maps in scratch (conv "same" padding). Padding the pooled maps
    # with zeros == pooling the zero-padded input (max(0,..)=0, mean(0,..)=0).
    mxpad_ref[...] = jnp.zeros_like(mxpad_ref)
    smpad_ref[...] = jnp.zeros_like(smpad_ref)
    mxpad_ref[:, PAD:PAD + H, PAD:PAD + W] = mx
    smpad_ref[:, PAD:PAD + H, PAD:PAD + W] = sm

    # ---- 7x7 conv, 2 -> 1 channels, stride 1, pad 3, no bias; BN folded ----
    # acc starts at the folded BN bias; BN scale is folded into the weights.
    acc = jnp.full(mx.shape, bias_ref[0], dtype=jnp.float32)  # (NB, H, W)
    pooled = (mxpad_ref[...], smpad_ref[...])                 # channel 0 = max, 1 = mean(sum)
    for c in range(2):
        p = pooled[c]                                         # (NB, Hp, Wp) f32
        for dj in range(K):
            col = p[:, :, dj:dj + W]                          # one lane shift per (c, dj): 14 total
            for di in range(K):
                w = w_ref[c * K * K + di * K + dj]            # scalar from SMEM
                acc = acc + w * col[:, di:di + H, :]          # sublane (row) offsets are cheap

    # ---- sigmoid gate (EUP), broadcast-multiply onto the original x ----
    scale = jax.nn.sigmoid(acc)                               # (NB, H, W) f32
    # TODO(synk): for W not a multiple of 128 the final stores are lane-masked; a fully
    # lane-dense (C, H*W) store path would need an in-kernel (H,W)<->(H*W,) relayout.
    out_ref[...] = (xv * scale[:, None, :, :].astype(xv.dtype)).astype(out_ref.dtype)


def _pick_batch_block(N, C, H, W, itemsize):
    """Largest divisor of N whose per-step VMEM footprint fits a v7x-safe budget."""
    Hp, Wp = H + 2 * PAD, W + 2 * PAD

    def est_bytes(nb):
        io = nb * C * H * W * itemsize                 # x block (out block is the same size)
        scratch = 2 * nb * Hp * Wp * 4                 # padded pooled maps
        work = nb * (6 * H * W + 4 * Hp * W) * 4       # acc / scale / pooled values / col slices
        return 2 * 2 * io + scratch + work             # in + out, double-buffered

    nb = 1
    for cand in range(1, N + 1):
        if N % cand == 0 and est_bytes(cand) <= 20 * 1024 * 1024:
            nb = cand
    return nb, est_bytes(nb)


def spatial_gate(x, conv_w, bn_gamma, bn_beta, bn_mean, bn_var, eps=1e-5):
    """x: (N, C, H, W). conv_w: (1, 2, 7, 7). BN params: shape (1,). Returns (N, C, H, W)."""
    N, C, H, W = x.shape
    Hp, Wp = H + 2 * PAD, W + 2 * PAD

    # Fold BatchNorm (eval mode) and the channel-mean 1/C into the conv weights.
    bn_scale = (bn_gamma / jnp.sqrt(bn_var + eps)).astype(jnp.float32)      # (1,)
    bn_bias = (bn_beta - bn_mean * bn_scale).astype(jnp.float32)            # (1,)
    w = conv_w.reshape(2, K, K).astype(jnp.float32) * bn_scale[0]
    w = w.at[1].multiply(1.0 / C)                     # mean channel -> kernel uses a plain sum
    w_flat = w.reshape(-1)                            # (2*7*7,) scalars in SMEM

    nb, est = _pick_batch_block(N, C, H, W, x.dtype.itemsize)

    # TODO(synk): for very large C*H*W a C-tiled grid (pool pass + gate pass) would be needed
    # to stay inside v7x's 64 MiB VMEM; here we only raise the scoped limit if required.
    vmem_limit = int(min(max(est + (8 << 20), 32 << 20), 100 << 20))

    kernel = functools.partial(spatial_gate_kernel, H=H, W=W)

    return pl.pallas_call(
        kernel,
        out_shape=jax.ShapeDtypeStruct((N, C, H, W), x.dtype),
        grid=(N // nb,),
        in_specs=[
            pl.BlockSpec(memory_space=pltpu.MemorySpace.SMEM),      # folded conv weights
            pl.BlockSpec(memory_space=pltpu.MemorySpace.SMEM),      # folded BN bias
            pl.BlockSpec((nb, C, H, W), lambda n: (n, 0, 0, 0)),    # x, nb batch elems per step
        ],
        out_specs=pl.BlockSpec((nb, C, H, W), lambda n: (n, 0, 0, 0)),
        scratch_shapes=[
            pltpu.VMEM((nb, Hp, Wp), jnp.float32),                  # padded max map
            pltpu.VMEM((nb, Hp, Wp), jnp.float32),                  # padded sum map
        ],
        compiler_params=pltpu.CompilerParams(
            dimension_semantics=("parallel",),                      # v7x: 2 TCs split the batch
            vmem_limit_bytes=vmem_limit,
        ),
    )(w_flat, bn_bias, x)


def spatial_gate_reference(x, conv_w, bn_gamma, bn_beta, bn_mean, bn_var, eps=1e-5):
    """Pure-JAX reference mirroring the PyTorch forward (BN in eval mode)."""
    mx = jnp.max(x, axis=1, keepdims=True)
    mn = jnp.mean(x, axis=1, keepdims=True)
    pooled = jnp.concatenate([mx, mn], axis=1)                      # (N, 2, H, W)
    conv = jax.lax.conv_general_dilated(
        pooled, conv_w, window_strides=(1, 1), padding=[(PAD, PAD), (PAD, PAD)],
        dimension_numbers=("NCHW", "OIHW", "NCHW"))
    g = bn_gamma.reshape(1, -1, 1, 1)
    b = bn_beta.reshape(1, -1, 1, 1)
    m = bn_mean.reshape(1, -1, 1, 1)
    v = bn_var.reshape(1, -1, 1, 1)
    bn = (conv - m) / jnp.sqrt(v + eps) * g + b
    return x * jax.nn.sigmoid(bn)


if __name__ == "__main__":
    key = jax.random.PRNGKey(0)
    kx, kw = jax.random.split(key)

    N, C, H, W = 2, 4, 16, 16
    x = jax.random.normal(kx, (N, C, H, W), dtype=jnp.float32)

    # Deterministic parameter init (synthetic, not a checkpoint).
    conv_w = 0.1 * jax.random.normal(kw, (1, 2, K, K), dtype=jnp.float32)
    # BatchNorm2d(1) default init, eval-mode statistics:
    # TODO(synk): training-mode BN (batch statistics) not modeled; eval-mode semantics used.
    bn_gamma = jnp.ones((1,), jnp.float32)
    bn_beta = jnp.zeros((1,), jnp.float32)
    bn_mean = jnp.zeros((1,), jnp.float32)
    bn_var = jnp.ones((1,), jnp.float32)

    out = spatial_gate(x, conv_w, bn_gamma, bn_beta, bn_mean, bn_var)
    out = jax.block_until_ready(out)

    ref = spatial_gate_reference(x, conv_w, bn_gamma, bn_beta, bn_mean, bn_var)
    assert out.shape == (N, C, H, W)
    assert jnp.allclose(out, ref, rtol=1e-4, atol=1e-5), float(jnp.max(jnp.abs(out - ref)))

    print("KERNEL_OK")
</pallas_src>

<mosaic_0001>
module attributes {stable_mosaic.version = 11 : i64} {
  func.func @spatial_gate_kernel(%arg0: i32, %arg1: memref<98xf32, #tpu.memory_space<smem>>, %arg2: memref<1xf32, #tpu.memory_space<smem>>, %arg3: memref<2x4x16x16xf32, #tpu.memory_space<vmem>>, %arg4: memref<2x4x16x16xf32, #tpu.memory_space<vmem>>, %arg5: memref<2x22x22xf32, #tpu.memory_space<vmem>>, %arg6: memref<2x22x22xf32, #tpu.memory_space<vmem>>) attributes {dimension_semantics = [#tpu.dimension_semantics<parallel>], iteration_bounds = array<i64: 1>, scalar_prefetch = 0 : i64, scratch_operands = 2 : i64, tpu.core_type = #tpu.core_type<tc>, window_params = [{transform_indices = @transform_0, window_bounds = array<i64: 98>}, {transform_indices = @transform_1, window_bounds = array<i64: 1>}, {transform_indices = @transform_2, window_bounds = array<i64: 2, 4, 16, 16>}, {transform_indices = @transform_3, window_bounds = array<i64: 2, 4, 16, 16>}]} {
    %c0 = arith.constant 0 : index
    %c0_0 = arith.constant 0 : index
    %c0_1 = arith.constant 0 : index
    %c0_2 = arith.constant 0 : index
    %0 = vector.load %arg3[%c0, %c0_0, %c0_1, %c0_2] : memref<2x4x16x16xf32, #tpu.memory_space<vmem>>, vector<2x4x16x16xf32>
    %cst = arith.constant dense<0xFF800000> : vector<2x16x16xf32>
    %1 = vector.multi_reduction <maximumf>, %0, %cst [1] : vector<2x4x16x16xf32> to vector<2x16x16xf32>
    %cst_3 = arith.constant dense<0.000000e+00> : vector<2x16x16xf32>
    %2 = vector.multi_reduction <add>, %0, %cst_3 [1] : vector<2x4x16x16xf32> to vector<2x16x16xf32>
    %cst_4 = arith.constant 0.000000e+00 : f32
    %3 = vector.broadcast %cst_4 : f32 to vector<2x22x22xf32>
    %c0_5 = arith.constant 0 : index
    %c0_6 = arith.constant 0 : index
    %c0_7 = arith.constant 0 : index
    %4 = vector.load %arg5[%c0_5, %c0_6, %c0_7] : memref<2x22x22xf32, #tpu.memory_space<vmem>>, vector<2x22x22xf32>
    tpu.vector_store %arg5[%c0_5, %c0_6, %c0_7], %3 {strides = array<i32>} : memref<2x22x22xf32, #tpu.memory_space<vmem>>, vector<2x22x22xf32>,
    %cst_8 = arith.constant 0.000000e+00 : f32
    %5 = vector.broadcast %cst_8 : f32 to vector<2x22x22xf32>
    %c0_9 = arith.constant 0 : index
    %c0_10 = arith.constant 0 : index
    %c0_11 = arith.constant 0 : index
    %6 = vector.load %arg6[%c0_9, %c0_10, %c0_11] : memref<2x22x22xf32, #tpu.memory_space<vmem>>, vector<2x22x22xf32>
    tpu.vector_store %arg6[%c0_9, %c0_10, %c0_11], %5 {strides = array<i32>} : memref<2x22x22xf32, #tpu.memory_space<vmem>>, vector<2x22x22xf32>,
    %c0_12 = arith.constant 0 : index
    %c3 = arith.constant 3 : index
    %c3_13 = arith.constant 3 : index
    %7 = vector.load %arg5[%c0_12, %c3, %c3_13] : memref<2x22x22xf32, #tpu.memory_space<vmem>>, vector<2x16x16xf32>
    tpu.vector_store %arg5[%c0_12, %c3, %c3_13], %1 {strides = array<i32>} : memref<2x22x22xf32, #tpu.memory_space<vmem>>, vector<2x16x16xf32>,
    %c0_14 = arith.constant 0 : index
    %c3_15 = arith.constant 3 : index
    %c3_16 = arith.constant 3 : index
    %8 = vector.load %arg6[%c0_14, %c3_15, %c3_16] : memref<2x22x22xf32, #tpu.memory_space<vmem>>, vector<2x16x16xf32>
    tpu.vector_store %arg6[%c0_14, %c3_15, %c3_16], %2 {strides = array<i32>} : memref<2x22x22xf32, #tpu.memory_space<vmem>>, vector<2x16x16xf32>,
    %c0_17 = arith.constant 0 : index
    %9 = memref.load %arg2[%c0_17] : memref<1xf32, #tpu.memory_space<smem>>
    %10 = vector.broadcast %9 : f32 to vector<2x16x16xf32>
    %c0_18 = arith.constant 0 : index
    %c0_19 = arith.constant 0 : index
    %c0_20 = arith.constant 0 : index
    %11 = vector.load %arg5[%c0_18, %c0_19, %c0_20] : memref<2x22x22xf32, #tpu.memory_space<vmem>>, vector<2x22x22xf32>
    %c0_21 = arith.constant 0 : index
    %c0_22 = arith.constant 0 : index
    %c0_23 = arith.constant 0 : index
    %12 = vector.load %arg6[%c0_21, %c0_22, %c0_23] : memref<2x22x22xf32, #tpu.memory_space<vmem>>, vector<2x22x22xf32>
    %13 = vector.extract_strided_slice %11 {offsets = [0, 0, 0], sizes = [2, 22, 16], strides = [1, 1, 1]} : vector<2x22x22xf32> to vector<2x22x16xf32>
    %c0_24 = arith.constant 0 : index
    %14 = memref.load %arg1[%c0_24] : memref<98xf32, #tpu.memory_space<smem>>
    %15 = vector.extract_strided_slice %13 {offsets = [0, 0, 0], sizes = [2, 16, 16], strides = [1, 1, 1]} : vector<2x22x16xf32> to vector<2x16x16xf32>
    %16 = vector.broadcast %14 : f32 to vector<2x16x16xf32>
    %17 = arith.mulf %16, %15 : vector<2x16x16xf32>
    %18 = arith.addf %10, %17 : vector<2x16x16xf32>
    %c7 = arith.constant 7 : index
    %19 = memref.load %arg1[%c7] : memref<98xf32, #tpu.memory_space<smem>>
    %20 = vector.extract_strided_slice %13 {offsets = [0, 1, 0], sizes = [2, 16, 16], strides = [1, 1, 1]} : vector<2x22x16xf32> to vector<2x16x16xf32>
    %21 = vector.broadcast %19 : f32 to vector<2x16x16xf32>
    %22 = arith.mulf %21, %20 : vector<2x16x16xf32>
    %23 = arith.addf %18, %22 : vector<2x16x16xf32>
    %c14 = arith.constant 14 : index
    %24 = memref.load %arg1[%c14] : memref<98xf32, #tpu.memory_space<smem>>
    %25 = vector.extract_strided_slice %13 {offsets = [0, 2, 0], sizes = [2, 16, 16], strides = [1, 1, 1]} : vector<2x22x16xf32> to vector<2x16x16xf32>
    %26 = vector.broadcast %24 : f32 to vector<2x16x16xf32>
    %27 = arith.mulf %26, %25 : vector<2x16x16xf32>
    %28 = arith.addf %23, %27 : vector<2x16x16xf32>
    %c21 = arith.constant 21 : index
    %29 = memref.load %arg1[%c21] : memref<98xf32, #tpu.memory_space<smem>>
    %30 = vector.extract_strided_slice %13 {offsets = [0, 3, 0], sizes = [2, 16, 16], strides = [1, 1, 1]} : vector<2x22x16xf32> to vector<2x16x16xf32>
    %31 = vector.broadcast %29 : f32 to vector<2x16x16xf32>
    %32 = arith.mulf %31, %30 : vector<2x16x16xf32>
    %33 = arith.addf %28, %32 : vector<2x16x16xf32>
    %c28 = arith.constant 28 : index
    %34 = memref.load %arg1[%c28] : memref<98xf32, #tpu.memory_space<smem>>
    %35 = vector.extract_strided_slice %13 {offsets = [0, 4, 0], sizes = [2, 16, 16], strides = [1, 1, 1]} : vector<2x22x16xf32> to vector<2x16x16xf32>
    %36 = vector.broadcast %34 : f32 to vector<2x16x16xf32>
    %37 = arith.mulf %36, %35 : vector<2x16x16xf32>
    %38 = arith.addf %33, %37 : vector<2x16x16xf32>
    %c35 = arith.constant 35 : index
    %39 = memref.load %arg1[%c35] : memref<98xf32, #tpu.memory_space<smem>>
    %40 = vector.extract_strided_slice %13 {offsets = [0, 5, 0], sizes = [2, 16, 16], strides = [1, 1, 1]} : vector<2x22x16xf32> to vector<2x16x16xf32>
    %41 = vector.broadcast %39 : f32 to vector<2x16x16xf32>
    %42 = arith.mulf %41, %40 : vector<2x16x16xf32>
    %43 = arith.addf %38, %42 : vector<2x16x16xf32>
    %c42 = arith.constant 42 : index
    %44 = memref.load %arg1[%c42] : memref<98xf32, #tpu.memory_space<smem>>
    %45 = vector.extract_strided_slice %13 {offsets = [0, 6, 0], sizes = [2, 16, 16], strides = [1, 1, 1]} : vector<2x22x16xf32> to vector<2x16x16xf32>
    %46 = vector.broadcast %44 : f32 to vector<2x16x16xf32>
    %47 = arith.mulf %46, %45 : vector<2x16x16xf32>
    %48 = arith.addf %43, %47 : vector<2x16x16xf32>
    %49 = vector.extract_strided_slice %11 {offsets = [0, 0, 1], sizes = [2, 22, 16], strides = [1, 1, 1]} : vector<2x22x22xf32> to vector<2x22x16xf32>
    %c1 = arith.constant 1 : index
    %50 = memref.load %arg1[%c1] : memref<98xf32, #tpu.memory_space<smem>>
    %51 = vector.extract_strided_slice %49 {offsets = [0, 0, 0], sizes = [2, 16, 16], strides = [1, 1, 1]} : vector<2x22x16xf32> to vector<2x16x16xf32>
    %52 = vector.broadcast %50 : f32 to vector<2x16x16xf32>
    %53 = arith.mulf %52, %51 : vector<2x16x16xf32>
    %54 = arith.addf %48, %53 : vector<2x16x16xf32>
    %c8 = arith.constant 8 : index
    %55 = memref.load %arg1[%c8] : memref<98xf32, #tpu.memory_space<smem>>
    %56 = vector.extract_strided_slice %49 {offsets = [0, 1, 0], sizes = [2, 16, 16], strides = [1, 1, 1]} : vector<2x22x16xf32> to vector<2x16x16xf32>
    %57 = vector.broadcast %55 : f32 to vector<2x16x16xf32>
    %58 = arith.mulf %57, %56 : vector<2x16x16xf32>
    %59 = arith.addf %54, %58 : vector<2x16x16xf32>
    %c15 = arith.constant 15 : index
    %60 = memref.load %arg1[%c15] : memref<98xf32, #tpu.memory_space<smem>>
    %61 = vector.extract_strided_slice %49 {offsets = [0, 2, 0], sizes = [2, 16, 16], strides = [1, 1, 1]} : vector<2x22x16xf32> to vector<2x16x16xf32>
    %62 = vector.broadcast %60 : f32 to vector<2x16x16xf32>
    %63 = arith.mulf %62, %61 : vector<2x16x16xf32>
    %64 = arith.addf %59, %63 : vector<2x16x16xf32>
    %c22 = arith.constant 22 : index
    %65 = memref.load %arg1[%c22] : memref<98xf32, #tpu.memory_space<smem>>
    %66 = vector.extract_strided_slice %49 {offsets = [0, 3, 0], sizes = [2, 16, 16], strides = [1, 1, 1]} : vector<2x22x16xf32> to vector<2x16x16xf32>
    %67 = vector.broadcast %65 : f32 to vector<2x16x16xf32>
    %68 = arith.mulf %67, %66 : vector<2x16x16xf32>
    %69 = arith.addf %64, %68 : vector<2x16x16xf32>
    %c29 = arith.constant 29 : index
    %70 = memref.load %arg1[%c29] : memref<98xf32, #tpu.memory_space<smem>>
    %71 = vector.extract_strided_slice %49 {offsets = [0, 4, 0], sizes = [2, 16, 16], strides = [1, 1, 1]} : vector<2x22x16xf32> to vector<2x16x16xf32>
    %72 = vector.broadcast %70 : f32 to vector<2x16x16xf32>
    %73 = arith.mulf %72, %71 : vector<2x16x16xf32>
    %74 = arith.addf %69, %73 : vector<2x16x16xf32>
    %c36 = arith.constant 36 : index
    %75 = memref.load %arg1[%c36] : memref<98xf32, #tpu.memory_space<smem>>
    %76 = vector.extract_strided_slice %49 {offsets = [0, 5, 0], sizes = [2, 16, 16], strides = [1, 1, 1]} : vector<2x22x16xf32> to vector<2x16x16xf32>
    %77 = vector.broadcast %75 : f32 to vector<2x16x16xf32>
    %78 = arith.mulf %77, %76 : vector<2x16x16xf32>
    %79 = arith.addf %74, %78 : vector<2x16x16xf32>
    %c43 = arith.constant 43 : index
    %80 = memref.load %arg1[%c43] : memref<98xf32, #tpu.memory_space<smem>>
    %81 = vector.extract_strided_slice %49 {offsets = [0, 6, 0], sizes = [2, 16, 16], strides = [1, 1, 1]} : vector<2x22x16xf32> to vector<2x16x16xf32>
    %82 = vector.broadcast %80 : f32 to vector<2x16x16xf32>
    %83 = arith.mulf %82, %81 : vector<2x16x16xf32>
    %84 = arith.addf %79, %83 : vector<2x16x16xf32>
    %85 = vector.extract_strided_slice %11 {offsets = [0, 0, 2], sizes = [2, 22, 16], strides = [1, 1, 1]} : vector<2x22x22xf32> to vector<2x22x16xf32>
    %c2 = arith.constant 2 : index
    %86 = memref.load %arg1[%c2] : memref<98xf32, #tpu.memory_space<smem>>
    %87 = vector.extract_strided_slice %85 {offsets = [0, 0, 0], sizes = [2, 16, 16], strides = [1, 1, 1]} : vector<2x22x16xf32> to vector<2x16x16xf32>
    %88 = vector.broadcast %86 : f32 to vector<2x16x16xf32>
    %89 = arith.mulf %88, %87 : vector<2x16x16xf32>
    %90 = arith.addf %84, %89 : vector<2x16x16xf32>
    %c9 = arith.constant 9 : index
    %91 = memref.load %arg1[%c9] : memref<98xf32, #tpu.memory_space<smem>>
    %92 = vector.extract_strided_slice %85 {offsets = [0, 1, 0], sizes = [2, 16, 16], strides = [1, 1, 1]} : vector<2x22x16xf32> to vector<2x16x16xf32>
    %93 = vector.broadcast %91 : f32 to vector<2x16x16xf32>
    %94 = arith.mulf %93, %92 : vector<2x16x16xf32>
    %95 = arith.addf %90, %94 : vector<2x16x16xf32>
    %c16 = arith.constant 16 : index
    %96 = memref.load %arg1[%c16] : memref<98xf32, #tpu.memory_space<smem>>
    %97 = vector.extract_strided_slice %85 {offsets = [0, 2, 0], sizes = [2, 16, 16], strides = [1, 1, 1]} : vector<2x22x16xf32> to vector<2x16x16xf32>
    %98 = vector.broadcast %96 : f32 to vector<2x16x16xf32>
    %99 = arith.mulf %98, %97 : vector<2x16x16xf32>
    %100 = arith.addf %95, %99 : vector<2x16x16xf32>
    %c23 = arith.constant 23 : index
    %101 = memref.load %arg1[%c23] : memref<98xf32, #tpu.memory_space<smem>>
    %102 = vector.extract_strided_slice %85 {offsets = [0, 3, 0], sizes = [2, 16, 16], strides = [1, 1, 1]} : vector<2x22x16xf32> to vector<2x16x16xf32>
    %103 = vector.broadcast %101 : f32 to vector<2x16x16xf32>
    %104 = arith.mulf %103, %102 : vector<2x16x16xf32>
    %105 = arith.addf %100, %104 : vector<2x16x16xf32>
    %c30 = arith.constant 30 : index
    %106 = memref.load %arg1[%c30] : memref<98xf32, #tpu.memory_space<smem>>
    %107 = vector.extract_strided_slice %85 {offsets = [0, 4, 0], sizes = [2, 16, 16], strides = [1, 1, 1]} : vector<2x22x16xf32> to vector<2x16x16xf32>
    %108 = vector.broadcast %106 : f32 to vector<2x16x16xf32>
    %109 = arith.mulf %108, %107 : vector<2x16x16xf32>
    %110 = arith.addf %105, %109 : vector<2x16x16xf32>
    %c37 = arith.constant 37 : index
    %111 = memref.load %arg1[%c37] : memref<98xf32, #tpu.memory_space<smem>>
    %112 = vector.extract_strided_slice %85 {offsets = [0, 5, 0], sizes = [2, 16, 16], strides = [1, 1, 1]} : vector<2x22x16xf32> to vector<2x16x16xf32>
    %113 = vector.broadcast %111 : f32 to vector<2x16x16xf32>
    %114 = arith.mulf %113, %112 : vector<2x16x16xf32>
    %115 = arith.addf %110, %114 : vector<2x16x16xf32>
    %c44 = arith.constant 44 : index
    %116 = memref.load %arg1[%c44] : memref<98xf32, #tpu.memory_space<smem>>
    %117 = vector.extract_strided_slice %85 {offsets = [0, 6, 0], sizes = [2, 16, 16], strides = [1, 1, 1]} : vector<2x22x16xf32> to vector<2x16x16xf32>
    %118 = vector.broadcast %116 : f32 to vector<2x16x16xf32>
    %119 = arith.mulf %118, %117 : vector<2x16x16xf32>
    %120 = arith.addf %115, %119 : vector<2x16x16xf32>
    %121 = vector.extract_strided_slice %11 {offsets = [0, 0, 3], sizes = [2, 22, 16], strides = [1, 1, 1]} : vector<2x22x22xf32> to vector<2x22x16xf32>
    %c3_25 = arith.constant 3 : index
    %122 = memref.load %arg1[%c3_25] : memref<98xf32, #tpu.memory_space<smem>>
    %123 = vector.extract_strided_slice %121 {offsets = [0, 0, 0], sizes = [2, 16, 16], strides = [1, 1, 1]} : vector<2x22x16xf32> to vector<2x16x16xf32>
    %124 = vector.broadcast %122 : f32 to vector<2x16x16xf32>
    %125 = arith.mulf %124, %123 : vector<2x16x16xf32>
    %126 = arith.addf %120, %125 : vector<2x16x16xf32>
    %c10 = arith.constant 10 : index
    %127 = memref.load %arg1[%c10] : memref<98xf32, #tpu.memory_space<smem>>
    %128 = vector.extract_strided_slice %121 {offsets = [0, 1, 0], sizes = [2, 16, 16], strides = [1, 1, 1]} : vector<2x22x16xf32> to vector<2x16x16xf32>
    %129 = vector.broadcast %127 : f32 to vector<2x16x16xf32>
    %130 = arith.mulf %129, %128 : vector<2x16x16xf32>
    %131 = arith.addf %126, %130 : vector<2x16x16xf32>
    %c17 = arith.constant 17 : index
    %132 = memref.load %arg1[%c17] : memref<98xf32, #tpu.memory_space<smem>>
    %133 = vector.extract_strided_slice %121 {offsets = [0, 2, 0], sizes = [2, 16, 16], strides = [1, 1, 1]} : vector<2x22x16xf32> to vector<2x16x16xf32>
    %134 = vector.broadcast %132 : f32 to vector<2x16x16xf32>
    %135 = arith.mulf %134, %133 : vector<2x16x16xf32>
    %136 = arith.addf %131, %135 : vector<2x16x16xf32>
    %c24 = arith.constant 24 : index
    %137 = memref.load %arg1[%c24] : memref<98xf32, #tpu.memory_space<smem>>
    %138 = vector.extract_strided_slice %121 {offsets = [0, 3, 0], sizes = [2, 16, 16], strides = [1, 1, 1]} : vector<2x22x16xf32> to vector<2x16x16xf32>
    %139 = vector.broadcast %137 : f32 to vector<2x16x16xf32>
    %140 = arith.mulf %139, %138 : vector<2x16x16xf32>
    %141 = arith.addf %136, %140 : vector<2x16x16xf32>
    %c31 = arith.constant 31 : index
    %142 = memref.load %arg1[%c31] : memref<98xf32, #tpu.memory_space<smem>>
    %143 = vector.extract_strided_slice %121 {offsets = [0, 4, 0], sizes = [2, 16, 16], strides = [1, 1, 1]} : vector<2x22x16xf32> to vector<2x16x16xf32>
    %144 = vector.broadcast %142 : f32 to vector<2x16x16xf32>
    %145 = arith.mulf %144, %143 : vector<2x16x16xf32>
    %146 = arith.addf %141, %145 : vector<2x16x16xf32>
    %c38 = arith.constant 38 : index
    %147 = memref.load %arg1[%c38] : memref<98xf32, #tpu.memory_space<smem>>
    %148 = vector.extract_strided_slice %121 {offsets = [0, 5, 0], sizes = [2, 16, 16], strides = [1, 1, 1]} : vector<2x22x16xf32> to vector<2x16x16xf32>
    %149 = vector.broadcast %147 : f32 to vector<2x16x16xf32>
    %150 = arith.mulf %149, %148 : vector<2x16x16xf32>
    %151 = arith.addf %146, %150 : vector<2x16x16xf32>
    %c45 = arith.constant 45 : index
    %152 = memref.load %arg1[%c45] : memref<98xf32, #tpu.memory_space<smem>>
    %153 = vector.extract_strided_slice %121 {offsets = [0, 6, 0], sizes = [2, 16, 16], strides = [1, 1, 1]} : vector<2x22x16xf32> to vector<2x16x16xf32>
    %154 = vector.broadcast %152 : f32 to vector<2x16x16xf32>
    %155 = arith.mulf %154, %153 : vector<2x16x16xf32>
    %156 = arith.addf %151, %155 : vector<2x16x16xf32>
    %157 = vector.extract_strided_slice %11 {offsets = [0, 0, 4], sizes = [2, 22, 16], strides = [1, 1, 1]} : vector<2x22x22xf32> to vector<2x22x16xf32>
    %c4 = arith.constant 4 : index
    %158 = memref.load %arg1[%c4] : memref<98xf32, #tpu.memory_space<smem>>
    %159 = vector.extract_strided_slice %157 {offsets = [0, 0, 0], sizes = [2, 16, 16], strides = [1, 1, 1]} : vector<2x22x16xf32> to vector<2x16x16xf32>
    %160 = vector.broadcast %158 : f32 to vector<2x16x16xf32>
    %161 = arith.mulf %160, %159 : vector<2x16x16xf32>
    %162 = arith.addf %156, %161 : vector<2x16x16xf32>
    %c11 = arith.constant 11 : index
    %163 = memref.load %arg1[%c11] : memref<98xf32, #tpu.memory_space<smem>>
    %164 = vector.extract_strided_slice %157 {offsets = [0, 1, 0], sizes = [2, 16, 16], strides = [1, 1, 1]} : vector<2x22x16xf32> to vector<2x16x16xf32>
    %165 = vector.broadcast %163 : f32 to vector<2x16x16xf32>
    %166 = arith.mulf %165, %164 : vector<2x16x16xf32>
    %167 = arith.addf %162, %166 : vector<2x16x16xf32>
    %c18 = arith.constant 18 : index
    %168 = memref.load %arg1[%c18] : memref<98xf32, #tpu.memory_space<smem>>
    %169 = vector.extract_strided_slice %157 {offsets = [0, 2, 0], sizes = [2, 16, 16], strides = [1, 1, 1]} : vector<2x22x16xf32> to vector<2x16x16xf32>
    %170 = vector.broadcast %168 : f32 to vector<2x16x16xf32>
    %171 = arith.mulf %170, %169 : vector<2x16x16xf32>
    %172 = arith.addf %167, %171 : vector<2x16x16xf32>
    %c25 = arith.constant 25 : index
    %173 = memref.load %arg1[%c25] : memref<98xf32, #tpu.memory_space<smem>>
    %174 = vector.extract_strided_slice %157 {offsets = [0, 3, 0], sizes = [2, 16, 16], strides = [1, 1, 1]} : vector<2x22x16xf32> to vector<2x16x16xf32>
    %175 = vector.broadcast %173 : f32 to vector<2x16x16xf32>
    %176 = arith.mulf %175, %174 : vector<2x16x16xf32>
    %177 = arith.addf %172, %176 : vector<2x16x16xf32>
    %c32 = arith.constant 32 : index
    %178 = memref.load %arg1[%c32] : memref<98xf32, #tpu.memory_space<smem>>
    %179 = vector.extract_strided_slice %157 {offsets = [0, 4, 0], sizes = [2, 16, 16], strides = [1, 1, 1]} : vector<2x22x16xf32> to vector<2x16x16xf32>
    %180 = vector.broadcast %178 : f32 to vector<2x16x16xf32>
    %181 = arith.mulf %180, %179 : vector<2x16x16xf32>
    %182 = arith.addf %177, %181 : vector<2x16x16xf32>
    %c39 = arith.constant 39 : index
    %183 = memref.load %arg1[%c39] : memref<98xf32, #tpu.memory_space<smem>>
    %184 = vector.extract_strided_slice %157 {offsets = [0, 5, 0], sizes = [2, 16, 16], strides = [1, 1, 1]} : vector<2x22x16xf32> to vector<2x16x16xf32>
    %185 = vector.broadcast %183 : f32 to vector<2x16x16xf32>
    %186 = arith.mulf %185, %184 : vector<2x16x16xf32>
    %187 = arith.addf %182, %186 : vector<2x16x16xf32>
    %c46 = arith.constant 46 : index
    %188 = memref.load %arg1[%c46] : memref<98xf32, #tpu.memory_space<smem>>
    %189 = vector.extract_strided_slice %157 {offsets = [0, 6, 0], sizes = [2, 16, 16], strides = [1, 1, 1]} : vector<2x22x16xf32> to vector<2x16x16xf32>
    %190 = vector.broadcast %188 : f32 to vector<2x16x16xf32>
    %191 = arith.mulf %190, %189 : vector<2x16x16xf32>
    %192 = arith.addf %187, %191 : vector<2x16x16xf32>
    %193 = vector.extract_strided_slice %11 {offsets = [0, 0, 5], sizes = [2, 22, 16], strides = [1, 1, 1]} : vector<2x22x22xf32> to vector<2x22x16xf32>
    %c5 = arith.constant 5 : index
    %194 = memref.load %arg1[%c5] : memref<98xf32, #tpu.memory_space<smem>>
    %195 = vector.extract_strided_slice %193 {offsets = [0, 0, 0], sizes = [2, 16, 16], strides = [1, 1, 1]} : vector<2x22x16xf32> to vector<2x16x16xf32>
    %196 = vector.broadcast %194 : f32 to vector<2x16x16xf32>
    %197 = arith.mulf %196, %195 : vector<2x16x16xf32>
    %198 = arith.addf %192, %197 : vector<2x16x16xf32>
    %c12 = arith.constant 12 : index
    %199 = memref.load %arg1[%c12] : memref<98xf32, #tpu.memory_space<smem>>
    %200 = vector.extract_strided_slice %193 {offsets = [0, 1, 0], sizes = [2, 16, 16], strides = [1, 1, 1]} : vector<2x22x16xf32> to vector<2x16x16xf32>
    %201 = vector.broadcast %199 : f32 to vector<2x16x16xf32>
    %202 = arith.mulf %201, %200 : vector<2x16x16xf32>
    %203 = arith.addf %198, %202 : vector<2x16x16xf32>
    %c19 = arith.constant 19 : index
    %204 = memref.load %arg1[%c19] : memref<98xf32, #tpu.memory_space<smem>>
    %205 = vector.extract_strided_slice %193 {offsets = [0, 2, 0], sizes = [2, 16, 16], strides = [1, 1, 1]} : vector<2x22x16xf32> to vector<2x16x16xf32>
    %206 = vector.broadcast %204 : f32 to vector<2x16x16xf32>
    %207 = arith.mulf %206, %205 : vector<2x16x16xf32>
    %208 = arith.addf %203, %207 : vector<2x16x16xf32>
    %c26 = arith.constant 26 : index
    %209 = memref.load %arg1[%c26] : memref<98xf32, #tpu.memory_space<smem>>
    %210 = vector.extract_strided_slice %193 {offsets = [0, 3, 0], sizes = [2, 16, 16], strides = [1, 1, 1]} : vector<2x22x16xf32> to vector<2x16x16xf32>
    %211 = vector.broadcast %209 : f32 to vector<2x16x16xf32>
    %212 = arith.mulf %211, %210 : vector<2x16x16xf32>
    %213 = arith.addf %208, %212 : vector<2x16x16xf32>
    %c33 = arith.constant 33 : index
    %214 = memref.load %arg1[%c33] : memref<98xf32, #tpu.memory_space<smem>>
    %215 = vector.extract_strided_slice %193 {offsets = [0, 4, 0], sizes = [2, 16, 16], strides = [1, 1, 1]} : vector<2x22x16xf32> to vector<2x16x16xf32>
    %216 = vector.broadcast %214 : f32 to vector<2x16x16xf32>
    %217 = arith.mulf %216, %215 : vector<2x16x16xf32>
    %218 = arith.addf %213, %217 : vector<2x16x16xf32>
    %c40 = arith.constant 40 : index
    %219 = memref.load %arg1[%c40] : memref<98xf32, #tpu.memory_space<smem>>
    %220 = vector.extract_strided_slice %193 {offsets = [0, 5, 0], sizes = [2, 16, 16], strides = [1, 1, 1]} : vector<2x22x16xf32> to vector<2x16x16xf32>
    %221 = vector.broadcast %219 : f32 to vector<2x16x16xf32>
    %222 = arith.mulf %221, %220 : vector<2x16x16xf32>
    %223 = arith.addf %218, %222 : vector<2x16x16xf32>
    %c47 = arith.constant 47 : index
    %224 = memref.load %arg1[%c47] : memref<98xf32, #tpu.memory_space<smem>>
    %225 = vector.extract_strided_slice %193 {offsets = [0, 6, 0], sizes = [2, 16, 16], strides = [1, 1, 1]} : vector<2x22x16xf32> to vector<2x16x16xf32>
    %226 = vector.broadcast %224 : f32 to vector<2x16x16xf32>
    %227 = arith.mulf %226, %225 : vector<2x16x16xf32>
    %228 = arith.addf %223, %227 : vector<2x16x16xf32>
    %229 = vector.extract_strided_slice %11 {offsets = [0, 0, 6], sizes = [2, 22, 16], strides = [1, 1, 1]} : vector<2x22x22xf32> to vector<2x22x16xf32>
    %c6 = arith.constant 6 : index
    %230 = memref.load %arg1[%c6] : memref<98xf32, #tpu.memory_space<smem>>
    %231 = vector.extract_strided_slice %229 {offsets = [0, 0, 0], sizes = [2, 16, 16], strides = [1, 1, 1]} : vector<2x22x16xf32> to vector<2x16x16xf32>
    %232 = vector.broadcast %230 : f32 to vector<2x16x16xf32>
    %233 = arith.mulf %232, %231 : vector<2x16x16xf32>
    %234 = arith.addf %228, %233 : vector<2x16x16xf32>
    %c13 = arith.constant 13 : index
    %235 = memref.load %arg1[%c13] : memref<98xf32, #tpu.memory_space<smem>>
    %236 = vector.extract_strided_slice %229 {offsets = [0, 1, 0], sizes = [2, 16, 16], strides = [1, 1, 1]} : vector<2x22x16xf32> to vector<2x16x16xf32>
    %237 = vector.broadcast %235 : f32 to vector<2x16x16xf32>
    %238 = arith.mulf %237, %236 : vector<2x16x16xf32>
    %239 = arith.addf %234, %238 : vector<2x16x16xf32>
    %c20 = arith.constant 20 : index
    %240 = memref.load %arg1[%c20] : memref<98xf32, #tpu.memory_space<smem>>
    %241 = vector.extract_strided_slice %229 {offsets = [0, 2, 0], sizes = [2, 16, 16], strides = [1, 1, 1]} : vector<2x22x16xf32> to vector<2x16x16xf32>
    %242 = vector.broadcast %240 : f32 to vector<2x16x16xf32>
    %243 = arith.mulf %242, %241 : vector<2x16x16xf32>
    %244 = arith.addf %239, %243 : vector<2x16x16xf32>
    %c27 = arith.constant 27 : index
    %245 = memref.load %arg1[%c27] : memref<98xf32, #tpu.memory_space<smem>>
    %246 = vector.extract_strided_slice %229 {offsets = [0, 3, 0], sizes = [2, 16, 16], strides = [1, 1, 1]} : vector<2x22x16xf32> to vector<2x16x16xf32>
    %247 = vector.broadcast %245 : f32 to vector<2x16x16xf32>
    %248 = arith.mulf %247, %246 : vector<2x16x16xf32>
    %249 = arith.addf %244, %248 : vector<2x16x16xf32>
    %c34 = arith.constant 34 : index
    %250 = memref.load %arg1[%c34] : memref<98xf32, #tpu.memory_space<smem>>
    %251 = vector.extract_strided_slice %229 {offsets = [0, 4, 0], sizes = [2, 16, 16], strides = [1, 1, 1]} : vector<2x22x16xf32> to vector<2x16x16xf32>
    %252 = vector.broadcast %250 : f32 to vector<2x16x16xf32>
    %253 = arith.mulf %252, %251 : vector<2x16x16xf32>
    %254 = arith.addf %249, %253 : vector<2x16x16xf32>
    %c41 = arith.constant 41 : index
    %255 = memref.load %arg1[%c41] : memref<98xf32, #tpu.memory_space<smem>>
    %256 = vector.extract_strided_slice %229 {offsets = [0, 5, 0], sizes = [2, 16, 16], strides = [1, 1, 1]} : vector<2x22x16xf32> to vector<2x16x16xf32>
    %257 = vector.broadcast %255 : f32 to vector<2x16x16xf32>
    %258 = arith.mulf %257, %256 : vector<2x16x16xf32>
    %259 = arith.addf %254, %258 : vector<2x16x16xf32>
    %c48 = arith.constant 48 : index
    %260 = memref.load %arg1[%c48] : memref<98xf32, #tpu.memory_space<smem>>
    %261 = vector.extract_strided_slice %229 {offsets = [0, 6, 0], sizes = [2, 16, 16], strides = [1, 1, 1]} : vector<2x22x16xf32> to vector<2x16x16xf32>
    %262 = vector.broadcast %260 : f32 to vector<2x16x16xf32>
    %263 = arith.mulf %262, %261 : vector<2x16x16xf32>
    %264 = arith.addf %259, %263 : vector<2x16x16xf32>
    %265 = vector.extract_strided_slice %12 {offsets = [0, 0, 0], sizes = [2, 22, 16], strides = [1, 1, 1]} : vector<2x22x22xf32> to vector<2x22x16xf32>
    %c49 = arith.constant 49 : index
    %266 = memref.load %arg1[%c49] : memref<98xf32, #tpu.memory_space<smem>>
    %267 = vector.extract_strided_slice %265 {offsets = [0, 0, 0], sizes = [2, 16, 16], strides = [1, 1, 1]} : vector<2x22x16xf32> to vector<2x16x16xf32>
    %268 = vector.broadcast %266 : f32 to vector<2x16x16xf32>
    %269 = arith.mulf %268, %267 : vector<2x16x16xf32>
    %270 = arith.addf %264, %269 : vector<2x16x16xf32>
    %c56 = arith.constant 56 : index
    %271 = memref.load %arg1[%c56] : memref<98xf32, #tpu.memory_space<smem>>
    %272 = vector.extract_strided_slice %265 {offsets = [0, 1, 0], sizes = [2, 16, 16], strides = [1, 1, 1]} : vector<2x22x16xf32> to vector<2x16x16xf32>
    %273 = vector.broadcast %271 : f32 to vector<2x16x16xf32>
    %274 = arith.mulf %273, %272 : vector<2x16x16xf32>
    %275 = arith.addf %270, %274 : vector<2x16x16xf32>
    %c63 = arith.constant 63 : index
    %276 = memref.load %arg1[%c63] : memref<98xf32, #tpu.memory_space<smem>>
    %277 = vector.extract_strided_slice %265 {offsets = [0, 2, 0], sizes = [2, 16, 16], strides = [1, 1, 1]} : vector<2x22x16xf32> to vector<2x16x16xf32>
    %278 = vector.broadcast %276 : f32 to vector<2x16x16xf32>
    %279 = arith.mulf %278, %277 : vector<2x16x16xf32>
    %280 = arith.addf %275, %279 : vector<2x16x16xf32>
    %c70 = arith.constant 70 : index
    %281 = memref.load %arg1[%c70] : memref<98xf32, #tpu.memory_space<smem>>
    %282 = vector.extract_strided_slice %265 {offsets = [0, 3, 0], sizes = [2, 16, 16], strides = [1, 1, 1]} : vector<2x22x16xf32> to vector<2x16x16xf32>
    %283 = vector.broadcast %281 : f32 to vector<2x16x16xf32>
    %284 = arith.mulf %283, %282 : vector<2x16x16xf32>
    %285 = arith.addf %280, %284 : vector<2x16x16xf32>
    %c77 = arith.constant 77 : index
    %286 = memref.load %arg1[%c77] : memref<98xf32, #tpu.memory_space<smem>>
    %287 = vector.extract_strided_slice %265 {offsets = [0, 4, 0], sizes = [2, 16, 16], strides = [1, 1, 1]} : vector<2x22x16xf32> to vector<2x16x16xf32>
    %288 = vector.broadcast %286 : f32 to vector<2x16x16xf32>
    %289 = arith.mulf %288, %287 : vector<2x16x16xf32>
    %290 = arith.addf %285, %289 : vector<2x16x16xf32>
    %c84 = arith.constant 84 : index
    %291 = memref.load %arg1[%c84] : memref<98xf32, #tpu.memory_space<smem>>
    %292 = vector.extract_strided_slice %265 {offsets = [0, 5, 0], sizes = [2, 16, 16], strides = [1, 1, 1]} : vector<2x22x16xf32> to vector<2x16x16xf32>
    %293 = vector.broadcast %291 : f32 to vector<2x16x16xf32>
    %294 = arith.mulf %293, %292 : vector<2x16x16xf32>
    %295 = arith.addf %290, %294 : vector<2x16x16xf32>
    %c91 = arith.constant 91 : index
    %296 = memref.load %arg1[%c91] : memref<98xf32, #tpu.memory_space<smem>>
    %297 = vector.extract_strided_slice %265 {offsets = [0, 6, 0], sizes = [2, 16, 16], strides = [1, 1, 1]} : vector<2x22x16xf32> to vector<2x16x16xf32>
    %298 = vector.broadcast %296 : f32 to vector<2x16x16xf32>
    %299 = arith.mulf %298, %297 : vector<2x16x16xf32>
    %300 = arith.addf %295, %299 : vector<2x16x16xf32>
    %301 = vector.extract_strided_slice %12 {offsets = [0, 0, 1], sizes = [2, 22, 16], strides = [1, 1, 1]} : vector<2x22x22xf32> to vector<2x22x16xf32>
    %c50 = arith.constant 50 : index
    %302 = memref.load %arg1[%c50] : memref<98xf32, #tpu.memory_space<smem>>
    %303 = vector.extract_strided_slice %301 {offsets = [0, 0, 0], sizes = [2, 16, 16], strides = [1, 1, 1]} : vector<2x22x16xf32> to vector<2x16x16xf32>
    %304 = vector.broadcast %302 : f32 to vector<2x16x16xf32>
    %305 = arith.mulf %304, %303 : vector<2x16x16xf32>
    %306 = arith.addf %300, %305 : vector<2x16x16xf32>
    %c57 = arith.constant 57 : index
    %307 = memref.load %arg1[%c57] : memref<98xf32, #tpu.memory_space<smem>>
    %308 = vector.extract_strided_slice %301 {offsets = [0, 1, 0], sizes = [2, 16, 16], strides = [1, 1, 1]} : vector<2x22x16xf32> to vector<2x16x16xf32>
    %309 = vector.broadcast %307 : f32 to vector<2x16x16xf32>
    %310 = arith.mulf %309, %308 : vector<2x16x16xf32>
    %311 = arith.addf %306, %310 : vector<2x16x16xf32>
    %c64 = arith.constant 64 : index
    %312 = memref.load %arg1[%c64] : memref<98xf32, #tpu.memory_space<smem>>
    %313 = vector.extract_strided_slice %301 {offsets = [0, 2, 0], sizes = [2, 16, 16], strides = [1, 1, 1]} : vector<2x22x16xf32> to vector<2x16x16xf32>
    %314 = vector.broadcast %312 : f32 to vector<2x16x16xf32>
    %315 = arith.mulf %314, %313 : vector<2x16x16xf32>
    %316 = arith.addf %311, %315 : vector<2x16x16xf32>
    %c71 = arith.constant 71 : index
    %317 = memref.load %arg1[%c71] : memref<98xf32, #tpu.memory_space<smem>>
    %318 = vector.extract_strided_slice %301 {offsets = [0, 3, 0], sizes = [2, 16, 16], strides = [1, 1, 1]} : vector<2x22x16xf32> to vector<2x16x16xf32>
    %319 = vector.broadcast %317 : f32 to vector<2x16x16xf32>
    %320 = arith.mulf %319, %318 : vector<2x16x16xf32>
    %321 = arith.addf %316, %320 : vector<2x16x16xf32>
    %c78 = arith.constant 78 : index
    %322 = memref.load %arg1[%c78] : memref<98xf32, #tpu.memory_space<smem>>
    %323 = vector.extract_strided_slice %301 {offsets = [0, 4, 0], sizes = [2, 16, 16], strides = [1, 1, 1]} : vector<2x22x16xf32> to vector<2x16x16xf32>
    %324 = vector.broadcast %322 : f32 to vector<2x16x16xf32>
    %325 = arith.mulf %324, %323 : vector<2x16x16xf32>
    %326 = arith.addf %321, %325 : vector<2x16x16xf32>
    %c85 = arith.constant 85 : index
    %327 = memref.load %arg1[%c85] : memref<98xf32, #tpu.memory_space<smem>>
    %328 = vector.extract_strided_slice %301 {offsets = [0, 5, 0], sizes = [2, 16, 16], strides = [1, 1, 1]} : vector<2x22x16xf32> to vector<2x16x16xf32>
    %329 = vector.broadcast %327 : f32 to vector<2x16x16xf32>
    %330 = arith.mulf %329, %328 : vector<2x16x16xf32>
    %331 = arith.addf %326, %330 : vector<2x16x16xf32>
    %c92 = arith.constant 92 : index
    %332 = memref.load %arg1[%c92] : memref<98xf32, #tpu.memory_space<smem>>
    %333 = vector.extract_strided_slice %301 {offsets = [0, 6, 0], sizes = [2, 16, 16], strides = [1, 1, 1]} : vector<2x22x16xf32> to vector<2x16x16xf32>
    %334 = vector.broadcast %332 : f32 to vector<2x16x16xf32>
    %335 = arith.mulf %334, %333 : vector<2x16x16xf32>
    %336 = arith.addf %331, %335 : vector<2x16x16xf32>
    %337 = vector.extract_strided_slice %12 {offsets = [0, 0, 2], sizes = [2, 22, 16], strides = [1, 1, 1]} : vector<2x22x22xf32> to vector<2x22x16xf32>
    %c51 = arith.constant 51 : index
    %338 = memref.load %arg1[%c51] : memref<98xf32, #tpu.memory_space<smem>>
    %339 = vector.extract_strided_slice %337 {offsets = [0, 0, 0], sizes = [2, 16, 16], strides = [1, 1, 1]} : vector<2x22x16xf32> to vector<2x16x16xf32>
    %340 = vector.broadcast %338 : f32 to vector<2x16x16xf32>
    %341 = arith.mulf %340, %339 : vector<2x16x16xf32>
    %342 = arith.addf %336, %341 : vector<2x16x16xf32>
    %c58 = arith.constant 58 : index
    %343 = memref.load %arg1[%c58] : memref<98xf32, #tpu.memory_space<smem>>
    %344 = vector.extract_strided_slice %337 {offsets = [0, 1, 0], sizes = [2, 16, 16], strides = [1, 1, 1]} : vector<2x22x16xf32> to vector<2x16x16xf32>
    %345 = vector.broadcast %343 : f32 to vector<2x16x16xf32>
    %346 = arith.mulf %345, %344 : vector<2x16x16xf32>
    %347 = arith.addf %342, %346 : vector<2x16x16xf32>
    %c65 = arith.constant 65 : index
    %348 = memref.load %arg1[%c65] : memref<98xf32, #tpu.memory_space<smem>>
    %349 = vector.extract_strided_slice %337 {offsets = [0, 2, 0], sizes = [2, 16, 16], strides = [1, 1, 1]} : vector<2x22x16xf32> to vector<2x16x16xf32>
    %350 = vector.broadcast %348 : f32 to vector<2x16x16xf32>
    %351 = arith.mulf %350, %349 : vector<2x16x16xf32>
    %352 = arith.addf %347, %351 : vector<2x16x16xf32>
    %c72 = arith.constant 72 : index
    %353 = memref.load %arg1[%c72] : memref<98xf32, #tpu.memory_space<smem>>
    %354 = vector.extract_strided_slice %337 {offsets = [0, 3, 0], sizes = [2, 16, 16], strides = [1, 1, 1]} : vector<2x22x16xf32> to vector<2x16x16xf32>
    %355 = vector.broadcast %353 : f32 to vector<2x16x16xf32>
    %356 = arith.mulf %355, %354 : vector<2x16x16xf32>
    %357 = arith.addf %352, %356 : vector<2x16x16xf32>
    %c79 = arith.constant 79 : index
    %358 = memref.load %arg1[%c79] : memref<98xf32, #tpu.memory_space<smem>>
    %359 = vector.extract_strided_slice %337 {offsets = [0, 4, 0], sizes = [2, 16, 16], strides = [1, 1, 1]} : vector<2x22x16xf32> to vector<2x16x16xf32>
    %360 = vector.broadcast %358 : f32 to vector<2x16x16xf32>
    %361 = arith.mulf %360, %359 : vector<2x16x16xf32>
    %362 = arith.addf %357, %361 : vector<2x16x16xf32>
    %c86 = arith.constant 86 : index
    %363 = memref.load %arg1[%c86] : memref<98xf32, #tpu.memory_space<smem>>
    %364 = vector.extract_strided_slice %337 {offsets = [0, 5, 0], sizes = [2, 16, 16], strides = [1, 1, 1]} : vector<2x22x16xf32> to vector<2x16x16xf32>
    %365 = vector.broadcast %363 : f32 to vector<2x16x16xf32>
    %366 = arith.mulf %365, %364 : vector<2x16x16xf32>
    %367 = arith.addf %362, %366 : vector<2x16x16xf32>
    %c93 = arith.constant 93 : index
    %368 = memref.load %arg1[%c93] : memref<98xf32, #tpu.memory_space<smem>>
    %369 = vector.extract_strided_slice %337 {offsets = [0, 6, 0], sizes = [2, 16, 16], strides = [1, 1, 1]} : vector<2x22x16xf32> to vector<2x16x16xf32>
    %370 = vector.broadcast %368 : f32 to vector<2x16x16xf32>
    %371 = arith.mulf %370, %369 : vector<2x16x16xf32>
    %372 = arith.addf %367, %371 : vector<2x16x16xf32>
    %373 = vector.extract_strided_slice %12 {offsets = [0, 0, 3], sizes = [2, 22, 16], strides = [1, 1, 1]} : vector<2x22x22xf32> to vector<2x22x16xf32>
    %c52 = arith.constant 52 : index
    %374 = memref.load %arg1[%c52] : memref<98xf32, #tpu.memory_space<smem>>
    %375 = vector.extract_strided_slice %373 {offsets = [0, 0, 0], sizes = [2, 16, 16], strides = [1, 1, 1]} : vector<2x22x16xf32> to vector<2x16x16xf32>
    %376 = vector.broadcast %374 : f32 to vector<2x16x16xf32>
    %377 = arith.mulf %376, %375 : vector<2x16x16xf32>
    %378 = arith.addf %372, %377 : vector<2x16x16xf32>
    %c59 = arith.constant 59 : index
    %379 = memref.load %arg1[%c59] : memref<98xf32, #tpu.memory_space<smem>>
    %380 = vector.extract_strided_slice %373 {offsets = [0, 1, 0], sizes = [2, 16, 16], strides = [1, 1, 1]} : vector<2x22x16xf32> to vector<2x16x16xf32>
    %381 = vector.broadcast %379 : f32 to vector<2x16x16xf32>
    %382 = arith.mulf %381, %380 : vector<2x16x16xf32>
    %383 = arith.addf %378, %382 : vector<2x16x16xf32>
    %c66 = arith.constant 66 : index
    %384 = memref.load %arg1[%c66] : memref<98xf32, #tpu.memory_space<smem>>
    %385 = vector.extract_strided_slice %373 {offsets = [0, 2, 0], sizes = [2, 16, 16], strides = [1, 1, 1]} : vector<2x22x16xf32> to vector<2x16x16xf32>
    %386 = vector.broadcast %384 : f32 to vector<2x16x16xf32>
    %387 = arith.mulf %386, %385 : vector<2x16x16xf32>
    %388 = arith.addf %383, %387 : vector<2x16x16xf32>
    %c73 = arith.constant 73 : index
    %389 = memref.load %arg1[%c73] : memref<98xf32, #tpu.memory_space<smem>>
    %390 = vector.extract_strided_slice %373 {offsets = [0, 3, 0], sizes = [2, 16, 16], strides = [1, 1, 1]} : vector<2x22x16xf32> to vector<2x16x16xf32>
    %391 = vector.broadcast %389 : f32 to vector<2x16x16xf32>
    %392 = arith.mulf %391, %390 : vector<2x16x16xf32>
    %393 = arith.addf %388, %392 : vector<2x16x16xf32>
    %c80 = arith.constant 80 : index
    %394 = memref.load %arg1[%c80] : memref<98xf32, #tpu.memory_space<smem>>
    %395 = vector.extract_strided_slice %373 {offsets = [0, 4, 0], sizes = [2, 16, 16], strides = [1, 1, 1]} : vector<2x22x16xf32> to vector<2x16x16xf32>
    %396 = vector.broadcast %394 : f32 to vector<2x16x16xf32>
    %397 = arith.mulf %396, %395 : vector<2x16x16xf32>
    %398 = arith.addf %393, %397 : vector<2x16x16xf32>
    %c87 = arith.constant 87 : index
    %399 = memref.load %arg1[%c87] : memref<98xf32, #tpu.memory_space<smem>>
    %400 = vector.extract_strided_slice %373 {offsets = [0, 5, 0], sizes = [2, 16, 16], strides = [1, 1, 1]} : vector<2x22x16xf32> to vector<2x16x16xf32>
    %401 = vector.broadcast %399 : f32 to vector<2x16x16xf32>
    %402 = arith.mulf %401, %400 : vector<2x16x16xf32>
    %403 = arith.addf %398, %402 : vector<2x16x16xf32>
    %c94 = arith.constant 94 : index
    %404 = memref.load %arg1[%c94] : memref<98xf32, #tpu.memory_space<smem>>
    %405 = vector.extract_strided_slice %373 {offsets = [0, 6, 0], sizes = [2, 16, 16], strides = [1, 1, 1]} : vector<2x22x16xf32> to vector<2x16x16xf32>
    %406 = vector.broadcast %404 : f32 to vector<2x16x16xf32>
    %407 = arith.mulf %406, %405 : vector<2x16x16xf32>
    %408 = arith.addf %403, %407 : vector<2x16x16xf32>
    %409 = vector.extract_strided_slice %12 {offsets = [0, 0, 4], sizes = [2, 22, 16], strides = [1, 1, 1]} : vector<2x22x22xf32> to vector<2x22x16xf32>
    %c53 = arith.constant 53 : index
    %410 = memref.load %arg1[%c53] : memref<98xf32, #tpu.memory_space<smem>>
    %411 = vector.extract_strided_slice %409 {offsets = [0, 0, 0], sizes = [2, 16, 16], strides = [1, 1, 1]} : vector<2x22x16xf32> to vector<2x16x16xf32>
    %412 = vector.broadcast %410 : f32 to vector<2x16x16xf32>
    %413 = arith.mulf %412, %411 : vector<2x16x16xf32>
    %414 = arith.addf %408, %413 : vector<2x16x16xf32>
    %c60 = arith.constant 60 : index
    %415 = memref.load %arg1[%c60] : memref<98xf32, #tpu.memory_space<smem>>
    %416 = vector.extract_strided_slice %409 {offsets = [0, 1, 0], sizes = [2, 16, 16], strides = [1, 1, 1]} : vector<2x22x16xf32> to vector<2x16x16xf32>
    %417 = vector.broadcast %415 : f32 to vector<2x16x16xf32>
    %418 = arith.mulf %417, %416 : vector<2x16x16xf32>
    %419 = arith.addf %414, %418 : vector<2x16x16xf32>
    %c67 = arith.constant 67 : index
    %420 = memref.load %arg1[%c67] : memref<98xf32, #tpu.memory_space<smem>>
    %421 = vector.extract_strided_slice %409 {offsets = [0, 2, 0], sizes = [2, 16, 16], strides = [1, 1, 1]} : vector<2x22x16xf32> to vector<2x16x16xf32>
    %422 = vector.broadcast %420 : f32 to vector<2x16x16xf32>
    %423 = arith.mulf %422, %421 : vector<2x16x16xf32>
    %424 = arith.addf %419, %423 : vector<2x16x16xf32>
    %c74 = arith.constant 74 : index
    %425 = memref.load %arg1[%c74] : memref<98xf32, #tpu.memory_space<smem>>
    %426 = vector.extract_strided_slice %409 {offsets = [0, 3, 0], sizes = [2, 16, 16], strides = [1, 1, 1]} : vector<2x22x16xf32> to vector<2x16x16xf32>
    %427 = vector.broadcast %425 : f32 to vector<2x16x16xf32>
    %428 = arith.mulf %427, %426 : vector<2x16x16xf32>
    %429 = arith.addf %424, %428 : vector<2x16x16xf32>
    %c81 = arith.constant 81 : index
    %430 = memref.load %arg1[%c81] : memref<98xf32, #tpu.memory_space<smem>>
    %431 = vector.extract_strided_slice %409 {offsets = [0, 4, 0], sizes = [2, 16, 16], strides = [1, 1, 1]} : vector<2x22x16xf32> to vector<2x16x16xf32>
    %432 = vector.broadcast %430 : f32 to vector<2x16x16xf32>
    %433 = arith.mulf %432, %431 : vector<2x16x16xf32>
    %434 = arith.addf %429, %433 : vector<2x16x16xf32>
    %c88 = arith.constant 88 : index
    %435 = memref.load %arg1[%c88] : memref<98xf32, #tpu.memory_space<smem>>
    %436 = vector.extract_strided_slice %409 {offsets = [0, 5, 0], sizes = [2, 16, 16], strides = [1, 1, 1]} : vector<2x22x16xf32> to vector<2x16x16xf32>
    %437 = vector.broadcast %435 : f32 to vector<2x16x16xf32>
    %438 = arith.mulf %437, %436 : vector<2x16x16xf32>
    %439 = arith.addf %434, %438 : vector<2x16x16xf32>
    %c95 = arith.constant 95 : index
    %440 = memref.load %arg1[%c95] : memref<98xf32, #tpu.memory_space<smem>>
    %441 = vector.extract_strided_slice %409 {offsets = [0, 6, 0], sizes = [2, 16, 16], strides = [1, 1, 1]} : vector<2x22x16xf32> to vector<2x16x16xf32>
    %442 = vector.broadcast %440 : f32 to vector<2x16x16xf32>
    %443 = arith.mulf %442, %441 : vector<2x16x16xf32>
    %444 = arith.addf %439, %443 : vector<2x16x16xf32>
    %445 = vector.extract_strided_slice %12 {offsets = [0, 0, 5], sizes = [2, 22, 16], strides = [1, 1, 1]} : vector<2x22x22xf32> to vector<2x22x16xf32>
    %c54 = arith.constant 54 : index
    %446 = memref.load %arg1[%c54] : memref<98xf32, #tpu.memory_space<smem>>
    %447 = vector.extract_strided_slice %445 {offsets = [0, 0, 0], sizes = [2, 16, 16], strides = [1, 1, 1]} : vector<2x22x16xf32> to vector<2x16x16xf32>
    %448 = vector.broadcast %446 : f32 to vector<2x16x16xf32>
    %449 = arith.mulf %448, %447 : vector<2x16x16xf32>
    %450 = arith.addf %444, %449 : vector<2x16x16xf32>
    %c61 = arith.constant 61 : index
    %451 = memref.load %arg1[%c61] : memref<98xf32, #tpu.memory_space<smem>>
    %452 = vector.extract_strided_slice %445 {offsets = [0, 1, 0], sizes = [2, 16, 16], strides = [1, 1, 1]} : vector<2x22x16xf32> to vector<2x16x16xf32>
    %453 = vector.broadcast %451 : f32 to vector<2x16x16xf32>
    %454 = arith.mulf %453, %452 : vector<2x16x16xf32>
    %455 = arith.addf %450, %454 : vector<2x16x16xf32>
    %c68 = arith.constant 68 : index
    %456 = memref.load %arg1[%c68] : memref<98xf32, #tpu.memory_space<smem>>
    %457 = vector.extract_strided_slice %445 {offsets = [0, 2, 0], sizes = [2, 16, 16], strides = [1, 1, 1]} : vector<2x22x16xf32> to vector<2x16x16xf32>
    %458 = vector.broadcast %456 : f32 to vector<2x16x16xf32>
    %459 = arith.mulf %458, %457 : vector<2x16x16xf32>
    %460 = arith.addf %455, %459 : vector<2x16x16xf32>
    %c75 = arith.constant 75 : index
    %461 = memref.load %arg1[%c75] : memref<98xf32, #tpu.memory_space<smem>>
    %462 = vector.extract_strided_slice %445 {offsets = [0, 3, 0], sizes = [2, 16, 16], strides = [1, 1, 1]} : vector<2x22x16xf32> to vector<2x16x16xf32>
    %463 = vector.broadcast %461 : f32 to vector<2x16x16xf32>
    %464 = arith.mulf %463, %462 : vector<2x16x16xf32>
    %465 = arith.addf %460, %464 : vector<2x16x16xf32>
    %c82 = arith.constant 82 : index
    %466 = memref.load %arg1[%c82] : memref<98xf32, #tpu.memory_space<smem>>
    %467 = vector.extract_strided_slice %445 {offsets = [0, 4, 0], sizes = [2, 16, 16], strides = [1, 1, 1]} : vector<2x22x16xf32> to vector<2x16x16xf32>
    %468 = vector.broadcast %466 : f32 to vector<2x16x16xf32>
    %469 = arith.mulf %468, %467 : vector<2x16x16xf32>
    %470 = arith.addf %465, %469 : vector<2x16x16xf32>
    %c89 = arith.constant 89 : index
    %471 = memref.load %arg1[%c89] : memref<98xf32, #tpu.memory_space<smem>>
    %472 = vector.extract_strided_slice %445 {offsets = [0, 5, 0], sizes = [2, 16, 16], strides = [1, 1, 1]} : vector<2x22x16xf32> to vector<2x16x16xf32>
    %473 = vector.broadcast %471 : f32 to vector<2x16x16xf32>
    %474 = arith.mulf %473, %472 : vector<2x16x16xf32>
    %475 = arith.addf %470, %474 : vector<2x16x16xf32>
    %c96 = arith.constant 96 : index
    %476 = memref.load %arg1[%c96] : memref<98xf32, #tpu.memory_space<smem>>
    %477 = vector.extract_strided_slice %445 {offsets = [0, 6, 0], sizes = [2, 16, 16], strides = [1, 1, 1]} : vector<2x22x16xf32> to vector<2x16x16xf32>
    %478 = vector.broadcast %476 : f32 to vector<2x16x16xf32>
    %479 = arith.mulf %478, %477 : vector<2x16x16xf32>
    %480 = arith.addf %475, %479 : vector<2x16x16xf32>
    %481 = vector.extract_strided_slice %12 {offsets = [0, 0, 6], sizes = [2, 22, 16], strides = [1, 1, 1]} : vector<2x22x22xf32> to vector<2x22x16xf32>
    %c55 = arith.constant 55 : index
    %482 = memref.load %arg1[%c55] : memref<98xf32, #tpu.memory_space<smem>>
    %483 = vector.extract_strided_slice %481 {offsets = [0, 0, 0], sizes = [2, 16, 16], strides = [1, 1, 1]} : vector<2x22x16xf32> to vector<2x16x16xf32>
    %484 = vector.broadcast %482 : f32 to vector<2x16x16xf32>
    %485 = arith.mulf %484, %483 : vector<2x16x16xf32>
    %486 = arith.addf %480, %485 : vector<2x16x16xf32>
    %c62 = arith.constant 62 : index
    %487 = memref.load %arg1[%c62] : memref<98xf32, #tpu.memory_space<smem>>
    %488 = vector.extract_strided_slice %481 {offsets = [0, 1, 0], sizes = [2, 16, 16], strides = [1, 1, 1]} : vector<2x22x16xf32> to vector<2x16x16xf32>
    %489 = vector.broadcast %487 : f32 to vector<2x16x16xf32>
    %490 = arith.mulf %489, %488 : vector<2x16x16xf32>
    %491 = arith.addf %486, %490 : vector<2x16x16xf32>
    %c69 = arith.constant 69 : index
    %492 = memref.load %arg1[%c69] : memref<98xf32, #tpu.memory_space<smem>>
    %493 = vector.extract_strided_slice %481 {offsets = [0, 2, 0], sizes = [2, 16, 16], strides = [1, 1, 1]} : vector<2x22x16xf32> to vector<2x16x16xf32>
    %494 = vector.broadcast %492 : f32 to vector<2x16x16xf32>
    %495 = arith.mulf %494, %493 : vector<2x16x16xf32>
    %496 = arith.addf %491, %495 : vector<2x16x16xf32>
    %c76 = arith.constant 76 : index
    %497 = memref.load %arg1[%c76] : memref<98xf32, #tpu.memory_space<smem>>
    %498 = vector.extract_strided_slice %481 {offsets = [0, 3, 0], sizes = [2, 16, 16], strides = [1, 1, 1]} : vector<2x22x16xf32> to vector<2x16x16xf32>
    %499 = vector.broadcast %497 : f32 to vector<2x16x16xf32>
    %500 = arith.mulf %499, %498 : vector<2x16x16xf32>
    %501 = arith.addf %496, %500 : vector<2x16x16xf32>
    %c83 = arith.constant 83 : index
    %502 = memref.load %arg1[%c83] : memref<98xf32, #tpu.memory_space<smem>>
    %503 = vector.extract_strided_slice %481 {offsets = [0, 4, 0], sizes = [2, 16, 16], strides = [1, 1, 1]} : vector<2x22x16xf32> to vector<2x16x16xf32>
    %504 = vector.broadcast %502 : f32 to vector<2x16x16xf32>
    %505 = arith.mulf %504, %503 : vector<2x16x16xf32>
    %506 = arith.addf %501, %505 : vector<2x16x16xf32>
    %c90 = arith.constant 90 : index
    %507 = memref.load %arg1[%c90] : memref<98xf32, #tpu.memory_space<smem>>
    %508 = vector.extract_strided_slice %481 {offsets = [0, 5, 0], sizes = [2, 16, 16], strides = [1, 1, 1]} : vector<2x22x16xf32> to vector<2x16x16xf32>
    %509 = vector.broadcast %507 : f32 to vector<2x16x16xf32>
    %510 = arith.mulf %509, %508 : vector<2x16x16xf32>
    %511 = arith.addf %506, %510 : vector<2x16x16xf32>
    %c97 = arith.constant 97 : index
    %512 = memref.load %arg1[%c97] : memref<98xf32, #tpu.memory_space<smem>>
    %513 = vector.extract_strided_slice %481 {offsets = [0, 6, 0], sizes = [2, 16, 16], strides = [1, 1, 1]} : vector<2x22x16xf32> to vector<2x16x16xf32>
    %514 = vector.broadcast %512 : f32 to vector<2x16x16xf32>
    %515 = arith.mulf %514, %513 : vector<2x16x16xf32>
    %516 = arith.addf %511, %515 : vector<2x16x16xf32>
    %517 = arith.negf %516 : vector<2x16x16xf32>
    %518 = math.exp %517 : vector<2x16x16xf32>
    %cst_26 = arith.constant 1.000000e+00 : f32
    %519 = vector.broadcast %cst_26 : f32 to vector<2x16x16xf32>
    %520 = arith.addf %519, %518 : vector<2x16x16xf32>
    %521 = arith.divf %519, %520 : vector<2x16x16xf32>
    %522 = vector.shape_cast %521 : vector<2x16x16xf32> to vector<2x1x16x16xf32>
    %523 = vector.broadcast %522 : vector<2x1x16x16xf32> to vector<2x4x16x16xf32>
    %524 = arith.mulf %0, %523 : vector<2x4x16x16xf32>
    %c0_27 = arith.constant 0 : index
    %c0_28 = arith.constant 0 : index
    %c0_29 = arith.constant 0 : index
    %c0_30 = arith.constant 0 : index
    %525 = vector.load %arg4[%c0_27, %c0_28, %c0_29, %c0_30] : memref<2x4x16x16xf32, #tpu.memory_space<vmem>>, vector<2x4x16x16xf32>
    tpu.vector_store %arg4[%c0_27, %c0_28, %c0_29, %c0_30], %524 {strides = array<i32>} : memref<2x4x16x16xf32, #tpu.memory_space<vmem>>, vector<2x4x16x16xf32>,
    return
  }
  func.func @transform_0(%arg0: i32) -> i32 {
    %c0_i32 = arith.constant 0 : i32
    %c0_i32_0 = arith.constant 0 : i32
    return %c0_i32 : i32
  }
  func.func @transform_1(%arg0: i32) -> i32 {
    %c0_i32 = arith.constant 0 : i32
    %c0_i32_0 = arith.constant 0 : i32
    return %c0_i32 : i32
  }
  func.func @transform_2(%arg0: i32) -> (i32, i32, i32, i32) {
    %c0_i32 = arith.constant 0 : i32
    %c0_i32_0 = arith.constant 0 : i32
    %c0_i32_1 = arith.constant 0 : i32
    %c0_i32_2 = arith.constant 0 : i32
    return %arg0, %c0_i32, %c0_i32_0, %c0_i32_1 : i32, i32, i32, i32
  }
  func.func @transform_3(%arg0: i32) -> (i32, i32, i32, i32) {
    %c0_i32 = arith.constant 0 : i32
    %c0_i32_0 = arith.constant 0 : i32
    %c0_i32_1 = arith.constant 0 : i32
    %c0_i32_2 = arith.constant 0 : i32
    return %arg0, %c0_i32, %c0_i32_0, %c0_i32_1 : i32, i32, i32, i32
  }
}

</mosaic_0001>

<bundles_post_ra>
// kernel: tpu_custom_call.1
= control target key start
LH: loop header
LB: loop body
LE: loop exit
PB: predicated region body
PF: predicated region fallthrough
CT: control target
= control target key end

     0   :  { %9 = vsyncpa [#allocation8], 0  ;;  %s6872_s0 = inlined_call_operand.vmem [shape: f32[98], index: 0, kind: input, shape index: {}]   ;;  %s6873_s1 = inlined_call_operand.<no memory space> [shape: f32[1], index: 1, kind: input, shape index: {}]   ;;  %s6874_s2 = inlined_call_operand.hbm [shape: f32[2,4,16,16], index: 2, kind: input, shape index: {}]   ;;  %s6875_s3 = inlined_call_operand.hbm [shape: f32[2,4,16,16], index: 3, kind: output, shape index: {}]  }
   0x1   :  { %10 = vsyncpa [#allocation6], 0 }
   0x2   :  { %11 = vsyncpa [#allocation7], 0  ;;  %s18_s14 = sshll.u32 %s6872_s0, 4  ;;  %s19_s14 = int_to_ptr.vmem [resolvable:$true] %s18_s14 }
   0x3   :  { %s4031_s15 = scalar_lea.vmem %s19_s14, 16  ;;  %p4036_p1 = scmp.lt.s32.totalorder %s19_s14, %s19_s14 }
   0x4   :  { %p4032_p0 = scmp.ne.s32.totalorder %s19_s14, %s4031_s15  ;;  %p4037_p2 = scmp.lt.s32.totalorder %s4031_s15, %s4031_s15 }
   0x6   :  { %p4038_p3 = por %p4037_p2, %p4036_p1 }
   0x8   :  { %p4039_p4 = pnand %p4038_p3, %p4032_p0 }
   0xa   :  { %4042 = shalt.err (!%p4039_p4)
}
   0xb   :  { %s4089_s16 = smov [#allocation5]   ;;  %s4090_s17 = smov [#allocation9]  }
   0xc   :  { %21 = dma.vmem_to_smem %s19_s14, 16, %s4089_s16, [#allocation8]  }
   0xd   :  { %s29_s18 = sshll.u32 %s4090_s17, 4  ;;  %s30_s18 = int_to_ptr.vmem [resolvable:$true] %s29_s18 }
   0xe   :  { %s4051_s19 = scalar_lea.vmem %s30_s18, 2048  ;;  %p4056_p6 = scmp.lt.s32.totalorder %s30_s18, %s30_s18 }
   0xf   :  { %p4052_p5 = scmp.ne.s32.totalorder %s30_s18, %s4051_s19  ;;  %p4057_p7 = scmp.lt.s32.totalorder %s4051_s19, %s4051_s19 }
  0x11   :  { %p4058_p8 = por %p4057_p7, %p4056_p6 }
  0x13   :  { %p4059_p9 = pnand %p4058_p8, %p4052_p5 }
  0x15   :  { %4062 = shalt.err (!%p4059_p9)
}
  0x16   :  { %s4091_s0 = smov 128   ;;  %s4092_s20 = smov 8  }
  0x17   :  { %35 = dma.hbm_to_vmem [thread:$0]  %s6874_s2, 2048, %s30_s18, [#allocation6], %s4091_s0, %s4091_s0, %s4092_s20  }
  0x18   :  { %4083 = dma.done.wait [#allocation8], 16  }
  0x19   :  { %4084 = vsyncadd [#allocation8], 4294967280 }
  0x1a   :  { %4085 = dma.done.wait [#allocation6], 2048  }
  0x1b   :  { %4086 = vsyncadd [#allocation6], 4294965248 }
  0x1c   :  { %42 = sfence }
  0x1d   :  { %v4131_v0 = vld [vmem:[#allocation9 + $0x40] sm:$0xff]  ;;  %v4133_v1 = vld [vmem:[#allocation9 + $0x50] sm:$0xff]  ;;  %vm59_vm0 = vcmask 130048   ;;  %v4147_v14 = vld [vmem:[#allocation9 + $0x48] sm:$0xff]  ;;  %vm116_vm1 = vcmask 179200   ;;  %s4093_s2 = smov 3  }
  0x1e   :  { %v4135_v2 = vld [vmem:[#allocation9 + $0x60] sm:$0xff]  ;;  %v4137_v3 = vld [vmem:[#allocation9 + $0x70] sm:$0xff]  ;;  %v74_v4 = vsel %vm59_vm0, %v4131_v0, -inf  ;;  %v75_v5 = vsel %vm59_vm0, %v4133_v1, -inf  ;;  %v4152_v18 = vld [vmem:[#allocation9 + $0x58] sm:$0xff]  ;;  %v81_v21 = vsel %vm59_vm0, %v4147_v14, -inf }
  0x1f   :  { %v77_v6 = vsel %vm59_vm0, %v4135_v2, -inf  ;;  %v43_v7 = vld [vmem:[#allocation9] sm:$0xff]  ;;  %v45_v8 = vld [vmem:[#allocation9 + $0x10] sm:$0xff]  ;;  %v76_v9 = vmax.f32 %v74_v4, %v75_v5  ;;  %v79_v15 = vsel %vm59_vm0, %v4137_v3, -inf  ;;  %v4154_v19 = vld [vmem:[#allocation9 + $0x68] sm:$0xff]  ;;  %v82_v24 = vsel %vm59_vm0, %v4152_v18, -inf }
  0x20   :  { %v47_v10 = vld [vmem:[#allocation9 + $0x20] sm:$0xff]  ;;  %v49_v11 = vld [vmem:[#allocation9 + $0x30] sm:$0xff]  ;;  %v60_v12 = vsel %vm59_vm0, %v43_v7, -inf  ;;  %v61_v13 = vsel %vm59_vm0, %v45_v8, -inf  ;;  %v4156_v20 = vld [vmem:[#allocation9 + $0x78] sm:$0xff]  ;;  %v84_v25 = vsel %vm59_vm0, %v4154_v19, -inf  ;;  %v83_v30 = vmax.f32 %v81_v21, %v82_v24 }
  0x21   :  { %v62_v16 = vmax.f32 %v60_v12, %v61_v13  ;;  %v63_v17 = vsel %vm59_vm0, %v47_v10, -inf  ;;  %v78_v22 = vmax.f32 %v76_v9, %v77_v6  ;;  %v65_v23 = vsel %vm59_vm0, %v49_v11, -inf  ;;  %v44_v26 = vld [vmem:[#allocation9 + $0x8] sm:$0xff]  ;;  %v46_v27 = vld [vmem:[#allocation9 + $0x18] sm:$0xff]  ;;  %s3867_s23 = sld [smem:[#allocation5 + $0x1]]  ;;  %s4095_s25 = smov 127  }
  0x22   :  { %v48_v28 = vld [vmem:[#allocation9 + $0x28] sm:$0xff]  ;;  %v50_v31 = vld [vmem:[#allocation9 + $0x38] sm:$0xff]  ;;  %v67_v32 = vsel %vm59_vm0, %v44_v26, -inf  ;;  %v68_v33 = vsel %vm59_vm0, %v46_v27, -inf  ;;  %v86_v35 = vsel %vm59_vm0, %v4156_v20, -inf  ;;  %v85_v39 = vmax.f32 %v83_v30, %v84_v25  ;;  %s3874_s24 = sld [smem:[#allocation5 + $0x2]] }
  0x23   :  { %v64_v29 = vmax.f32 %v62_v16, %v63_v17  ;;  %v80_v34 = vmax.f32 %v78_v22, %v79_v15  ;;  %v69_v36 = vmax.f32 %v67_v32, %v68_v33  ;;  %v70_v37 = vsel %vm59_vm0, %v48_v28, -inf  ;;  %s3881_s26 = sld [smem:[#allocation5 + $0x3]]  ;;  %s4096_s28 = smov 126  }
  0x24   :  { %v72_v40 = vsel %vm59_vm0, %v50_v31, -inf  ;;  %v4094_v42 = vmov 0.0   ;;  %v88_v43 = vsel %vm59_vm0, %v43_v7, 0.0  ;;  %v89_v44 = vsel %vm59_vm0, %v45_v8, 0.0  ;;  %s3868_s27 = sld [smem:[#allocation5 + $0x8]]  ;;  %s4097_s30 = smov 125  }
  0x25   :  { %v66_v38 = vmax.f32 %v64_v29, %v65_v23  ;;  %138 = vrot.lane.b32.xlu1 %v80_v34, %s4093_s2  ;;  %v71_v41 = vmax.f32 %v69_v36, %v70_v37  ;;  %121 = vst.msk [vmem:[#allocation2 + $0x18] sm:$0xff] %vm116_vm1, %v4094_v42  ;;  %122 = vst.msk [vmem:[#allocation2 + $0x20] sm:$0xff] %vm116_vm1, %v4094_v42  ;;  %v91_v45 = vsel %vm59_vm0, %v47_v10, 0.0  ;;  %v93_v48 = vsel %vm59_vm0, %v49_v11, 0.0  ;;  %s3869_s29 = sld [smem:[#allocation5 + $0xf]] }
  0x26   :  { %117 = vst.msk [vmem:[#allocation2] sm:$0xff] %vm116_vm1, %v4094_v42  ;;  %118 = vst.msk [vmem:[#allocation2 + $0x8] sm:$0xff] %vm116_vm1, %v4094_v42  ;;  %v87_v46 = vmax.f32 %v85_v39, %v86_v35  ;;  %v90_v47 = vadd.f32 %v89_v44, %v88_v43  ;;  %vm119_vm2 = vcmask 177152   ;;  %v95_v50 = vsel %vm59_vm0, %v44_v26, 0.0  ;;  %s3870_s4 = sld [smem:[#allocation5 + $0x16]] }
  0x27   :  { %124 = vst.msk [vmem:[#allocation3] sm:$0xff] %vm116_vm1, %v4094_v42  ;;  %125 = vst.msk [vmem:[#allocation3 + $0x8] sm:$0xff] %vm116_vm1, %v4094_v42  ;;  %134 = vrot.lane.b32.xlu0 %v66_v38, %s4093_s2  ;;  %v73_v49 = vmax.f32 %v71_v41, %v72_v40  ;;  %v96_v51 = vsel %vm59_vm0, %v46_v27, 0.0  ;;  %v98_v52 = vsel %vm59_vm0, %v48_v28, 0.0  ;;  %v102_v55 = vsel %vm59_vm0, %v4131_v0, 0.0  ;;  %s3871_s5 = sld [smem:[#allocation5 + $0x1d]] }
  0x28   :  { %127 = vst.msk [vmem:[#allocation3 + $0x18] sm:$0xff] %vm116_vm1, %v4094_v42  ;;  %128 = vst.msk [vmem:[#allocation3 + $0x20] sm:$0xff] %vm116_vm1, %v4094_v42  ;;  %v92_v53 = vadd.f32 %v91_v45, %v90_v47  ;;  %v97_v54 = vadd.f32 %v96_v51, %v95_v50  ;;  %v100_v56 = vsel %vm59_vm0, %v50_v31, 0.0  ;;  %v103_v57 = vsel %vm59_vm0, %v4133_v1, 0.0  ;;  %s3872_s6 = sld [smem:[#allocation5 + $0x24]] }
  0x29   :  { %123 = vst.msk [vmem:[#allocation2 + $0x28] sm:$0x3f] %vm119_vm2, %v4094_v42  ;;  %120 = vst.msk [vmem:[#allocation2 + $0x10] sm:$0x3f] %vm119_vm2, %v4094_v42  ;;  %140 = vrot.lane.b32.xlu1 %v87_v46, %s4093_s2  ;;  %v105_v58 = vsel %vm59_vm0, %v4135_v2, 0.0  ;;  %v109_v59 = vsel %vm59_vm0, %v4147_v14, 0.0  ;;  %v104_v62 = vadd.f32 %v103_v57, %v102_v55  ;;  %v394_v13 = vstv %s3867_s23 }
  0x2a   :  { %126 = vst.msk [vmem:[#allocation3 + $0x10] sm:$0x3f] %vm119_vm2, %v4094_v42  ;;  %129 = vst.msk [vmem:[#allocation3 + $0x28] sm:$0x3f] %vm119_vm2, %v4094_v42  ;;  %v94_v60 = vadd.f32 %v93_v48, %v92_v53  ;;  %v99_v61 = vadd.f32 %v98_v52, %v97_v54  ;;  %v110_v63 = vsel %vm59_vm0, %v4152_v18, 0.0  ;;  %v107_v0 = vsel %vm59_vm0, %v4137_v3, 0.0 }
  0x2b   :  { %136 = vrot.lane.b32.xlu0 %v73_v49, %s4093_s2  ;;  %v111_v4 = vadd.f32 %v110_v63, %v109_v59  ;;  %v112_v1 = vsel %vm59_vm0, %v4154_v19, 0.0  ;;  %v106_v2 = vadd.f32 %v105_v58, %v104_v62  ;;  %v114_v6 = vsel %vm59_vm0, %v4156_v20, 0.0  ;;  %s3873_s7 = sld [smem:[#allocation5 + $0x2b]]  ;;  %s4098_s23 = smov 124  }
  0x2c   :  { %v101_v5 = vadd.f32 %v100_v56, %v99_v61  ;;  %vm146_vm3 = vcmask 154648   ;;  %v660_v25 = vstv %s3874_s24  ;;  %v926_v30 = vstv %s3881_s26  ;;  %s3875_s8 = sld [smem:[#allocation5 + $0x9]] }
  0x2d   :  { %v113_v7 = vadd.f32 %v112_v1, %v111_v4  ;;  %v108_v8 = vadd.f32 %v107_v0, %v106_v2  ;;  %v420_v33 = vstv %s3868_s27  ;;  %vm209_vm4 = vcmask 1046528   ;;  %s3876_s9 = sld [smem:[#allocation5 + $0x10]] }
  0x2e   :  { %157 = vrot.lane.b32.xlu1 %v101_v5, %s4093_s2  ;;  %v460_v48 = vstv %s3869_s29  ;;  %vm242_vm5 = vcmask 1045504   ;;  %v500_v62 = vstv %s3870_s4  ;;  %vm275_vm6 = vcmask 1044480   ;;  %s3877_s10 = sld [smem:[#allocation5 + $0x17]] }
  0x2f   :  { %155 = vrot.lane.b32.xlu0 %v94_v60, %s4093_s2  ;;  %v115_v9 = vadd.f32 %v114_v6, %v113_v7  ;;  %vm308_vm7 = vcmask 1043456   ;;  %vm341_vm8 = vcmask 1042432   ;;  %vm374_vm9 = vcmask 1041408   ;;  %s3878_s11 = sld [smem:[#allocation5 + $0x1e]] }
  0x30   :  { %s3879_s12 = sld [smem:[#allocation5 + $0x25]] }
  0x31   :  { %s3880_s13 = sld [smem:[#allocation5 + $0x2c]] }
  0x32   :  { %161 = vrot.lane.b32.xlu1 %v115_v9, %s4093_s2  ;;  %s3882_s14 = sld [smem:[#allocation5 + $0xa]] }
  0x33   :  { %159 = vrot.lane.b32.xlu0 %v108_v8, %s4093_s2  ;;  %s3883_s15 = sld [smem:[#allocation5 + $0x11]] }
  0x34   :  { %s3884_s16 = sld [smem:[#allocation5 + $0x18]] }
  0x35   :  { %s3885_s17 = sld [smem:[#allocation5 + $0x1f]] }
  0x36   :  { %s3886_s18 = sld [smem:[#allocation5 + $0x26]] }
  0x37   :  { %s3887_s19 = sld [smem:[#allocation5 + $0x2d]] }
  0x38   :  { %s3888_s21 = sld [smem:[#allocation5 + $0x4]] }
  0x39   :  { %s3889_s22 = sld [smem:[#allocation5 + $0xb]] }
  0x3a   :  { %s3890_s2 = sld [smem:[#allocation5 + $0x12]] }
  0x3b   :  { %s3891_s24 = sld [smem:[#allocation5 + $0x19]] }
  0x3c   :  { %s3892_s26 = sld [smem:[#allocation5 + $0x20]] }
  0x3d   :  { %s3893_s27 = sld [smem:[#allocation5 + $0x27]] }
  0x3e   :  { %s3894_s29 = sld [smem:[#allocation5 + $0x2e]] }
  0x3f   :  { %s3895_s4 = sld [smem:[#allocation5 + $0x5]] }
  0x97   :  { %v139_v3 = vpop.permute.xlu1 %138 }
  0x98   :  { %149 = vst.msk [vmem:[#allocation2 + $0x1b] sm:$0xff] %vm146_vm3, %v139_v3 }
  0x99   :  { %v135_v10 = vpop.permute.xlu0 %134 }
  0x9a   :  { %147 = vst.msk [vmem:[#allocation2 + $0x3] sm:$0xff] %vm146_vm3, %v135_v10 }
  0x9b   :  { %v141_v11 = vpop.permute.xlu1 %140 }
  0x9c   :  { %150 = vst.msk [vmem:[#allocation2 + $0x23] sm:$0xff] %vm146_vm3, %v141_v11 }
  0x9d   :  { %v137_v12 = vpop.permute.xlu0 %136 }
  0x9e   :  { %148 = vst.msk [vmem:[#allocation2 + $0xb] sm:$0xff] %vm146_vm3, %v137_v12 }
  0x9f   :  { %v4215_v14 = vld [vmem:[#allocation2 + $0x18] sm:$0xff] }
  0xa0   :  { %v158_v17 = vpop.permute.xlu1 %157  ;;  %v397_v19 = vmul.f32 %v394_v13, %v4215_v14  ;;  %v663_v28 = vmul.f32 %v660_v25, %v4215_v14  ;;  %v929_v37 = vmul.f32 %v926_v30, %v4215_v14  ;;  %v424_v39 = vmul.f32 %v420_v33, %v4215_v14 }
  0xa1   :  { %v4217_v15 = vld [vmem:[#allocation2] sm:$0xff]  ;;  %v156_v16 = vpop.permute.xlu0 %155  ;;  %168 = vst.msk [vmem:[#allocation3 + $0xb] sm:$0xff] %vm146_vm3, %v158_v17  ;;  %v464_v55 = vmul.f32 %v460_v48, %v4215_v14  ;;  %v504_v3 = vmul.f32 %v500_v62, %v4215_v14  ;;  %v540_v17 = vstv %s3871_s5  ;;  %s3896_s5 = sld [smem:[#allocation5 + $0xc]] }
  0xa2   :  { %v395_v18 = vmul.f32 %v394_v13, %v4217_v15  ;;  %167 = vst.msk [vmem:[#allocation3 + $0x3] sm:$0xff] %vm146_vm3, %v156_v16  ;;  %v661_v26 = vmul.f32 %v660_v25, %v4217_v15  ;;  %v927_v31 = vmul.f32 %v926_v30, %v4217_v15  ;;  %v421_v36 = vmul.f32 %v420_v33, %v4217_v15 }
  0xa3   :  { %v4229_v24 = vld [vmem:[#allocation2 + $0x20] sm:$0xff]  ;;  %v4254_v43 = vld [vmem:[#allocation2 + $0x28] sm:$0x3f]  ;;  %v438_v46 = vrot.slane %v424_v39, 1  ;;  %v461_v53 = vmul.f32 %v460_v48, %v4217_v15  ;;  %v478_v63 = vrot.slane %v464_v55, 2  ;;  %v501_v7 = vmul.f32 %v500_v62, %v4217_v15 }
  0xa4   :  { %403 = vrot.lane.b32.xlu0 %v395_v18, %s4095_s25  ;;  %v162_v22 = vpop.permute.xlu1 %161  ;;  %v398_v27 = vmul.f32 %v394_v13, %v4229_v24  ;;  %v664_v32 = vmul.f32 %v660_v25, %v4229_v24  ;;  %v425_v40 = vmul.f32 %v420_v33, %v4229_v24  ;;  %v433_v44 = vrot.slane %v421_v36, 1 }
  0xa5   :  { %v4224_v20 = vld [vmem:[#allocation2 + $0x8] sm:$0xff]  ;;  %v160_v21 = vpop.permute.xlu0 %159  ;;  %170 = vst.msk [vmem:[#allocation3 + $0x23] sm:$0xff] %vm146_vm3, %v162_v22  ;;  %v4244_v35 = vld [vmem:[#allocation2 + $0x10] sm:$0x3f]  ;;  %v930_v45 = vmul.f32 %v926_v30, %v4229_v24  ;;  %v426_v52 = vmul.f32 %v420_v33, %v4254_v43  ;;  %v465_v56 = vmul.f32 %v460_v48, %v4229_v24  ;;  %v473_v61 = vrot.slane %v461_v53, 2 }
  0xa6   :  { %v396_v23 = vmul.f32 %v394_v13, %v4224_v20  ;;  %169 = vst.msk [vmem:[#allocation3 + $0x1b] sm:$0xff] %vm146_vm3, %v160_v21  ;;  %v662_v29 = vmul.f32 %v660_v25, %v4224_v20  ;;  %v422_v34 = vmul.f32 %v420_v33, %v4224_v20  ;;  %v928_v38 = vmul.f32 %v926_v30, %v4224_v20 }
  0xa7   :  { %v423_v42 = vmul.f32 %v420_v33, %v4244_v35  ;;  %v439_v47 = vrot.slane %v425_v40, 1  ;;  %v462_v51 = vmul.f32 %v460_v48, %v4224_v20  ;;  %v441_v59 = vrot.slane %v426_v52, 1 }
  0xa8   :  { %407 = vrot.lane.b32.xlu0 %v397_v19, %s4095_s25  ;;  %405 = vrot.lane.b32.xlu1 %v396_v23, %s4095_s25  ;;  %v434_v41 = vrot.slane %v422_v34, 1  ;;  %v463_v60 = vmul.f32 %v460_v48, %v4244_v35  ;;  %v479_v0 = vrot.slane %v465_v56, 2  ;;  %v502_v4 = vmul.f32 %v500_v62, %v4224_v20 }
  0xa9   :  { %v436_v50 = vrot.slane %v423_v42, 1  ;;  %v440_v54 = vsel %vm209_vm4, %v438_v46, %v439_v47  ;;  %v474_v58 = vrot.slane %v462_v51, 2  ;;  %v442_v5 = vsel %vm209_vm4, %v439_v47, %v441_v59 }
  0xaa   :  { %v435_v49 = vsel %vm209_vm4, %v433_v44, %v434_v41  ;;  %v476_v2 = vrot.slane %v463_v60, 2  ;;  %v466_v6 = vmul.f32 %v460_v48, %v4254_v43  ;;  %v480_v8 = vsel %vm242_vm5, %v478_v63, %v479_v0 }
  0xab   :  { %v437_v57 = vsel %vm209_vm4, %v434_v41, %v436_v50  ;;  %v475_v1 = vsel %vm242_vm5, %v473_v61, %v474_v58  ;;  %v514_v9 = vrot.slane %v502_v4, 3  ;;  %v505_v12 = vmul.f32 %v500_v62, %v4229_v24 }
  0xac   :  { %669 = vrot.lane.b32.xlu0 %v661_v26, %s4096_s28  ;;  %409 = vrot.lane.b32.xlu1 %v398_v27, %s4095_s25  ;;  %v477_v10 = vsel %vm242_vm5, %v474_v58, %v476_v2  ;;  %v481_v11 = vrot.slane %v466_v6, 2  ;;  %v503_v13 = vmul.f32 %v500_v62, %v4244_v35  ;;  %v513_v16 = vrot.slane %v501_v7, 3 }
  0xad   :  { %v518_v19 = vrot.slane %v504_v3, 3  ;;  %v542_v21 = vmul.f32 %v540_v17, %v4224_v20  ;;  %v519_v23 = vrot.slane %v505_v12, 3  ;;  %v506_v26 = vmul.f32 %v500_v62, %v4254_v43 }
  0xae   :  { %v515_v18 = vsel %vm275_vm6, %v513_v16, %v514_v9  ;;  %v482_v22 = vsel %vm242_vm5, %v479_v0, %v481_v11  ;;  %v516_v25 = vrot.slane %v503_v13, 3  ;;  %v541_v27 = vmul.f32 %v540_v17, %v4217_v15 }
  0xaf   :  { %v545_v30 = vmul.f32 %v540_v17, %v4229_v24  ;;  %v521_v33 = vrot.slane %v506_v26, 3  ;;  %v543_v34 = vmul.f32 %v540_v17, %v4244_v35  ;;  %v620_v58 = vstv %s3873_s7  ;;  %s4099_s7 = smov 123  }
  0xb0   :  { %673 = vrot.lane.b32.xlu0 %v663_v28, %s4096_s28  ;;  %671 = vrot.lane.b32.xlu1 %v662_v29, %s4096_s28  ;;  %v554_v28 = vrot.slane %v542_v21, 4  ;;  %v544_v29 = vmul.f32 %v540_v17, %v4215_v14  ;;  %v553_v36 = vrot.slane %v541_v27, 4  ;;  %v622_v61 = vmul.f32 %v620_v58, %v4224_v20 }
  0xb1   :  { %v559_v39 = vrot.slane %v545_v30, 4  ;;  %v522_v42 = vsel %vm275_vm6, %v519_v23, %v521_v33  ;;  %v556_v44 = vrot.slane %v543_v34, 4  ;;  %v621_v63 = vmul.f32 %v620_v58, %v4217_v15 }
  0xb2   :  { %v555_v41 = vsel %vm308_vm7, %v553_v36, %v554_v28  ;;  %v624_v4 = vmul.f32 %v620_v58, %v4215_v14  ;;  %v634_v2 = vrot.slane %v622_v61, 6  ;;  %v623_v7 = vmul.f32 %v620_v58, %v4244_v35 }
  0xb3   :  { %v557_v51 = vsel %vm308_vm7, %v554_v28, %v556_v44 }
  0xb4   :  { %935 = vrot.lane.b32.xlu0 %v927_v31, %s4097_s30  ;;  %675 = vrot.lane.b32.xlu1 %v664_v32, %s4096_s28  ;;  %v520_v31 = vsel %vm275_vm6, %v518_v19, %v519_v23  ;;  %v517_v32 = vsel %vm275_vm6, %v514_v9, %v516_v25  ;;  %v686_v9 = vstv %s3875_s8  ;;  %v638_v3 = vrot.slane %v624_v4, 6  ;;  %s3898_s8 = sld [smem:[#allocation5 + $0x1a]] }
  0xb5   :  { %v688_v11 = vmul.f32 %v686_v9, %v4224_v20  ;;  %v636_v16 = vrot.slane %v623_v7, 6  ;;  %v691_v26 = vmul.f32 %v686_v9, %v4229_v24  ;;  %v689_v27 = vmul.f32 %v686_v9, %v4244_v35 }
  0xb6   :  { %v806_v4 = vstv %s3878_s11  ;;  %s3901_s11 = sld [smem:[#allocation5 + $0x2f]] }
  0xb7   :  { %v700_v21 = vrot.slane %v688_v11, 1  ;;  %v637_v23 = vsel %vm374_vm9, %v634_v2, %v636_v16  ;;  %v705_v34 = vrot.slane %v691_v26, 1  ;;  %v702_v36 = vrot.slane %v689_v27, 1 }
  0xb8   :  { %939 = vrot.lane.b32.xlu0 %v929_v37, %s4097_s30  ;;  %937 = vrot.lane.b32.xlu1 %v928_v38, %s4097_s30  ;;  %v580_v37 = vstv %s3872_s6  ;;  %v558_v38 = vrot.slane %v544_v29, 4  ;;  %v726_v29 = vstv %s3876_s9  ;;  %s3897_s6 = sld [smem:[#allocation5 + $0x13]] }
  0xb9   :  { %v582_v40 = vmul.f32 %v580_v37, %v4224_v20  ;;  %v581_v46 = vmul.f32 %v580_v37, %v4217_v15  ;;  %v584_v48 = vmul.f32 %v580_v37, %v4215_v14  ;;  %v583_v53 = vmul.f32 %v580_v37, %v4244_v35  ;;  %s3899_s9 = sld [smem:[#allocation5 + $0x21]] }
  0xba   :  { %v560_v50 = vsel %vm308_vm7, %v558_v38, %v559_v39  ;;  %v586_v62 = vmul.f32 %v580_v37, %v4254_v43  ;;  %v727_v38 = vmul.f32 %v726_v29, %v4217_v15  ;;  %v703_v44 = vsel %vm209_vm4, %v700_v21, %v702_v36 }
  0xbb   :  { %v594_v47 = vrot.slane %v582_v40, 5  ;;  %v598_v56 = vrot.slane %v584_v48, 5  ;;  %v596_v60 = vrot.slane %v583_v53, 5  ;;  %v730_v40 = vmul.f32 %v726_v29, %v4215_v14 }
  0xbc   :  { %443 = vrot.lane.b32.xlu0 %v435_v49, %s4095_s25  ;;  %941 = vrot.lane.b32.xlu1 %v930_v45, %s4097_s30  ;;  %v546_v45 = vmul.f32 %v540_v17, %v4254_v43  ;;  %v585_v49 = vmul.f32 %v580_v37, %v4229_v24  ;;  %v601_v6 = vrot.slane %v586_v62, 5  ;;  %v626_v17 = vmul.f32 %v620_v58, %v4254_v43 }
  0xbd   :  { %v692_v37 = vmul.f32 %v686_v9, %v4254_v43 }
  0xbe   :  { %v561_v52 = vrot.slane %v546_v45, 4  ;;  %v641_v25 = vrot.slane %v626_v17, 6  ;;  %v811_v17 = vmul.f32 %v806_v4, %v4229_v24 }
  0xbf   :  { %v707_v45 = vrot.slane %v692_v37, 1 }
  0xc0   :  { %447 = vrot.lane.b32.xlu0 %v440_v54, %s4095_s25  ;;  %445 = vrot.lane.b32.xlu1 %v437_v57, %s4095_s25  ;;  %v593_v54 = vrot.slane %v581_v46, 5  ;;  %v599_v57 = vrot.slane %v585_v49, 5  ;;  %v562_v59 = vsel %vm308_vm7, %v559_v39, %v561_v52  ;;  %v729_v46 = vmul.f32 %v726_v29, %v4244_v35 }
  0xc1   :  { %v744_v49 = vrot.slane %v730_v40, 2  ;;  %v708_v52 = vsel %vm209_vm4, %v705_v34, %v707_v45  ;;  %v825_v27 = vrot.slane %v811_v17, 4 }
  0xc2   :  { %v595_v55 = vsel %vm341_vm8, %v593_v54, %v594_v47  ;;  %v600_v0 = vsel %vm341_vm8, %v598_v56, %v599_v57  ;;  %v602_v13 = vsel %vm341_vm8, %v599_v57, %v601_v6  ;;  %v742_v53 = vrot.slane %v729_v46, 2 }
  0xc4   :  { %483 = vrot.lane.b32.xlu0 %v475_v1, %s4095_s25  ;;  %449 = vrot.lane.b32.xlu1 %v442_v5, %s4095_s25  ;;  %v625_v1 = vmul.f32 %v620_v58, %v4229_v24  ;;  %v597_v5 = vsel %vm341_vm8, %v594_v47, %v596_v60  ;;  %v739_v47 = vrot.slane %v727_v38, 2 }
  0xc8   :  { %487 = vrot.lane.b32.xlu0 %v480_v8, %s4095_s25  ;;  %485 = vrot.lane.b32.xlu1 %v477_v10, %s4095_s25  ;;  %v633_v8 = vrot.slane %v621_v63, 6  ;;  %v639_v10 = vrot.slane %v625_v1, 6 }
  0xca   :  { %v635_v12 = vsel %vm374_vm9, %v633_v8, %v634_v2  ;;  %v640_v19 = vsel %vm374_vm9, %v638_v3, %v639_v10  ;;  %v642_v33 = vsel %vm374_vm9, %v639_v10, %v641_v25  ;;  %v808_v2 = vmul.f32 %v806_v4, %v4224_v20 }
  0xcb   :  { %v807_v3 = vmul.f32 %v806_v4, %v4217_v15 }
  0xcc   :  { %523 = vrot.lane.b32.xlu0 %v515_v18, %s4095_s25  ;;  %489 = vrot.lane.b32.xlu1 %v482_v22, %s4095_s25  ;;  %v687_v18 = vmul.f32 %v686_v9, %v4217_v15  ;;  %v690_v22 = vmul.f32 %v686_v9, %v4215_v14  ;;  %v820_v11 = vrot.slane %v808_v2, 4 }
  0xce   :  { %v699_v28 = vrot.slane %v687_v18, 1  ;;  %v809_v18 = vmul.f32 %v806_v4, %v4244_v35 }
  0xd0   :  { %527 = vrot.lane.b32.xlu0 %v520_v31, %s4095_s25  ;;  %525 = vrot.lane.b32.xlu1 %v517_v32, %s4095_s25  ;;  %v701_v30 = vsel %vm209_vm4, %v699_v28, %v700_v21  ;;  %v704_v31 = vrot.slane %v690_v22, 1  ;;  %v728_v32 = vmul.f32 %v726_v29, %v4224_v20  ;;  %v846_v21 = vstv %s3879_s12  ;;  %s3902_s12 = sld [smem:[#allocation5 + $0x6]] }
  0xd1   :  { %v848_v25 = vmul.f32 %v846_v21, %v4224_v20  ;;  %v822_v28 = vrot.slane %v809_v18, 4  ;;  %v849_v38 = vmul.f32 %v846_v21, %v4244_v35 }
  0xd2   :  { %v740_v39 = vrot.slane %v728_v32, 2  ;;  %v850_v32 = vmul.f32 %v846_v21, %v4215_v14 }
  0xd3   :  { %v823_v36 = vsel %vm308_vm7, %v820_v11, %v822_v28  ;;  %v862_v46 = vrot.slane %v849_v38, 5  ;;  %v1032_v38 = vstv %s3884_s16  ;;  %s3905_s16 = sld [smem:[#allocation5 + $0x1b]] }
  0xd4   :  { %563 = vrot.lane.b32.xlu0 %v555_v41, %s4095_s25  ;;  %529 = vrot.lane.b32.xlu1 %v522_v42, %s4095_s25  ;;  %v731_v41 = vmul.f32 %v726_v29, %v4229_v24  ;;  %v706_v42 = vsel %vm209_vm4, %v704_v31, %v705_v34  ;;  %v741_v48 = vsel %vm242_vm5, %v739_v47, %v740_v39  ;;  %v860_v31 = vrot.slane %v848_v25, 5 }
  0xd5   :  { %v743_v60 = vsel %vm242_vm5, %v740_v39, %v742_v53 }
  0xd6   :  { %v863_v53 = vsel %vm341_vm8, %v860_v31, %v862_v46 }
  0xd8   :  { %567 = vrot.lane.b32.xlu0 %v560_v50, %s4095_s25  ;;  %565 = vrot.lane.b32.xlu1 %v557_v51, %s4095_s25  ;;  %v745_v50 = vrot.slane %v731_v41, 2  ;;  %v766_v51 = vstv %s3877_s10  ;;  %v864_v41 = vrot.slane %v850_v32, 5  ;;  %s3900_s10 = sld [smem:[#allocation5 + $0x28]] }
  0xd9   :  { %v768_v54 = vmul.f32 %v766_v51, %v4224_v20  ;;  %v767_v56 = vmul.f32 %v766_v51, %v4217_v15  ;;  %v770_v58 = vmul.f32 %v766_v51, %v4215_v14  ;;  %v769_v63 = vmul.f32 %v766_v51, %v4244_v35 }
  0xda   :  { %v746_v57 = vsel %vm242_vm5, %v744_v49, %v745_v50  ;;  %v772_v9 = vmul.f32 %v766_v51, %v4254_v43 }
  0xdb   :  { %v780_v61 = vrot.slane %v768_v54, 3  ;;  %v784_v1 = vrot.slane %v770_v58, 3  ;;  %v782_v8 = vrot.slane %v769_v63, 3  ;;  %v952_v58 = vstv %s3882_s14  ;;  %s3904_s14 = sld [smem:[#allocation5 + $0x14]] }
  0xdc   :  { %603 = vrot.lane.b32.xlu0 %v595_v55, %s4095_s25  ;;  %569 = vrot.lane.b32.xlu1 %v562_v59, %s4095_s25  ;;  %v732_v55 = vmul.f32 %v726_v29, %v4254_v43  ;;  %v771_v59 = vmul.f32 %v766_v51, %v4229_v24  ;;  %v787_v16 = vrot.slane %v772_v9, 3  ;;  %v812_v29 = vmul.f32 %v806_v4, %v4254_v43 }
  0xdd   :  { %v956_v9 = vmul.f32 %v952_v58, %v4215_v14  ;;  %v958_v25 = vmul.f32 %v952_v58, %v4254_v43 }
  0xde   :  { %v747_v62 = vrot.slane %v732_v55, 2  ;;  %v827_v37 = vrot.slane %v812_v29, 4 }
  0xe0   :  { %607 = vrot.lane.b32.xlu0 %v600_v0, %s4095_s25  ;;  %605 = vrot.lane.b32.xlu1 %v597_v5, %s4095_s25  ;;  %v779_v0 = vrot.slane %v767_v56, 3  ;;  %v785_v5 = vrot.slane %v771_v59, 3  ;;  %v748_v7 = vsel %vm242_vm5, %v745_v50, %v747_v62  ;;  %v828_v45 = vsel %vm308_vm7, %v825_v27, %v827_v37 }
  0xe2   :  { %v781_v6 = vsel %vm275_vm6, %v779_v0, %v780_v61  ;;  %v786_v10 = vsel %vm275_vm6, %v784_v1, %v785_v5  ;;  %v788_v26 = vsel %vm275_vm6, %v785_v5, %v787_v16  ;;  %v953_v1 = vmul.f32 %v952_v58, %v4217_v15 }
  0xe4   :  { %643 = vrot.lane.b32.xlu0 %v635_v12, %s4095_s25  ;;  %609 = vrot.lane.b32.xlu1 %v602_v13, %s4095_s25  ;;  %v810_v12 = vmul.f32 %v806_v4, %v4215_v14  ;;  %v783_v13 = vsel %vm275_vm6, %v780_v61, %v782_v8  ;;  %v954_v61 = vmul.f32 %v952_v58, %v4224_v20 }
  0xe8   :  { %647 = vrot.lane.b32.xlu0 %v640_v19, %s4095_s25  ;;  %645 = vrot.lane.b32.xlu1 %v637_v23, %s4095_s25  ;;  %v819_v19 = vrot.slane %v807_v3, 4  ;;  %v824_v23 = vrot.slane %v810_v12, 4  ;;  %v957_v3 = vmul.f32 %v952_v58, %v4229_v24  ;;  %v992_v12 = vstv %s3883_s15  ;;  %s4100_s15 = smov 122  }
  0xea   :  { %v821_v22 = vsel %vm308_vm7, %v819_v19, %v820_v11  ;;  %v826_v34 = vsel %vm308_vm7, %v824_v23, %v825_v27  ;;  %v965_v11 = vrot.slane %v953_v1, 1  ;;  %v994_v19 = vmul.f32 %v992_v12, %v4224_v20 }
  0xec   :  { %709 = vrot.lane.b32.xlu0 %v701_v30, %s4096_s28  ;;  %649 = vrot.lane.b32.xlu1 %v642_v33, %s4095_s25  ;;  %v847_v30 = vmul.f32 %v846_v21, %v4217_v15  ;;  %v851_v33 = vmul.f32 %v846_v21, %v4229_v24  ;;  %v1006_v29 = vrot.slane %v994_v19, 2 }
  0xee   :  { %v859_v39 = vrot.slane %v847_v30, 5  ;;  %v996_v30 = vmul.f32 %v992_v12, %v4215_v14 }
  0xf0   :  { %713 = vrot.lane.b32.xlu0 %v706_v42, %s4096_s28  ;;  %711 = vrot.lane.b32.xlu1 %v703_v44, %s4096_s28  ;;  %v861_v40 = vsel %vm341_vm8, %v859_v39, %v860_v31  ;;  %v865_v42 = vrot.slane %v851_v33, 5  ;;  %v886_v44 = vstv %s3880_s13  ;;  %v997_v31 = vmul.f32 %v992_v12, %v4229_v24  ;;  %s3903_s13 = sld [smem:[#allocation5 + $0xd]] }
  0xf1   :  { %v888_v47 = vmul.f32 %v886_v44, %v4224_v20  ;;  %v887_v49 = vmul.f32 %v886_v44, %v4217_v15  ;;  %v890_v51 = vmul.f32 %v886_v44, %v4215_v14  ;;  %v889_v56 = vmul.f32 %v886_v44, %v4244_v35 }
  0xf2   :  { %v866_v50 = vsel %vm341_vm8, %v864_v41, %v865_v42  ;;  %v892_v62 = vmul.f32 %v886_v44, %v4254_v43  ;;  %v1010_v41 = vrot.slane %v996_v30, 2 }
  0xf3   :  { %v900_v54 = vrot.slane %v888_v47, 6  ;;  %v904_v59 = vrot.slane %v890_v51, 6  ;;  %v902_v4 = vrot.slane %v889_v56, 6  ;;  %v1011_v47 = vrot.slane %v997_v31, 2 }
  0xf4   :  { %749 = vrot.lane.b32.xlu0 %v741_v48, %s4096_s28  ;;  %715 = vrot.lane.b32.xlu1 %v708_v52, %s4096_s28  ;;  %v852_v48 = vmul.f32 %v846_v21, %v4254_v43  ;;  %v891_v52 = vmul.f32 %v886_v44, %v4229_v24  ;;  %v970_v21 = vrot.slane %v956_v9, 1  ;;  %v998_v44 = vmul.f32 %v992_v12, %v4254_v43 }
  0xf5   :  { %v903_v8 = vsel %vm374_vm9, %v900_v54, %v902_v4  ;;  %v1072_v4 = vstv %s3885_s17  ;;  %v1112_v31 = vstv %s3886_s18  ;;  %s3906_s17 = sld [smem:[#allocation5 + $0x22]] }
  0xf6   :  { %v867_v55 = vrot.slane %v852_v48, 5  ;;  %s3907_s18 = sld [smem:[#allocation5 + $0x29]] }
  0xf8   :  { %753 = vrot.lane.b32.xlu0 %v746_v57, %s4096_s28  ;;  %751 = vrot.lane.b32.xlu1 %v743_v60, %s4096_s28  ;;  %v899_v57 = vrot.slane %v887_v49, 6  ;;  %v905_v60 = vrot.slane %v891_v52, 6  ;;  %v868_v0 = vsel %vm341_vm8, %v865_v42, %v867_v55  ;;  %v1034_v42 = vmul.f32 %v1032_v38, %v4224_v20 }
  0xf9   :  { %v1033_v49 = vmul.f32 %v1032_v38, %v4217_v15  ;;  %v1012_v55 = vsel %vm242_vm5, %v1010_v41, %v1011_v47 }
  0xfa   :  { %v901_v63 = vsel %vm374_vm9, %v899_v57, %v900_v54  ;;  %v906_v2 = vsel %vm374_vm9, %v904_v59, %v905_v60  ;;  %v1046_v52 = vrot.slane %v1034_v42, 3  ;;  %v1036_v54 = vmul.f32 %v1032_v38, %v4215_v14 }
  0xfb   :  { %v1037_v57 = vmul.f32 %v1032_v38, %v4229_v24  ;;  %v1045_v59 = vrot.slane %v1033_v49, 3  ;;  %v1115_v49 = vmul.f32 %v1112_v31, %v4244_v35 }
  0xfc   :  { %789 = vrot.lane.b32.xlu0 %v781_v6, %s4096_s28  ;;  %755 = vrot.lane.b32.xlu1 %v748_v7, %s4096_s28  ;;  %v966_v6 = vrot.slane %v954_v61, 1  ;;  %v907_v7 = vrot.slane %v892_v62, 6 }
  0xfd   :  { %v1047_v62 = vsel %vm275_vm6, %v1045_v59, %v1046_v52  ;;  %v1051_v1 = vrot.slane %v1037_v57, 3 }
  0xfe   :  { %v967_v17 = vsel %vm209_vm4, %v965_v11, %v966_v6  ;;  %v908_v18 = vsel %vm374_vm9, %v905_v60, %v907_v7  ;;  %v1038_v7 = vmul.f32 %v1032_v38, %v4254_v43  ;;  %v1077_v11 = vmul.f32 %v1072_v4, %v4229_v24 }
 0x100   :  { %793 = vrot.lane.b32.xlu0 %v786_v10, %s4096_s28  ;;  %791 = vrot.lane.b32.xlu1 %v783_v13, %s4096_s28  ;;  %v955_v10 = vmul.f32 %v952_v58, %v4244_v35  ;;  %v1035_v58 = vmul.f32 %v1032_v38, %v4244_v35 }
 0x102   :  { %v968_v23 = vrot.slane %v955_v10, 1  ;;  %v1076_v10 = vmul.f32 %v1072_v4, %v4215_v14 }
 0x104   :  { %829 = vrot.lane.b32.xlu0 %v821_v22, %s4096_s28  ;;  %795 = vrot.lane.b32.xlu1 %v788_v26, %s4096_s28  ;;  %v971_v22 = vrot.slane %v957_v3, 1  ;;  %v993_v26 = vmul.f32 %v992_v12, %v4217_v15  ;;  %v969_v33 = vsel %vm209_vm4, %v966_v6, %v968_v23  ;;  %v1074_v6 = vmul.f32 %v1072_v4, %v4224_v20 }
 0x106   :  { %v972_v32 = vsel %vm209_vm4, %v970_v21, %v971_v22  ;;  %v1005_v37 = vrot.slane %v993_v26, 2  ;;  %v1086_v19 = vrot.slane %v1074_v6, 4  ;;  %v1053_v21 = vrot.slane %v1038_v7, 3 }
 0x107   :  { %v1090_v26 = vrot.slane %v1076_v10, 4 }
 0x108   :  { %833 = vrot.lane.b32.xlu0 %v826_v34, %s4096_s28  ;;  %831 = vrot.lane.b32.xlu1 %v823_v36, %s4096_s28  ;;  %v973_v34 = vrot.slane %v958_v25, 1  ;;  %v995_v36 = vmul.f32 %v992_v12, %v4244_v35  ;;  %v1075_v12 = vmul.f32 %v1072_v4, %v4244_v35 }
 0x10a   :  { %v974_v46 = vsel %vm209_vm4, %v971_v22, %v973_v34  ;;  %v1008_v48 = vrot.slane %v995_v36, 2  ;;  %v1088_v30 = vrot.slane %v1075_v12, 4  ;;  %v1114_v34 = vmul.f32 %v1112_v31, %v4224_v20 }
 0x10b   :  { %v1078_v36 = vmul.f32 %v1072_v4, %v4254_v43 }
 0x10c   :  { %869 = vrot.lane.b32.xlu0 %v861_v40, %s4096_s28  ;;  %835 = vrot.lane.b32.xlu1 %v828_v45, %s4096_s28  ;;  %v1007_v45 = vsel %vm242_vm5, %v1005_v37, %v1006_v29  ;;  %v1009_v56 = vsel %vm242_vm5, %v1006_v29, %v1008_v48  ;;  %v1091_v29 = vrot.slane %v1077_v11, 4  ;;  %v1113_v37 = vmul.f32 %v1112_v31, %v4217_v15 }
 0x10d   :  { %v1117_v48 = vmul.f32 %v1112_v31, %v4229_v24 }
 0x10e   :  { %v1092_v42 = vsel %vm308_vm7, %v1090_v26, %v1091_v29 }
 0x110   :  { %873 = vrot.lane.b32.xlu0 %v866_v50, %s4096_s28  ;;  %871 = vrot.lane.b32.xlu1 %v863_v53, %s4096_s28  ;;  %v1013_v53 = vrot.slane %v998_v44, 2  ;;  %v1089_v44 = vsel %vm308_vm7, %v1086_v19, %v1088_v30 }
 0x114   :  { %909 = vrot.lane.b32.xlu0 %v901_v63, %s4096_s28  ;;  %875 = vrot.lane.b32.xlu1 %v868_v0, %s4096_s28  ;;  %v1014_v63 = vsel %vm242_vm5, %v1011_v47, %v1013_v53  ;;  %v1050_v0 = vrot.slane %v1036_v54, 3  ;;  %v1093_v47 = vrot.slane %v1078_v36, 4  ;;  %v1152_v53 = vstv %s3887_s19  ;;  %s3908_s19 = sld [smem:[#allocation5 + $0x30]] }
 0x115   :  { %v1154_v57 = vmul.f32 %v1152_v53, %v4224_v20  ;;  %v1157_v12 = vmul.f32 %v1152_v53, %v4229_v24 }
 0x116   :  { %v4419_v5 = vpop.permute.xlu0 %403 }
 0x117   :  { %v1166_v6 = vrot.slane %v1154_v57, 6  ;;  %v1171_v30 = vrot.slane %v1157_v12, 6 }
 0x118   :  { %913 = vrot.lane.b32.xlu0 %v906_v2, %s4096_s28  ;;  %911 = vrot.lane.b32.xlu1 %v903_v8, %s4096_s28  ;;  %v1048_v2 = vrot.slane %v1035_v58, 3  ;;  %v1073_v8 = vmul.f32 %v1072_v4, %v4217_v15  ;;  %v1118_v58 = vmul.f32 %v1112_v31, %v4254_v43  ;;  %v1153_v4 = vmul.f32 %v1152_v53, %v4217_v15 }
 0x11a   :  { %v4428_v13 = vpop.permute.xlu1 %405  ;;  %v4430_v16 = vpop.permute.xlu0 %407  ;;  %v1085_v22 = vrot.slane %v1073_v8, 4  ;;  %v1133_v7 = vrot.slane %v1118_v58, 5  ;;  %v1156_v8 = vmul.f32 %v1152_v53, %v4215_v14 }
 0x11c   :  { %975 = vrot.lane.b32.xlu0 %v967_v17, %s4097_s30  ;;  %915 = vrot.lane.b32.xlu1 %v908_v18, %s4096_s28  ;;  %v1052_v17 = vsel %vm275_vm6, %v1050_v0, %v1051_v1  ;;  %v1049_v18 = vsel %vm275_vm6, %v1046_v52, %v1048_v2  ;;  %v1125_v52 = vrot.slane %v1113_v37, 5  ;;  %v1128_v0 = vrot.slane %v1115_v49, 5 }
 0x11d   :  { %v1170_v26 = vrot.slane %v1156_v8, 6 }
 0x11e   :  { %v4439_v27 = vpop.permute.xlu1 %409  ;;  %v4441_v28 = vpop.permute.xlu0 %669 }
 0x11f   :  { %6890 = vst [vmem:[#allocation14_spill] sm:$0xff] %v4441_v28  ;;  %v1172_v36 = vsel %vm374_vm9, %v1170_v26, %v1171_v30 }
 0x120   :  { %979 = vrot.lane.b32.xlu0 %v972_v32, %s4097_s30  ;;  %977 = vrot.lane.b32.xlu1 %v969_v33, %s4097_s30  ;;  %v1087_v32 = vsel %vm308_vm7, %v1085_v22, %v1086_v19  ;;  %v1054_v33 = vsel %vm275_vm6, %v1051_v1, %v1053_v21 }
 0x122   :  { %v4450_v39 = vpop.permute.xlu1 %671  ;;  %v4452_v40 = vpop.permute.xlu0 %673 }
 0x123   :  { %6891 = vst [vmem:[#allocation15_spill] sm:$0xff] %v4450_v39  ;;  %6892 = vst [vmem:[#allocation16_spill] sm:$0xff] %v4452_v40 }
 0x124   :  { %1015 = vrot.lane.b32.xlu0 %v1007_v45, %s4097_s30  ;;  %981 = vrot.lane.b32.xlu1 %v974_v46, %s4097_s30  ;;  %v1116_v45 = vmul.f32 %v1112_v31, %v4215_v14  ;;  %v1126_v46 = vrot.slane %v1114_v34, 5 }
 0x126   :  { %v4461_v50 = vpop.permute.xlu1 %675  ;;  %v4463_v51 = vpop.permute.xlu0 %935  ;;  %v1127_v59 = vsel %vm341_vm8, %v1125_v52, %v1126_v46  ;;  %v1129_v11 = vsel %vm341_vm8, %v1126_v46, %v1128_v0 }
 0x127   :  { %6893 = vst [vmem:[#allocation17_spill] sm:$0xff] %v4461_v50  ;;  %6894 = vst [vmem:[#allocation18_spill] sm:$0xff] %v4463_v51 }
 0x128   :  { %1019 = vrot.lane.b32.xlu0 %v1012_v55, %s4097_s30  ;;  %1017 = vrot.lane.b32.xlu1 %v1009_v56, %s4097_s30  ;;  %v1130_v56 = vrot.slane %v1116_v45, 5 }
 0x12a   :  { %v4472_v60 = vpop.permute.xlu1 %937  ;;  %v4474_v61 = vpop.permute.xlu0 %939 }
 0x12b   :  { %6895 = vst [vmem:[#allocation19_spill] sm:$0xff] %v4472_v60  ;;  %6896 = vst [vmem:[#allocation20_spill] sm:$0xff] %v4474_v61 }
 0x12c   :  { %1055 = vrot.lane.b32.xlu0 %v1047_v62, %s4097_s30  ;;  %1021 = vrot.lane.b32.xlu1 %v1014_v63, %s4097_s30  ;;  %v1094_v62 = vsel %vm308_vm7, %v1091_v29, %v1093_v47  ;;  %v1131_v63 = vrot.slane %v1117_v48, 5  ;;  %v1218_v48 = vstv %s3889_s22  ;;  %s4972_s22 = sld [smem:[#allocation5]] }
 0x12d   :  { %v1220_v52 = vmul.f32 %v1218_v48, %v4224_v20  ;;  %v1223_v0 = vmul.f32 %v1218_v48, %v4229_v24  ;;  %v1224_v26 = vmul.f32 %v1218_v48, %v4254_v43 }
 0x12e   :  { %v4483_v9 = vpop.permute.xlu1 %941  ;;  %v4485_v3 = vpop.permute.xlu0 %443  ;;  %v1132_v10 = vsel %vm341_vm8, %v1130_v56, %v1131_v63  ;;  %v1134_v29 = vsel %vm341_vm8, %v1131_v63, %v1133_v7  ;;  %v1258_v7 = vstv %s3890_s2  ;;  %s4974_s2 = sld [smem:[#allocation5 + $0xe]] }
 0x12f   :  { %6897 = vst [vmem:[#allocation21_spill] sm:$0xff] %v4483_v9  ;;  %v1232_v63 = vrot.slane %v1220_v52, 1 }
 0x130   :  { %1059 = vrot.lane.b32.xlu0 %v1052_v17, %s4097_s30  ;;  %1057 = vrot.lane.b32.xlu1 %v1049_v18, %s4097_s30  ;;  %v1155_v17 = vmul.f32 %v1152_v53, %v4244_v35  ;;  %v1165_v18 = vrot.slane %v1153_v4, 6  ;;  %v1221_v4 = vmul.f32 %v1218_v48, %v4244_v35 }
 0x132   :  { %v4494_v23 = vpop.permute.xlu1 %445  ;;  %v4496_v25 = vpop.permute.xlu0 %447  ;;  %v1167_v22 = vsel %vm374_vm9, %v1165_v18, %v1166_v6  ;;  %v1168_v31 = vrot.slane %v1155_v17, 6  ;;  %v1237_v18 = vrot.slane %v1223_v0, 1 }
 0x134   :  { %1095 = vrot.lane.b32.xlu0 %v1087_v32, %s4097_s30  ;;  %1061 = vrot.lane.b32.xlu1 %v1054_v33, %s4097_s30  ;;  %v1158_v32 = vmul.f32 %v1152_v53, %v4254_v43  ;;  %v1169_v37 = vsel %vm374_vm9, %v1166_v6, %v1168_v31  ;;  %v1219_v53 = vmul.f32 %v1218_v48, %v4217_v15 }
 0x136   :  { %v4505_v38 = vpop.permute.xlu1 %449  ;;  %v4507_v41 = vpop.permute.xlu0 %483  ;;  %v1231_v6 = vrot.slane %v1219_v53, 1 }
 0x137   :  { %6898 = vst [vmem:[#allocation22_spill] sm:$0xff] %v4507_v41 }
 0x138   :  { %1099 = vrot.lane.b32.xlu0 %v1092_v42, %s4097_s30  ;;  %1097 = vrot.lane.b32.xlu1 %v1089_v44, %s4097_s30  ;;  %v1192_v42 = vstv %s3888_s21  ;;  %v1173_v44 = vrot.slane %v1158_v32, 6  ;;  %v1233_v17 = vsel %vm209_vm4, %v1231_v6, %v1232_v63  ;;  %s3861_s21 = sld [smem:[#allocation5 + $0x7]] }
 0x139   :  { %v1193_v47 = vmul.f32 %v1192_v42, %v4217_v15  ;;  %v1195_v58 = vmul.f32 %v1192_v42, %v4215_v14 }
 0x13a   :  { %v4516_v54 = vpop.permute.xlu1 %485  ;;  %v4518_v55 = vpop.permute.xlu0 %487  ;;  %v1174_v49 = vsel %vm374_vm9, %v1171_v30, %v1173_v44 }
 0x13b   :  { %6899 = vst [vmem:[#allocation23_spill] sm:$0xff] %v4516_v54  ;;  %6900 = vst [vmem:[#allocation24_spill] sm:$0xff] %v4518_v55 }
 0x13c   :  { %1135 = vrot.lane.b32.xlu0 %v1127_v59, %s4097_s30  ;;  %1101 = vrot.lane.b32.xlu1 %v1094_v62, %s4097_s30  ;;  %v1194_v59 = vmul.f32 %v1192_v42, %v4224_v20  ;;  %v1222_v62 = vmul.f32 %v1218_v48, %v4215_v14  ;;  %v1260_v14 = vmul.f32 %v1258_v7, %v4224_v20 }
 0x13d   :  { %v1261_v20 = vmul.f32 %v1258_v7, %v4244_v35  ;;  %v1263_v48 = vmul.f32 %v1258_v7, %v4229_v24 }
 0x13e   :  { %v4527_v1 = vpop.permute.xlu1 %489  ;;  %v4529_v2 = vpop.permute.xlu0 %523  ;;  %v1236_v12 = vrot.slane %v1222_v62, 1  ;;  %v1272_v32 = vrot.slane %v1260_v14, 2  ;;  %v1298_v62 = vstv %s3891_s24  ;;  %s4984_s24 = sld [smem:[#allocation5 + $0x15]] }
 0x13f   :  { %6901 = vst [vmem:[#allocation25_spill] sm:$0xff] %v4527_v1  ;;  %6902 = vst [vmem:[#allocation26_spill] sm:$0xff] %v4529_v2 }
 0x140   :  { %1139 = vrot.lane.b32.xlu0 %v1132_v10, %s4097_s30  ;;  %1137 = vrot.lane.b32.xlu1 %v1129_v11, %s4097_s30  ;;  %v1196_v11 = vmul.f32 %v1192_v42, %v4229_v24  ;;  %v1238_v42 = vsel %vm209_vm4, %v1236_v12, %v1237_v18  ;;  %v1277_v24 = vrot.slane %v1263_v48, 2 }
 0x142   :  { %v4538_v19 = vpop.permute.xlu1 %525  ;;  %v4540_v21 = vpop.permute.xlu0 %527 }
 0x143   :  { %6903 = vst [vmem:[#allocation27_spill] sm:$0xff] %v4538_v19  ;;  %6904 = vst [vmem:[#allocation28_spill] sm:$0xff] %v4540_v21 }
 0x144   :  { %1175 = vrot.lane.b32.xlu0 %v1167_v22, %s4097_s30  ;;  %1141 = vrot.lane.b32.xlu1 %v1134_v29, %s4097_s30  ;;  %v1234_v22 = vrot.slane %v1221_v4, 1  ;;  %v1259_v29 = vmul.f32 %v1258_v7, %v4217_v15  ;;  %v4607_v4 = vld [vmem:[#allocation2 + $0x8] sm:$0xff] }
 0x145   :  { %v1300_v6 = vmul.f32 %v4607_v4, %v1298_v62 }
 0x146   :  { %v4547_v33 = vpop.permute.xlu1 %529  ;;  %v4549_v34 = vpop.permute.xlu0 %563  ;;  %v1235_v44 = vsel %vm209_vm4, %v1232_v63, %v1234_v22  ;;  %v1271_v15 = vrot.slane %v1259_v29, 2  ;;  %v1301_v22 = vmul.f32 %v1298_v62, %v4244_v35 }
 0x147   :  { %6905 = vst [vmem:[#allocation29_spill] sm:$0xff] %v4547_v33  ;;  %6906 = vst [vmem:[#allocation30_spill] sm:$0xff] %v4549_v34  ;;  %v1312_v29 = vrot.slane %v1300_v6, 3 }
 0x148   :  { %1179 = vrot.lane.b32.xlu0 %v1172_v36, %s4097_s30  ;;  %1177 = vrot.lane.b32.xlu1 %v1169_v37, %s4097_s30  ;;  %v4592_v36 = vld [vmem:[#allocation2 + $0x18] sm:$0xff]  ;;  %v1273_v53 = vsel %vm242_vm5, %v1271_v15, %v1272_v32  ;;  %v1314_v48 = vrot.slane %v1301_v22, 3  ;;  %v1304_v15 = vmul.f32 %v1298_v62, %v4254_v43 }
 0x149   :  { %v1262_v37 = vmul.f32 %v4592_v36, %v1258_v7 }
 0x14a   :  { %v4555_v45 = vpop.permute.xlu1 %565  ;;  %v4557_v46 = vpop.permute.xlu0 %567 }
 0x14b   :  { %6907 = vst [vmem:[#allocation31_spill] sm:$0xff] %v4555_v45  ;;  %6908 = vst [vmem:[#allocation32_spill] sm:$0xff] %v4557_v46  ;;  %v1276_v0 = vrot.slane %v1262_v37, 2  ;;  %v4623_v37 = vld [vmem:[#allocation2 + $0x20] sm:$0xff]  ;;  %v3999_v45 = vld [vmem:[#allocation2 + $0x10] sm:$0x3f] }
 0x14c   :  { %1201 = vrot.lane.b32.xlu0 %v1193_v47, %s4098_s23  ;;  %1181 = vrot.lane.b32.xlu1 %v1174_v49, %s4097_s30  ;;  %v1239_v47 = vrot.slane %v1224_v26, 1 }
 0x14d   :  { %v1278_v26 = vsel %vm242_vm5, %v1276_v0, %v1277_v24 }
 0x14e   :  { %v4565_v56 = vpop.permute.xlu1 %569  ;;  %v4567_v57 = vpop.permute.xlu0 %603  ;;  %v1240_v63 = vsel %vm209_vm4, %v1237_v18, %v1239_v47 }
 0x14f   :  { %6909 = vst [vmem:[#allocation33_spill] sm:$0xff] %v4565_v56  ;;  %6910 = vst [vmem:[#allocation34_spill] sm:$0xff] %v4567_v57  ;;  %v3997_v56 = vld [vmem:[#allocation2] sm:$0xff] }
 0x150   :  { %1205 = vrot.lane.b32.xlu0 %v1195_v58, %s4098_s23  ;;  %1203 = vrot.lane.b32.xlu1 %v1194_v59, %s4098_s23  ;;  %v1274_v58 = vrot.slane %v1261_v20, 2  ;;  %v1264_v59 = vmul.f32 %v1258_v7, %v4254_v43  ;;  %v1302_v20 = vmul.f32 %v4592_v36, %v1298_v62  ;;  %v1315_v43 = vsel %vm275_vm6, %v1312_v29, %v1314_v48 }
 0x152   :  { %v4576_v8 = vpop.permute.xlu1 %605  ;;  %v4578_v10 = vpop.permute.xlu0 %607  ;;  %v1279_v18 = vrot.slane %v1264_v59, 2  ;;  %v1316_v59 = vrot.slane %v1302_v20, 3 }
 0x153   :  { %6911 = vst [vmem:[#allocation35_spill] sm:$0xff] %v4576_v8  ;;  %6912 = vst [vmem:[#allocation36_spill] sm:$0xff] %v4578_v10 }
 0x154   :  { %1241 = vrot.lane.b32.xlu0 %v1233_v17, %s4098_s23  ;;  %1207 = vrot.lane.b32.xlu1 %v1196_v11, %s4098_s23  ;;  %v4612_v11 = vld [vmem:[#allocation2] sm:$0xff]  ;;  %v1275_v17 = vsel %vm242_vm5, %v1272_v32, %v1274_v58  ;;  %v1280_v35 = vsel %vm242_vm5, %v1277_v24, %v1279_v18 }
 0x155   :  { %v1299_v12 = vmul.f32 %v4612_v11, %v1298_v62 }
 0x156   :  { %v4587_v30 = vpop.permute.xlu1 %609  ;;  %v4589_v31 = vpop.permute.xlu0 %643 }
 0x157   :  { %6913 = vst [vmem:[#allocation37_spill] sm:$0xff] %v4587_v30  ;;  %6914 = vst [vmem:[#allocation38_spill] sm:$0xff] %v4589_v31 }
 0x158   :  { %1245 = vrot.lane.b32.xlu0 %v1238_v42, %s4098_s23  ;;  %1243 = vrot.lane.b32.xlu1 %v1235_v44, %s4098_s23  ;;  %v1303_v42 = vmul.f32 %v4623_v37, %v1298_v62  ;;  %v1311_v44 = vrot.slane %v1299_v12, 3  ;;  %v1319_v62 = vrot.slane %v1304_v15, 3 }
 0x15a   :  { %v4600_v49 = vpop.permute.xlu1 %645  ;;  %v4602_v52 = vpop.permute.xlu0 %647  ;;  %v1313_v58 = vsel %vm275_vm6, %v1311_v44, %v1312_v29 }
 0x15b   :  { %6915 = vst [vmem:[#allocation39_spill] sm:$0xff] %v4600_v49  ;;  %6916 = vst [vmem:[#allocation40_spill] sm:$0xff] %v4602_v52 }
 0x15c   :  { %1281 = vrot.lane.b32.xlu0 %v1273_v53, %s4098_s23  ;;  %1247 = vrot.lane.b32.xlu1 %v1240_v63, %s4098_s23  ;;  %v1338_v53 = vstv %s3892_s26  ;;  %v1317_v63 = vrot.slane %v1303_v42, 3  ;;  %s4988_s26 = sld [smem:[#allocation5 + $0x1c]] }
 0x15d   :  { %v1340_v0 = vmul.f32 %v4607_v4, %v1338_v53  ;;  %v1339_v6 = vmul.f32 %v4612_v11, %v1338_v53  ;;  %v1342_v20 = vmul.f32 %v4592_v36, %v1338_v53  ;;  %v1343_v42 = vmul.f32 %v4623_v37, %v1338_v53 }
 0x15e   :  { %v4615_v14 = vpop.permute.xlu1 %649  ;;  %v4617_v7 = vpop.permute.xlu0 %709  ;;  %v1318_v22 = vsel %vm275_vm6, %v1316_v59, %v1317_v63  ;;  %v1320_v48 = vsel %vm275_vm6, %v1317_v63, %v1319_v62 }
 0x15f   :  { %6917 = vst [vmem:[#allocation41_spill] sm:$0xff] %v4615_v14  ;;  %6918 = vst [vmem:[#allocation42_spill] sm:$0xff] %v4617_v7  ;;  %v1351_v44 = vrot.slane %v1339_v6, 4  ;;  %v1356_v61 = vrot.slane %v1342_v20, 4 }
 0x160   :  { %1283 = vrot.lane.b32.xlu1 %v1275_v17, %s4098_s23  ;;  %1285 = vrot.lane.b32.xlu0 %v1278_v26, %s4098_s23  ;;  %v4644_v17 = vld [vmem:[#allocation2 + $0x10] sm:$0x3f]  ;;  %v1352_v26 = vrot.slane %v1340_v0, 4  ;;  %v1378_v0 = vstv %s3893_s27  ;;  %s4993_s27 = sld [smem:[#allocation5 + $0x23]] }
 0x161   :  { %v1341_v18 = vmul.f32 %v4644_v17, %v1338_v53  ;;  %v1379_v6 = vmul.f32 %v4612_v11, %v1378_v0  ;;  %v1381_v60 = vmul.f32 %v4644_v17, %v1378_v0 }
 0x162   :  { %v4628_v47 = vpop.permute.xlu1 %711  ;;  %v4630_v32 = vpop.permute.xlu0 %713  ;;  %v1353_v9 = vsel %vm308_vm7, %v1351_v44, %v1352_v26  ;;  %v1382_v44 = vmul.f32 %v4592_v36, %v1378_v0 }
 0x163   :  { %6919 = vst [vmem:[#allocation43_spill] sm:$0xff] %v4628_v47  ;;  %6920 = vst [vmem:[#allocation44_spill] sm:$0xff] %v4630_v32  ;;  %v1354_v15 = vrot.slane %v1341_v18, 4 }
 0x164   :  { %1287 = vrot.lane.b32.xlu1 %v1280_v35, %s4098_s23  ;;  %1321 = vrot.lane.b32.xlu0 %v1313_v58, %s4098_s23  ;;  %v4657_v58 = vld [vmem:[#allocation2 + $0x28] sm:$0x3f] }
 0x165   :  { %v1344_v59 = vmul.f32 %v4657_v58, %v1338_v53  ;;  %v1355_v53 = vsel %vm308_vm7, %v1352_v26, %v1354_v15  ;;  %v1394_v15 = vrot.slane %v1381_v60, 5 }
 0x166   :  { %v4639_v12 = vpop.permute.xlu1 %715  ;;  %v4641_v24 = vpop.permute.xlu0 %749 }
 0x167   :  { %6921 = vst [vmem:[#allocation45_spill] sm:$0xff] %v4639_v12  ;;  %6922 = vst [vmem:[#allocation46_spill] sm:$0xff] %v4641_v24  ;;  %v1359_v18 = vrot.slane %v1344_v59, 4  ;;  %v1384_v59 = vmul.f32 %v4657_v58, %v1378_v0 }
 0x168   :  { %1323 = vrot.lane.b32.xlu1 %v1315_v43, %s4098_s23  ;;  %1325 = vrot.lane.b32.xlu0 %v1318_v22, %s4098_s23  ;;  %v1357_v43 = vrot.slane %v1343_v42, 4  ;;  %v1380_v22 = vmul.f32 %v4607_v4, %v1378_v0 }
 0x16a   :  { %v4652_v35 = vpop.permute.xlu1 %751  ;;  %v4654_v29 = vpop.permute.xlu0 %753  ;;  %v1358_v20 = vsel %vm308_vm7, %v1356_v61, %v1357_v43  ;;  %v1392_v42 = vrot.slane %v1380_v22, 5  ;;  %v1360_v26 = vsel %vm308_vm7, %v1357_v43, %v1359_v18  ;;  %v1418_v61 = vstv %s3894_s29  ;;  %s5004_s29 = sld [smem:[#allocation5 + $0x32]] }
 0x16b   :  { %6923 = vst [vmem:[#allocation47_spill] sm:$0xff] %v4652_v35  ;;  %6924 = vst [vmem:[#allocation48_spill] sm:$0xff] %v4654_v29  ;;  %v1420_v35 = vmul.f32 %v4607_v4, %v1418_v61  ;;  %v1421_v43 = vmul.f32 %v4644_v17, %v1418_v61 }
 0x16c   :  { %1327 = vrot.lane.b32.xlu1 %v1320_v48, %s4098_s23  ;;  %1361 = vrot.lane.b32.xlu0 %v1353_v9, %s4098_s23  ;;  %v1383_v48 = vmul.f32 %v4623_v37, %v1378_v0  ;;  %v1391_v9 = vrot.slane %v1379_v6, 5  ;;  %v1419_v6 = vmul.f32 %v4612_v11, %v1418_v61  ;;  %v1395_v60 = vsel %vm341_vm8, %v1392_v42, %v1394_v15 }
 0x16d   :  { %v1399_v0 = vrot.slane %v1384_v59, 5  ;;  %v1434_v15 = vrot.slane %v1421_v43, 6  ;;  %v1458_v43 = vstv %s3895_s4  ;;  %s5008_s4 = sld [smem:[#allocation5 + $0x39]] }
 0x16e   :  { %v4665_v63 = vpop.permute.xlu1 %755  ;;  %v4667_v62 = vpop.permute.xlu0 %789  ;;  %v1393_v22 = vsel %vm341_vm8, %v1391_v9, %v1392_v42  ;;  %v1397_v29 = vrot.slane %v1383_v48, 5  ;;  %v1422_v48 = vmul.f32 %v4592_v36, %v1418_v61  ;;  %v1423_v9 = vmul.f32 %v4623_v37, %v1418_v61 }
 0x16f   :  { %6925 = vst [vmem:[#allocation49_spill] sm:$0xff] %v4665_v63  ;;  %6926 = vst [vmem:[#allocation50_spill] sm:$0xff] %v4667_v62  ;;  %v1396_v63 = vrot.slane %v1382_v44, 5  ;;  %v1432_v44 = vrot.slane %v1420_v35, 6 }
 0x170   :  { %1363 = vrot.lane.b32.xlu1 %v1355_v53, %s4098_s23  ;;  %1365 = vrot.lane.b32.xlu0 %v1358_v20, %s4098_s23  ;;  %v1400_v42 = vsel %vm341_vm8, %v1397_v29, %v1399_v0  ;;  %v1437_v59 = vrot.slane %v1423_v9, 6  ;;  %v1459_v9 = vmul.f32 %v4612_v11, %v1458_v43 }
 0x171   :  { %v1398_v18 = vsel %vm341_vm8, %v1396_v63, %v1397_v29  ;;  %v1436_v63 = vrot.slane %v1422_v48, 6 }
 0x172   :  { %v4676_v51 = vpop.permute.xlu1 %791  ;;  %v4678_v62 = vpop.permute.xlu0 %793 }
 0x173   :  { %6927 = vst [vmem:[#allocation51_spill] sm:$0xff] %v4676_v51  ;;  %6928 = vst [vmem:[#allocation52_spill] sm:$0xff] %v4678_v62  ;;  %v1438_v29 = vsel %vm374_vm9, %v1436_v63, %v1437_v59  ;;  %v1460_v63 = vmul.f32 %v4607_v4, %v1458_v43 }
 0x174   :  { %1367 = vrot.lane.b32.xlu1 %v1360_v26, %s4098_s23  ;;  %1401 = vrot.lane.b32.xlu0 %v1393_v22, %s4098_s23  ;;  %v1431_v26 = vrot.slane %v1419_v6, 6 }
 0x176   :  { %v4687_v53 = vpop.permute.xlu1 %795  ;;  %v4689_v20 = vpop.permute.xlu0 %829  ;;  %v1433_v35 = vsel %vm374_vm9, %v1431_v26, %v1432_v44  ;;  %v1484_v26 = vstv %s3896_s5  ;;  %s5022_s5 = sld [smem:[#allocation5 + $0x2a]] }
 0x177   :  { %6929 = vst [vmem:[#allocation53_spill] sm:$0xff] %v4687_v53  ;;  %6930 = vst [vmem:[#allocation54_spill] sm:$0xff] %v4689_v20  ;;  %v1424_v53 = vmul.f32 %v4657_v58, %v1418_v61 }
 0x178   :  { %1403 = vrot.lane.b32.xlu1 %v1395_v60, %s4098_s23  ;;  %1405 = vrot.lane.b32.xlu0 %v1398_v18, %s4098_s23  ;;  %v1435_v18 = vsel %vm374_vm9, %v1432_v44, %v1434_v15  ;;  %v1486_v44 = vmul.f32 %v4607_v4, %v1484_v26 }
 0x179   :  { %v1439_v0 = vrot.slane %v1424_v53, 6  ;;  %v1485_v53 = vmul.f32 %v4612_v11, %v1484_v26 }
 0x17a   :  { %v4698_v22 = vpop.permute.xlu1 %831  ;;  %v4700_v20 = vpop.permute.xlu0 %833 }
 0x17b   :  { %6931 = vst [vmem:[#allocation55_spill] sm:$0xff] %v4698_v22  ;;  %6932 = vst [vmem:[#allocation56_spill] sm:$0xff] %v4700_v20 }
 0x17c   :  { %1407 = vrot.lane.b32.xlu1 %v1400_v42, %s4098_s23  ;;  %1441 = vrot.lane.b32.xlu0 %v1433_v35, %s4098_s23  ;;  %v1440_v42 = vsel %vm374_vm9, %v1437_v59, %v1439_v0  ;;  %v1498_v59 = vrot.slane %v1486_v44, 1  ;;  %v1488_v0 = vmul.f32 %v4592_v36, %v1484_v26  ;;  %v5090_v7 = vstv %s5022_s5  ;;  %s5757_s5 = sld [smem:[#allocation5 + $0x54]] }
 0x17e   :  { %v4707_v60 = vpop.permute.xlu1 %835  ;;  %v4709_v6 = vpop.permute.xlu0 %869  ;;  %v1502_v20 = vrot.slane %v1488_v0, 1 }
 0x17f   :  { %6933 = vst [vmem:[#allocation57_spill] sm:$0xff] %v4707_v60  ;;  %6934 = vst [vmem:[#allocation58_spill] sm:$0xff] %v4709_v6  ;;  %v1490_v6 = vmul.f32 %v4657_v58, %v1484_v26  ;;  %v1524_v60 = vstv %s3897_s6  ;;  %s5774_s6 = sld [smem:[#allocation5 + $0x5b]] }
 0x180   :  { %1443 = vrot.lane.b32.xlu1 %v1435_v18, %s4098_s23  ;;  %1445 = vrot.lane.b32.xlu0 %v1438_v29, %s4098_s23  ;;  %v1461_v18 = vmul.f32 %v4592_v36, %v1458_v43  ;;  %v1487_v29 = vmul.f32 %v4644_v17, %v1484_v26 }
 0x182   :  { %v4715_v48 = vpop.permute.xlu1 %871  ;;  %v4717_v61 = vpop.permute.xlu0 %873 }
 0x183   :  { %6935 = vst [vmem:[#allocation59_spill] sm:$0xff] %v4715_v48  ;;  %6936 = vst [vmem:[#allocation60_spill] sm:$0xff] %v4717_v61  ;;  %v1500_v48 = vrot.slane %v1487_v29, 1  ;;  %v1505_v29 = vrot.slane %v1490_v6, 1 }
 0x184   :  { %1447 = vrot.lane.b32.xlu1 %v1440_v42, %s4098_s23  ;;  %1467 = vrot.lane.b32.xlu0 %v1459_v9, %s4099_s7  ;;  %v1489_v42 = vmul.f32 %v4623_v37, %v1484_v26  ;;  %v1497_v9 = vrot.slane %v1485_v53, 1  ;;  %v1525_v53 = vmul.f32 %v4612_v11, %v1524_v60 }
 0x185   :  { %v1501_v26 = vsel %vm209_vm4, %v1498_v59, %v1500_v48 }
 0x186   :  { %v4725_v15 = vpop.permute.xlu1 %875  ;;  %v4727_v35 = vpop.permute.xlu0 %909  ;;  %v1499_v44 = vsel %vm209_vm4, %v1497_v9, %v1498_v59  ;;  %v1503_v22 = vrot.slane %v1489_v42, 1  ;;  %v1528_v9 = vmul.f32 %v4592_v36, %v1524_v60  ;;  %v1530_v59 = vmul.f32 %v4657_v58, %v1524_v60 }
 0x187   :  { %6937 = vst [vmem:[#allocation61_spill] sm:$0xff] %v4725_v15  ;;  %6938 = vst [vmem:[#allocation62_spill] sm:$0xff] %v4727_v35  ;;  %v1462_v35 = vmul.f32 %v4623_v37, %v1458_v43 }
 0x188   :  { %1469 = vrot.lane.b32.xlu1 %v1460_v63, %s4099_s7  ;;  %1471 = vrot.lane.b32.xlu0 %v1461_v18, %s4099_s7  ;;  %v1526_v63 = vmul.f32 %v4607_v4, %v1524_v60  ;;  %v1504_v0 = vsel %vm209_vm4, %v1502_v20, %v1503_v22  ;;  %v1506_v6 = vsel %vm209_vm4, %v1503_v22, %v1505_v29  ;;  %v1564_v20 = vstv %s3898_s8  ;;  %s5840_s8 = sld [smem:[#allocation5 + $0x50]] }
 0x189   :  { %v1567_v29 = vmul.f32 %v4644_v17, %v1564_v20 }
 0x18a   :  { %v4736_v61 = vpop.permute.xlu1 %911  ;;  %v4738_v15 = vpop.permute.xlu0 %913  ;;  %v1538_v42 = vrot.slane %v1526_v63, 2 }
 0x18b   :  { %6939 = vst [vmem:[#allocation63_spill] sm:$0xff] %v4736_v61  ;;  %6940 = vst [vmem:[#allocation64_spill] sm:$0xff] %v4738_v15  ;;  %v1527_v15 = vmul.f32 %v4644_v17, %v1524_v60  ;;  %v1542_v61 = vrot.slane %v1528_v9, 2 }
 0x18c   :  { %1473 = vrot.lane.b32.xlu1 %v1462_v35, %s4099_s7  ;;  %1507 = vrot.lane.b32.xlu0 %v1499_v44, %s4099_s7  ;;  %v1529_v35 = vmul.f32 %v4623_v37, %v1524_v60  ;;  %v1537_v44 = vrot.slane %v1525_v53, 2  ;;  %v1565_v53 = vmul.f32 %v4612_v11, %v1564_v20 }
 0x18d   :  { %v1540_v48 = vrot.slane %v1527_v15, 2  ;;  %v1545_v15 = vrot.slane %v1530_v59, 2  ;;  %v1570_v59 = vmul.f32 %v4657_v58, %v1564_v20 }
 0x18e   :  { %v4747_v18 = vpop.permute.xlu1 %915  ;;  %v4749_v43 = vpop.permute.xlu0 %975  ;;  %v1539_v63 = vsel %vm242_vm5, %v1537_v44, %v1538_v42  ;;  %v1543_v62 = vrot.slane %v1529_v35, 2  ;;  %v1568_v44 = vmul.f32 %v4592_v36, %v1564_v20 }
 0x18f   :  { %6941 = vst [vmem:[#allocation65_spill] sm:$0xff] %v4747_v18  ;;  %6942 = vst [vmem:[#allocation66_spill] sm:$0xff] %v4749_v43  ;;  %v1541_v60 = vsel %vm242_vm5, %v1538_v42, %v1540_v48  ;;  %v1580_v48 = vrot.slane %v1567_v29, 3 }
 0x190   :  { %1509 = vrot.lane.b32.xlu1 %v1501_v26, %s4099_s7  ;;  %1511 = vrot.lane.b32.xlu0 %v1504_v0, %s4099_s7  ;;  %v1566_v26 = vmul.f32 %v4607_v4, %v1564_v20  ;;  %v1544_v9 = vsel %vm242_vm5, %v1542_v61, %v1543_v62  ;;  %v1546_v42 = vsel %vm242_vm5, %v1543_v62, %v1545_v15  ;;  %v1604_v61 = vstv %s3899_s9  ;;  %s5142_s9 = sld [smem:[#allocation5 + $0x47]] }
 0x191   :  { %v1585_v15 = vrot.slane %v1570_v59, 3  ;;  %v1607_v29 = vmul.f32 %v4644_v17, %v1604_v61  ;;  %v1610_v59 = vmul.f32 %v4657_v58, %v1604_v61 }
 0x192   :  { %v4758_v18 = vpop.permute.xlu1 %977  ;;  %v4760_v43 = vpop.permute.xlu0 %979  ;;  %v1578_v35 = vrot.slane %v1566_v26, 3 }
 0x193   :  { %6943 = vst [vmem:[#allocation67_spill] sm:$0xff] %v4758_v18  ;;  %6944 = vst [vmem:[#allocation68_spill] sm:$0xff] %v4760_v43  ;;  %v1582_v43 = vrot.slane %v1568_v44, 3 }
 0x194   :  { %1513 = vrot.lane.b32.xlu1 %v1506_v6, %s4099_s7  ;;  %1547 = vrot.lane.b32.xlu0 %v1539_v63, %s4099_s7  ;;  %v1569_v6 = vmul.f32 %v4623_v37, %v1564_v20  ;;  %v1577_v63 = vrot.slane %v1565_v53, 3  ;;  %v1605_v53 = vmul.f32 %v4612_v11, %v1604_v61  ;;  %v1581_v20 = vsel %vm275_vm6, %v1578_v35, %v1580_v48 }
 0x195   :  { %v1620_v48 = vrot.slane %v1607_v29, 4 }
 0x196   :  { %v4769_v0 = vpop.permute.xlu1 %981  ;;  %v4771_v22 = vpop.permute.xlu0 %1015  ;;  %v1579_v26 = vsel %vm275_vm6, %v1577_v63, %v1578_v35  ;;  %v1583_v18 = vrot.slane %v1569_v6, 3  ;;  %v1608_v63 = vmul.f32 %v4592_v36, %v1604_v61 }
 0x197   :  { %6945 = vst [vmem:[#allocation69_spill] sm:$0xff] %v4769_v0  ;;  %6946 = vst [vmem:[#allocation70_spill] sm:$0xff] %v4771_v22 }
 0x198   :  { %1549 = vrot.lane.b32.xlu1 %v1541_v60, %s4099_s7  ;;  %1551 = vrot.lane.b32.xlu0 %v1544_v9, %s4099_s7  ;;  %v1606_v60 = vmul.f32 %v4607_v4, %v1604_v61  ;;  %v1584_v44 = vsel %vm275_vm6, %v1582_v43, %v1583_v18  ;;  %v1586_v35 = vsel %vm275_vm6, %v1583_v18, %v1585_v15  ;;  %v1644_v43 = vstv %s3900_s10  ;;  %s5199_s10 = sld [smem:[#allocation5 + $0x4e]] }
 0x199   :  { %v1625_v15 = vrot.slane %v1610_v59, 4  ;;  %v1647_v29 = vmul.f32 %v4644_v17, %v1644_v43  ;;  %v1650_v59 = vmul.f32 %v4657_v58, %v1644_v43 }
 0x19a   :  { %v4780_v0 = vpop.permute.xlu1 %1017  ;;  %v4782_v22 = vpop.permute.xlu0 %1019  ;;  %v1618_v6 = vrot.slane %v1606_v60, 4 }
 0x19b   :  { %6947 = vst [vmem:[#allocation71_spill] sm:$0xff] %v4780_v0  ;;  %6948 = vst [vmem:[#allocation72_spill] sm:$0xff] %v4782_v22  ;;  %v1622_v22 = vrot.slane %v1608_v63, 4 }
 0x19c   :  { %1553 = vrot.lane.b32.xlu1 %v1546_v42, %s4099_s7  ;;  %1587 = vrot.lane.b32.xlu0 %v1579_v26, %s4099_s7  ;;  %v1609_v42 = vmul.f32 %v4623_v37, %v1604_v61  ;;  %v1617_v26 = vrot.slane %v1605_v53, 4  ;;  %v1645_v53 = vmul.f32 %v4612_v11, %v1644_v43  ;;  %v1621_v61 = vsel %vm308_vm7, %v1618_v6, %v1620_v48 }
 0x19d   :  { %v1660_v48 = vrot.slane %v1647_v29, 5 }
 0x19e   :  { %v4791_v9 = vpop.permute.xlu1 %1021  ;;  %v4793_v62 = vpop.permute.xlu0 %1055  ;;  %v1619_v60 = vsel %vm308_vm7, %v1617_v26, %v1618_v6  ;;  %v1623_v0 = vrot.slane %v1609_v42, 4  ;;  %v1648_v26 = vmul.f32 %v4592_v36, %v1644_v43 }
 0x19f   :  { %6949 = vst [vmem:[#allocation73_spill] sm:$0xff] %v4791_v9  ;;  %6950 = vst [vmem:[#allocation74_spill] sm:$0xff] %v4793_v62 }
 0x1a0   :  { %1589 = vrot.lane.b32.xlu1 %v1581_v20, %s4099_s7  ;;  %1591 = vrot.lane.b32.xlu0 %v1584_v44, %s4099_s7  ;;  %v1646_v20 = vmul.f32 %v4607_v4, %v1644_v43  ;;  %v1624_v63 = vsel %vm308_vm7, %v1622_v22, %v1623_v0  ;;  %v1626_v6 = vsel %vm308_vm7, %v1623_v0, %v1625_v15  ;;  %v1684_v22 = vstv %s3901_s11  ;;  %s5245_s11 = sld [smem:[#allocation5 + $0x55]] }
 0x1a1   :  { %v1686_v51 = vmul.f32 %v4607_v4, %v1684_v22  ;;  %v1687_v15 = vmul.f32 %v4644_v17, %v1684_v22 }
 0x1a2   :  { %v4802_v9 = vpop.permute.xlu1 %1057  ;;  %v4804_v62 = vpop.permute.xlu0 %1059  ;;  %v1658_v42 = vrot.slane %v1646_v20, 5 }
 0x1a3   :  { %6951 = vst [vmem:[#allocation75_spill] sm:$0xff] %v4802_v9  ;;  %6952 = vst [vmem:[#allocation76_spill] sm:$0xff] %v4804_v62  ;;  %v1662_v62 = vrot.slane %v1648_v26, 5  ;;  %v1698_v26 = vrot.slane %v1686_v51, 6 }
 0x1a4   :  { %1593 = vrot.lane.b32.xlu1 %v1586_v35, %s4099_s7  ;;  %1627 = vrot.lane.b32.xlu0 %v1619_v60, %s4099_s7  ;;  %v1649_v35 = vmul.f32 %v4623_v37, %v1644_v43  ;;  %v1657_v60 = vrot.slane %v1645_v53, 5  ;;  %v1685_v53 = vmul.f32 %v4612_v11, %v1684_v22  ;;  %v1661_v0 = vsel %vm341_vm8, %v1658_v42, %v1660_v48 }
 0x1a5   :  { %v1665_v43 = vrot.slane %v1650_v59, 5  ;;  %v1700_v48 = vrot.slane %v1687_v15, 6  ;;  %v1724_v15 = vstv %s3902_s12  ;;  %s5326_s12 = sld [smem:[#allocation5 + $0x5c]] }
 0x1a6   :  { %v4813_v44 = vpop.permute.xlu1 %1061  ;;  %v4815_v18 = vpop.permute.xlu0 %1095  ;;  %v1659_v20 = vsel %vm341_vm8, %v1657_v60, %v1658_v42  ;;  %v1663_v9 = vrot.slane %v1649_v35, 5  ;;  %v1688_v35 = vmul.f32 %v4592_v36, %v1684_v22  ;;  %v1689_v60 = vmul.f32 %v4623_v37, %v1684_v22 }
 0x1a7   :  { %6953 = vst [vmem:[#allocation77_spill] sm:$0xff] %v4813_v44  ;;  %6954 = vst [vmem:[#allocation78_spill] sm:$0xff] %v4815_v18 }
 0x1a8   :  { %1629 = vrot.lane.b32.xlu1 %v1621_v61, %s4099_s7  ;;  %1631 = vrot.lane.b32.xlu0 %v1624_v63, %s4099_s7  ;;  %v1664_v29 = vsel %vm341_vm8, %v1662_v62, %v1663_v9  ;;  %v1666_v42 = vsel %vm341_vm8, %v1663_v9, %v1665_v43  ;;  %v1702_v62 = vrot.slane %v1688_v35, 6  ;;  %v1703_v59 = vrot.slane %v1689_v60, 6 }
 0x1a9   :  { %v1725_v60 = vmul.f32 %v4612_v11, %v1724_v15 }
 0x1aa   :  { %v4824_v44 = vpop.permute.xlu1 %1097  ;;  %v4826_v18 = vpop.permute.xlu0 %1099  ;;  %v1704_v9 = vsel %vm374_vm9, %v1702_v62, %v1703_v59  ;;  %v1726_v62 = vmul.f32 %v4607_v4, %v1724_v15 }
 0x1ab   :  { %6955 = vst [vmem:[#allocation79_spill] sm:$0xff] %v4824_v44  ;;  %6956 = vst [vmem:[#allocation80_spill] sm:$0xff] %v4826_v18  ;;  %v5064_v44 = vld [vmem:[#allocation3 + $0x8] sm:$0xff] }
 0x1ac   :  { %1633 = vrot.lane.b32.xlu1 %v1626_v6, %s4099_s7  ;;  %1667 = vrot.lane.b32.xlu0 %v1659_v20, %s4099_s7  ;;  %v1697_v6 = vrot.slane %v1685_v53, 6 }
 0x1ae   :  { %v4835_v61 = vpop.permute.xlu1 %1101  ;;  %v4837_v63 = vpop.permute.xlu0 %1135  ;;  %v1699_v51 = vsel %vm374_vm9, %v1697_v6, %v1698_v26  ;;  %v1750_v6 = vstv %s3903_s13  ;;  %s5406_s13 = sld [smem:[#allocation5 + $0x33]] }
 0x1af   :  { %6957 = vst [vmem:[#allocation81_spill] sm:$0xff] %v4835_v61  ;;  %6958 = vst [vmem:[#allocation82_spill] sm:$0xff] %v4837_v63  ;;  %v1690_v61 = vmul.f32 %v4657_v58, %v1684_v22 }
 0x1b0   :  { %1669 = vrot.lane.b32.xlu1 %v1661_v0, %s4099_s7  ;;  %1671 = vrot.lane.b32.xlu0 %v1664_v29, %s4099_s7  ;;  %v1701_v29 = vsel %vm374_vm9, %v1698_v26, %v1700_v48  ;;  %v1752_v26 = vmul.f32 %v4607_v4, %v1750_v6 }
 0x1b1   :  { %v1705_v43 = vrot.slane %v1690_v61, 6  ;;  %v1751_v61 = vmul.f32 %v4612_v11, %v1750_v6 }
 0x1b2   :  { %v4846_v20 = vpop.permute.xlu1 %1137  ;;  %v4848_v63 = vpop.permute.xlu0 %1139 }
 0x1b3   :  { %6959 = vst [vmem:[#allocation83_spill] sm:$0xff] %v4846_v20  ;;  %6960 = vst [vmem:[#allocation84_spill] sm:$0xff] %v4848_v63  ;;  %v1756_v20 = vmul.f32 %v4657_v58, %v1750_v6 }
 0x1b4   :  { %1673 = vrot.lane.b32.xlu1 %v1666_v42, %s4099_s7  ;;  %1707 = vrot.lane.b32.xlu0 %v1699_v51, %s4099_s7  ;;  %v1706_v42 = vsel %vm374_vm9, %v1703_v59, %v1705_v43  ;;  %v1764_v59 = vrot.slane %v1752_v26, 1  ;;  %v1754_v43 = vmul.f32 %v4592_v36, %v1750_v6 }
 0x1b6   :  { %v4855_v0 = vpop.permute.xlu1 %1141  ;;  %v4857_v53 = vpop.permute.xlu0 %1175 }
 0x1b7   :  { %6961 = vst [vmem:[#allocation85_spill] sm:$0xff] %v4855_v0  ;;  %6962 = vst [vmem:[#allocation86_spill] sm:$0xff] %v4857_v53  ;;  %v1768_v0 = vrot.slane %v1754_v43, 1 }
 0x1b8   :  { %1709 = vrot.lane.b32.xlu1 %v1701_v29, %s4099_s7  ;;  %1711 = vrot.lane.b32.xlu0 %v1704_v9, %s4099_s7  ;;  %v1727_v29 = vmul.f32 %v4592_v36, %v1724_v15  ;;  %v1753_v9 = vmul.f32 %v4644_v17, %v1750_v6 }
 0x1ba   :  { %v4863_v35 = vpop.permute.xlu1 %1177  ;;  %v4865_v22 = vpop.permute.xlu0 %1179  ;;  %v1766_v53 = vrot.slane %v1753_v9, 1  ;;  %v1771_v9 = vrot.slane %v1756_v20, 1 }
 0x1bb   :  { %6963 = vst [vmem:[#allocation87_spill] sm:$0xff] %v4863_v35  ;;  %6964 = vst [vmem:[#allocation88_spill] sm:$0xff] %v4865_v22  ;;  %v1790_v22 = vstv %s3904_s14  ;;  %s5416_s14 = sld [smem:[#allocation5 + $0x3a]] }
 0x1bc   :  { %1713 = vrot.lane.b32.xlu1 %v1706_v42, %s4099_s7  ;;  %1733 = vrot.lane.b32.xlu0 %v1725_v60, %s4100_s15  ;;  %v1755_v42 = vmul.f32 %v4623_v37, %v1750_v6  ;;  %v1763_v60 = vrot.slane %v1751_v61, 1  ;;  %v1791_v61 = vmul.f32 %v4612_v11, %v1790_v22  ;;  %v1767_v6 = vsel %vm209_vm4, %v1764_v59, %v1766_v53 }
 0x1be   :  { %v4873_v48 = vpop.permute.xlu1 %1181  ;;  %v4875_v51 = vpop.permute.xlu0 %1201  ;;  %v1765_v26 = vsel %vm209_vm4, %v1763_v60, %v1764_v59  ;;  %v1769_v63 = vrot.slane %v1755_v42, 1  ;;  %v1794_v60 = vmul.f32 %v4592_v36, %v1790_v22  ;;  %v1796_v59 = vmul.f32 %v4657_v58, %v1790_v22 }
 0x1bf   :  { %6965 = vst [vmem:[#allocation89_spill] sm:$0xff] %v4873_v48  ;;  %6966 = vst [vmem:[#allocation90_spill] sm:$0xff] %v4875_v51  ;;  %v1728_v51 = vmul.f32 %v4623_v37, %v1724_v15 }
 0x1c0   :  { %1735 = vrot.lane.b32.xlu1 %v1726_v62, %s4100_s15  ;;  %1737 = vrot.lane.b32.xlu0 %v1727_v29, %s4100_s15  ;;  %v1792_v62 = vmul.f32 %v4607_v4, %v1790_v22  ;;  %v1770_v43 = vsel %vm209_vm4, %v1768_v0, %v1769_v63  ;;  %v1772_v20 = vsel %vm209_vm4, %v1769_v63, %v1771_v9  ;;  %v1830_v0 = vstv %s3905_s16  ;;  %s5448_s16 = sld [smem:[#allocation5 + $0x41]] }
 0x1c1   :  { %v1833_v9 = vmul.f32 %v4644_v17, %v1830_v0 }
 0x1c2   :  { %v4884_v35 = vpop.permute.xlu1 %1203  ;;  %v4886_v48 = vpop.permute.xlu0 %1205  ;;  %v1804_v42 = vrot.slane %v1792_v62, 2 }
 0x1c3   :  { %6967 = vst [vmem:[#allocation91_spill] sm:$0xff] %v4884_v35  ;;  %6968 = vst [vmem:[#allocation92_spill] sm:$0xff] %v4886_v48  ;;  %v1793_v35 = vmul.f32 %v4644_v17, %v1790_v22  ;;  %v1808_v48 = vrot.slane %v1794_v60, 2 }
 0x1c4   :  { %1739 = vrot.lane.b32.xlu1 %v1728_v51, %s4100_s15  ;;  %1773 = vrot.lane.b32.xlu0 %v1765_v26, %s4100_s15  ;;  %v1795_v51 = vmul.f32 %v4623_v37, %v1790_v22  ;;  %v1803_v26 = vrot.slane %v1791_v61, 2  ;;  %v1831_v61 = vmul.f32 %v4612_v11, %v1830_v0  ;;  %v1811_v22 = vrot.slane %v1796_v59, 2 }
 0x1c5   :  { %v1806_v53 = vrot.slane %v1793_v35, 2  ;;  %v1836_v59 = vmul.f32 %v4657_v58, %v1830_v0 }
 0x1c6   :  { %v4895_v29 = vpop.permute.xlu1 %1207  ;;  %v4897_v15 = vpop.permute.xlu0 %1241  ;;  %v1805_v62 = vsel %vm242_vm5, %v1803_v26, %v1804_v42  ;;  %v1809_v18 = vrot.slane %v1795_v51, 2  ;;  %v1834_v26 = vmul.f32 %v4592_v36, %v1830_v0 }
 0x1c7   :  { %6969 = vst [vmem:[#allocation93_spill] sm:$0xff] %v4895_v29  ;;  %6970 = vst [vmem:[#allocation94_spill] sm:$0xff] %v4897_v15  ;;  %v1807_v35 = vsel %vm242_vm5, %v1804_v42, %v1806_v53  ;;  %v1846_v53 = vrot.slane %v1833_v9, 3 }
 0x1c8   :  { %1775 = vrot.lane.b32.xlu1 %v1767_v6, %s4100_s15  ;;  %1777 = vrot.lane.b32.xlu0 %v1770_v43, %s4100_s15  ;;  %v1832_v6 = vmul.f32 %v4607_v4, %v1830_v0  ;;  %v1810_v60 = vsel %vm242_vm5, %v1808_v48, %v1809_v18  ;;  %v1812_v42 = vsel %vm242_vm5, %v1809_v18, %v1811_v22  ;;  %v1870_v48 = vstv %s3906_s17  ;;  %s5477_s17 = sld [smem:[#allocation5 + $0x48]] }
 0x1c9   :  { %v1851_v22 = vrot.slane %v1836_v59, 3  ;;  %v1873_v9 = vmul.f32 %v4644_v17, %v1870_v48  ;;  %v1876_v59 = vmul.f32 %v4657_v58, %v1870_v48 }
 0x1ca   :  { %v4906_v29 = vpop.permute.xlu1 %1243  ;;  %v4908_v15 = vpop.permute.xlu0 %1245  ;;  %v1844_v51 = vrot.slane %v1832_v6, 3 }
 0x1cb   :  { %6971 = vst [vmem:[#allocation95_spill] sm:$0xff] %v4906_v29  ;;  %6972 = vst [vmem:[#allocation96_spill] sm:$0xff] %v4908_v15 }
 0x1cc   :  { %1779 = vrot.lane.b32.xlu1 %v1772_v20, %s4100_s15  ;;  %1813 = vrot.lane.b32.xlu0 %v1805_v62, %s4100_s15  ;;  %v1835_v20 = vmul.f32 %v4623_v37, %v1830_v0  ;;  %v1843_v62 = vrot.slane %v1831_v61, 3  ;;  %v1871_v61 = vmul.f32 %v4612_v11, %v1870_v48  ;;  %v1847_v0 = vsel %vm275_vm6, %v1844_v51, %v1846_v53 }
 0x1cd   :  { %v1886_v53 = vrot.slane %v1873_v9, 4 }
 0x1ce   :  { %v4917_v43 = vpop.permute.xlu1 %1247  ;;  %v4919_v63 = vpop.permute.xlu0 %1281  ;;  %v1845_v6 = vsel %vm275_vm6, %v1843_v62, %v1844_v51  ;;  %v1849_v15 = vrot.slane %v1835_v20, 3  ;;  %v1874_v62 = vmul.f32 %v4592_v36, %v1870_v48 }
 0x1cf   :  { %6973 = vst [vmem:[#allocation97_spill] sm:$0xff] %v4917_v43  ;;  %6974 = vst [vmem:[#allocation98_spill] sm:$0xff] %v4919_v63  ;;  %v1848_v43 = vrot.slane %v1834_v26, 3 }
 0x1d0   :  { %1815 = vrot.lane.b32.xlu1 %v1807_v35, %s4100_s15  ;;  %1817 = vrot.lane.b32.xlu0 %v1810_v60, %s4100_s15  ;;  %v1872_v35 = vmul.f32 %v4607_v4, %v1870_v48  ;;  %v1852_v51 = vsel %vm275_vm6, %v1849_v15, %v1851_v22  ;;  %v1891_v22 = vrot.slane %v1876_v59, 4 }
 0x1d1   :  { %v1850_v26 = vsel %vm275_vm6, %v1848_v43, %v1849_v15  ;;  %v1910_v43 = vstv %s3907_s18  ;;  %s5559_s18 = sld [smem:[#allocation5 + $0x56]] }
 0x1d2   :  { %v4928_v29 = vpop.permute.xlu1 %1283  ;;  %v4930_v63 = vpop.permute.xlu0 %1285  ;;  %v1884_v20 = vrot.slane %v1872_v35, 4  ;;  %v1913_v9 = vmul.f32 %v4644_v17, %v1910_v43 }
 0x1d3   :  { %6975 = vst [vmem:[#allocation99_spill] sm:$0xff] %v4928_v29  ;;  %6976 = vst [vmem:[#allocation100_spill] sm:$0xff] %v4930_v63 }
 0x1d4   :  { %1819 = vrot.lane.b32.xlu1 %v1812_v42, %s4100_s15  ;;  %1853 = vrot.lane.b32.xlu0 %v1845_v6, %s4100_s15  ;;  %v1875_v42 = vmul.f32 %v4623_v37, %v1870_v48  ;;  %v1883_v6 = vrot.slane %v1871_v61, 4  ;;  %v1911_v61 = vmul.f32 %v4612_v11, %v1910_v43  ;;  %v1887_v48 = vsel %vm308_vm7, %v1884_v20, %v1886_v53 }
 0x1d5   :  { %v1926_v59 = vrot.slane %v1913_v9, 5 }
 0x1d6   :  { %v4939_v60 = vpop.permute.xlu1 %1287  ;;  %v4941_v18 = vpop.permute.xlu0 %1321  ;;  %v1885_v35 = vsel %vm308_vm7, %v1883_v6, %v1884_v20  ;;  %v1889_v63 = vrot.slane %v1875_v42, 4  ;;  %v1914_v6 = vmul.f32 %v4592_v36, %v1910_v43 }
 0x1d7   :  { %6977 = vst [vmem:[#allocation101_spill] sm:$0xff] %v4939_v60  ;;  %6978 = vst [vmem:[#allocation102_spill] sm:$0xff] %v4941_v18  ;;  %v1888_v60 = vrot.slane %v1874_v62, 4 }
 0x1d8   :  { %1855 = vrot.lane.b32.xlu1 %v1847_v0, %s4100_s15  ;;  %1857 = vrot.lane.b32.xlu0 %v1850_v26, %s4100_s15  ;;  %v1912_v0 = vmul.f32 %v4607_v4, %v1910_v43 }
 0x1d9   :  { %v1890_v62 = vsel %vm308_vm7, %v1888_v60, %v1889_v63  ;;  %v1892_v60 = vsel %vm308_vm7, %v1889_v63, %v1891_v22 }
 0x1da   :  { %v4950_v29 = vpop.permute.xlu1 %1323  ;;  %v4952_v18 = vpop.permute.xlu0 %1325  ;;  %v1924_v42 = vrot.slane %v1912_v0, 5  ;;  %v1916_v0 = vmul.f32 %v4657_v58, %v1910_v43 }
 0x1db   :  { %6979 = vst [vmem:[#allocation103_spill] sm:$0xff] %v4950_v29  ;;  %6980 = vst [vmem:[#allocation104_spill] sm:$0xff] %v4952_v18  ;;  %v1950_v29 = vstv %s3908_s19  ;;  %v2192_v18 = vstv %s5004_s29  ;;  %s5580_s19 = sld [smem:[#allocation5 + $0x5d]] }
 0x1dc   :  { %1859 = vrot.lane.b32.xlu1 %v1852_v51, %s4100_s15  ;;  %1893 = vrot.lane.b32.xlu0 %v1885_v35, %s4100_s15  ;;  %v1915_v51 = vmul.f32 %v4623_v37, %v1910_v43  ;;  %v1923_v35 = vrot.slane %v1911_v61, 5  ;;  %v1951_v63 = vmul.f32 %v4612_v11, %v1950_v29  ;;  %v4991_v61 = vstv %s3861_s21  ;;  %s5648_s21 = sld [smem:[#allocation5 + $0x31]] }
 0x1dd   :  { %v1927_v9 = vsel %vm341_vm8, %v1924_v42, %v1926_v59  ;;  %s5692_s29 = sld [smem:[#allocation5 + $0x4d]] }
 0x1de   :  { %v4961_v26 = vpop.permute.xlu1 %1327  ;;  %v4963_v15 = vpop.permute.xlu0 %1361  ;;  %v1963_v59 = vrot.slane %v1951_v63, 6 }
 0x1df   :  { %6981 = vst [vmem:[#allocation105_spill] sm:$0xff] %v4961_v26  ;;  %6982 = vst [vmem:[#allocation106_spill] sm:$0xff] %v4963_v15  ;;  %v1925_v15 = vsel %vm341_vm8, %v1923_v35, %v1924_v42  ;;  %v1929_v26 = vrot.slane %v1915_v51, 5  ;;  %v1953_v51 = vmul.f32 %v4644_v17, %v1950_v29  ;;  %v5015_v42 = vmul.f32 %v4607_v4, %v4991_v61 }
 0x1e0   :  { %1895 = vrot.lane.b32.xlu1 %v1887_v48, %s4100_s15  ;;  %1897 = vrot.lane.b32.xlu0 %v1890_v62, %s4100_s15  ;;  %v1928_v48 = vrot.slane %v1914_v6, 5  ;;  %v1952_v62 = vmul.f32 %v4607_v4, %v1950_v29  ;;  %v1931_v6 = vrot.slane %v1916_v0, 5 }
 0x1e2   :  { %v4976_v20 = vpop.permute.xlu1 %1363  ;;  %v4978_v53 = vpop.permute.xlu0 %1365  ;;  %v1964_v35 = vrot.slane %v1952_v62, 6  ;;  %v1932_v62 = vsel %vm341_vm8, %v1929_v26, %v1931_v6  ;;  %v5044_v6 = vstv %s4984_s24  ;;  %s5671_s24 = sld [smem:[#allocation5 + $0x3b]] }
 0x1e3   :  { %6983 = vst [vmem:[#allocation107_spill] sm:$0xff] %v4976_v20  ;;  %6984 = vst [vmem:[#allocation108_spill] sm:$0xff] %v4978_v53  ;;  %v1955_v20 = vmul.f32 %v4623_v37, %v1950_v29  ;;  %v5020_v37 = vstv %s4974_s2  ;;  %v1956_v53 = vmul.f32 %v4657_v58, %v1950_v29  ;;  %v263_v24 = vmul.f32 %v4612_v11, %v5044_v6  ;;  %s5664_s2 = sld [smem:[#allocation5 + $0x34]] }
 0x1e4   :  { %1899 = vrot.lane.b32.xlu1 %v1892_v60, %s4100_s15  ;;  %1933 = vrot.lane.b32.xlu0 %v1925_v15, %s4100_s15  ;;  %v1930_v15 = vsel %vm341_vm8, %v1928_v48, %v1929_v26  ;;  %v1954_v60 = vmul.f32 %v4592_v36, %v1950_v29  ;;  %v197_v36 = vmul.f32 %v4612_v11, %v4991_v61 }
 0x1e5   :  { %v1969_v63 = vrot.slane %v1955_v20, 6  ;;  %v5041_v26 = vmul.f32 %v4607_v4, %v5020_v37  ;;  %v230_v20 = vmul.f32 %v4612_v11, %v5020_v37 }
 0x1e6   :  { %v4995_v43 = vpop.permute.xlu1 %1367  ;;  %v4997_v22 = vpop.permute.xlu0 %1401  ;;  %v210_v29 = vrot.slane %v197_v36, 1  ;;  %v1971_v36 = vrot.slane %v1956_v53, 6 }
 0x1e7   :  { %6985 = vst [vmem:[#allocation109_spill] sm:$0xff] %v4995_v43  ;;  %6986 = vst [vmem:[#allocation110_spill] sm:$0xff] %v4997_v22  ;;  %v5011_v22 = vstv %s4972_s22  ;;  %v1968_v43 = vrot.slane %v1954_v60, 6  ;;  %s5655_s22 = sld [smem:[#allocation5 + $0x38]] }
 0x1e8   :  { %1935 = vrot.lane.b32.xlu1 %v1927_v9, %s4100_s15  ;;  %1937 = vrot.lane.b32.xlu0 %v1930_v15, %s4100_s15  ;;  %v1966_v9 = vrot.slane %v1953_v51, 6  ;;  %v1965_v15 = vsel %vm374_vm9, %v1963_v59, %v1964_v35  ;;  %v187_v58 = vmul.f32 %v4612_v11, %v5011_v22  ;;  %v5051_v51 = vstv %s4988_s26  ;;  %s5674_s26 = sld [smem:[#allocation5 + $0x3f]] }
 0x1e9   :  { %v296_v12 = vmul.f32 %v4612_v11, %v5051_v51  ;;  %v5086_v32 = vmul.f32 %v4607_v4, %v5051_v51  ;;  %v1972_v40 = vsel %vm374_vm9, %v1969_v63, %v1971_v36  ;;  %v276_v36 = vrot.slane %v263_v24, 3 }
 0x1ea   :  { %v5024_v0 = vpop.permute.xlu1 %1403  ;;  %v5026_v48 = vpop.permute.xlu0 %1405 }
 0x1eb   :  { %6987 = vst [vmem:[#allocation111_spill] sm:$0xff] %v5024_v0  ;;  %6988 = vst [vmem:[#allocation112_spill] sm:$0xff] %v5026_v48  ;;  %v5036_v0 = vstv %s6873_s1  ;;  %s5057_s1 = sld [smem:[#allocation5 + $0x40]]  ;;  %v1970_v48 = vsel %vm374_vm9, %v1968_v43, %v1969_v63  ;;  %v6991_v43 = vrot.slane %v5015_v42, 1  ;;  %v6994_v63 = vrot.slane %v5041_v26, 2 }
 0x1ec   :  { %1939 = vrot.lane.b32.xlu1 %v1932_v62, %s4100_s15  ;;  %1973 = vrot.lane.b32.xlu0 %v1965_v15, %s4100_s15  ;;  %v5059_v62 = vld [vmem:[#allocation3] sm:$0xff]  ;;  %v1967_v15 = vsel %vm374_vm9, %v1964_v35, %v1966_v9  ;;  %v2218_v35 = vstv %s5008_s4  ;;  %v191_v47 = vadd.f32 %v187_v58, %v5036_v0  ;;  %v243_v9 = vrot.slane %v230_v20, 2  ;;  %s5715_s4 = sld [smem:[#allocation5 + $0x42]] }
 0x1ed   :  { %v212_v53 = vsel %vm209_vm4, %v210_v29, %v6991_v43  ;;  %v2193_v50 = vmul.f32 %v2192_v18, %v5059_v62  ;;  %v5097_v29 = vld [vmem:[#allocation3 + $0x10] sm:$0x3f]  ;;  %v5099_v43 = vld [vmem:[#allocation3 + $0x18] sm:$0xff]  ;;  %v2219_v14 = vmul.f32 %v2218_v35, %v5059_v62  ;;  %v5104_v52 = vmul.f32 %v2218_v35, %v5064_v44  ;;  %v5106_v58 = vld [vmem:[#allocation3 + $0x20] sm:$0xff] }
 0x1ee   :  { %v5053_v60 = vpop.permute.xlu1 %1407  ;;  %v5055_v59 = vpop.permute.xlu0 %1441  ;;  %v224_v39 = vadd.f32 %v212_v53, %v191_v47  ;;  %v245_v20 = vsel %vm242_vm5, %v243_v9, %v6994_v63  ;;  %v309_v47 = vrot.slane %v296_v12, 4  ;;  %v2222_v12 = vmul.f32 %v2218_v35, %v5099_v43 }
 0x1ef   :  { %6989 = vst [vmem:[#allocation113_spill] sm:$0xff] %v5053_v60  ;;  %6990 = vst [vmem:[#allocation114_spill] sm:$0xff] %v5055_v59  ;;  %v5070_v60 = vmul.f32 %v4607_v4, %v5044_v6  ;;  %v5073_v59 = vstv %s4993_s27  ;;  %v2231_v31 = vrot.slane %v2219_v14, 1  ;;  %v2232_v24 = vrot.slane %v5104_v52, 1  ;;  %s5689_s27 = sld [smem:[#allocation5 + $0x46]] }
 0x1f0   :  { %1975 = vrot.lane.b32.xlu1 %v1967_v15, %s4100_s15  ;;  %1977 = vrot.lane.b32.xlu0 %v1970_v48, %s4100_s15  ;;  %v5113_v28 = vmul.f32 %v4607_v4, %v5073_v59  ;;  %v2194_v4 = vmul.f32 %v2192_v18, %v5064_v44  ;;  %v2223_v9 = vmul.f32 %v2218_v35, %v5106_v58  ;;  %v6998_v52 = vrot.slane %v5086_v32, 4 }
 0x1f1   :  { %v5131_v49 = vstv %s5057_s1  ;;  %v257_v63 = vadd.f32 %v245_v20, %v224_v39  ;;  %v6997_v53 = vrot.slane %v5070_v60, 3  ;;  %v5148_v39 = vmul.f32 %v3997_v56, %v5090_v7  ;;  %v3998_v20 = vld [vmem:[#allocation2 + $0x8] sm:$0xff]  ;;  %s5930_s1 = sld [smem:[#allocation5 + $0x57]] }
 0x1f2   :  { %v5092_v15 = vpop.permute.xlu1 %1443  ;;  %v5094_v48 = vpop.permute.xlu0 %1445  ;;  %v311_v14 = vsel %vm308_vm7, %v309_v47, %v6998_v52  ;;  %v2196_v10 = vmul.f32 %v2192_v18, %v5106_v58  ;;  %v2259_v47 = vmul.f32 %v5131_v49, %v5059_v62  ;;  %v2260_v56 = vmul.f32 %v5131_v49, %v5064_v44 }
 0x1f3   :  { %6992 = vst [vmem:[#allocation115_spill] sm:$0xff] %v5092_v15  ;;  %6993 = vst [vmem:[#allocation116_spill] sm:$0xff] %v5094_v48  ;;  %v329_v48 = vmul.f32 %v4612_v11, %v5073_v59  ;;  %v5121_v15 = vld [vmem:[#allocation3 + $0x28] sm:$0x3f]  ;;  %v2233_v52 = vsel %vm209_vm4, %v2231_v31, %v2232_v24  ;;  %v2236_v57 = vrot.slane %v2222_v12, 1  ;;  %v7001_v33 = vrot.slane %v5113_v28, 5 }
 0x1f4   :  { %1979 = vrot.lane.b32.xlu1 %v1972_v40, %s4100_s15  ;;  %2201 = vrot.lane.b32.xlu0 %v2193_v50, %s4095_s25  ;;  %v2195_v40 = vmul.f32 %v2192_v18, %v5099_v43  ;;  %v2221_v50 = vmul.f32 %v2218_v35, %v5097_v29  ;;  %v232_v18 = vmul.f32 %v4644_v17, %v5020_v37 }
 0x1f5   :  { %v265_v31 = vmul.f32 %v3999_v45, %v5044_v6 }
 0x1f6   :  { %v5123_v30 = vpop.permute.xlu1 %1447  ;;  %v5125_v11 = vpop.permute.xlu0 %1467  ;;  %v2234_v8 = vrot.slane %v2221_v50, 1  ;;  %v298_v50 = vmul.f32 %v3999_v45, %v5051_v51 }
 0x1f7   :  { %6995 = vst [vmem:[#allocation117_spill] sm:$0xff] %v5123_v30  ;;  %6996 = vst [vmem:[#allocation118_spill] sm:$0xff] %v5125_v11  ;;  %v278_v11 = vsel %vm275_vm6, %v276_v36, %v6997_v53  ;;  %v342_v30 = vrot.slane %v329_v48, 5  ;;  %v5151_v36 = vmul.f32 %v3998_v20, %v5090_v7  ;;  %v2224_v48 = vmul.f32 %v2218_v35, %v5121_v15 }
 0x1f8   :  { %2203 = vrot.lane.b32.xlu1 %v2194_v4, %s4095_s25  ;;  %2205 = vrot.lane.b32.xlu0 %v2195_v40, %s4095_s25  ;;  %v199_v53 = vmul.f32 %v4644_v17, %v4991_v61  ;;  %v2237_v35 = vrot.slane %v2223_v9, 1  ;;  %v290_v46 = vadd.f32 %v278_v11, %v257_v63  ;;  %v2272_v9 = vrot.slane %v2260_v56, 2 }
 0x1f9   :  { %v2239_v11 = vrot.slane %v2224_v48, 1  ;;  %v2262_v17 = vmul.f32 %v5131_v49, %v5099_v43  ;;  %v5190_v48 = vmul.f32 %v5131_v49, %v5106_v58  ;;  %v2298_v56 = vstv %s5142_s9  ;;  %s6004_s9 = sld [smem:[#allocation5 + $0x5e]] }
 0x1fa   :  { %v5156_v4 = vpop.permute.xlu1 %1469  ;;  %v5158_v40 = vpop.permute.xlu0 %1471  ;;  %v213_v63 = vrot.slane %v199_v53, 1  ;;  %v5204_v53 = vmul.f32 %v3999_v45, %v5090_v7 }
 0x1fb   :  { %6999 = vst [vmem:[#allocation119_spill] sm:$0xff] %v5156_v4  ;;  %7000 = vst [vmem:[#allocation120_spill] sm:$0xff] %v5158_v40  ;;  %v5169_v4 = vsel %vm341_vm8, %v342_v30, %v7001_v33  ;;  %v2271_v30 = vrot.slane %v2259_v47, 2  ;;  %v2238_v40 = vsel %vm209_vm4, %v2236_v57, %v2237_v35  ;;  %v188_v47 = vmul.f32 %v3998_v20, %v5011_v22 }
 0x1fc   :  { %2207 = vrot.lane.b32.xlu1 %v2196_v10, %s4095_s25  ;;  %2241 = vrot.lane.b32.xlu0 %v2233_v52, %s4095_s25  ;;  %v2261_v10 = vmul.f32 %v5131_v49, %v5097_v29  ;;  %v2235_v52 = vsel %vm209_vm4, %v2232_v24, %v2234_v8  ;;  %v5201_v8 = vadd.f32 %v311_v14, %v290_v46  ;;  %v279_v57 = vrot.slane %v265_v31, 3 }
 0x1fd   :  { %v312_v24 = vrot.slane %v298_v50, 4  ;;  %v2240_v20 = vsel %vm209_vm4, %v2237_v35, %v2239_v11  ;;  %v2277_v19 = vrot.slane %v5190_v48, 2  ;;  %v2264_v46 = vmul.f32 %v5131_v49, %v5121_v15 }
 0x1fe   :  { %v5178_v12 = vpop.permute.xlu1 %1473  ;;  %v5180_v33 = vpop.permute.xlu0 %1507  ;;  %v2274_v21 = vrot.slane %v2261_v10, 2  ;;  %v2299_v14 = vmul.f32 %v2298_v56, %v5059_v62  ;;  %v192_v50 = vadd.f32 %v188_v47, %v5036_v0  ;;  %v7007_v11 = vrot.slane %v5041_v26, 2 }
 0x1ff   :  { %7002 = vst [vmem:[#allocation121_spill] sm:$0xff] %v5178_v12  ;;  %7003 = vst [vmem:[#allocation122_spill] sm:$0xff] %v5180_v33  ;;  %v246_v12 = vrot.slane %v232_v18, 2  ;;  %v5193_v33 = vmul.f32 %v3999_v45, %v5073_v59  ;;  %v2300_v45 = vmul.f32 %v2298_v56, %v5064_v44  ;;  %v7008_v49 = vrot.slane %v5070_v60, 3 }
 0x200   :  { %2243 = vrot.lane.b32.xlu1 %v2235_v52, %s4095_s25  ;;  %2245 = vrot.lane.b32.xlu0 %v2238_v40, %s4095_s25  ;;  %v2273_v52 = vsel %vm242_vm5, %v2271_v30, %v2272_v9  ;;  %v2276_v40 = vrot.slane %v2262_v17, 2  ;;  %v7009_v17 = vrot.slane %v5086_v32, 4  ;;  %v2275_v32 = vsel %vm242_vm5, %v2272_v9, %v2274_v21 }
 0x201   :  { %v247_v30 = vsel %vm242_vm5, %v7007_v11, %v246_v12  ;;  %v5230_v10 = vsel %vm275_vm6, %v7008_v49, %v279_v57  ;;  %v2301_v47 = vmul.f32 %v2298_v56, %v5097_v29  ;;  %v2302_v57 = vmul.f32 %v2298_v56, %v5099_v43 }
 0x202   :  { %v5206_v18 = vpop.permute.xlu1 %1509  ;;  %v5208_v34 = vpop.permute.xlu0 %1511  ;;  %v5235_v48 = vsel %vm308_vm7, %v7009_v17, %v312_v24  ;;  %v2303_v24 = vmul.f32 %v2298_v56, %v5106_v58  ;;  %v2312_v11 = vrot.slane %v2300_v45, 3  ;;  %v5256_v17 = vld [vmem:[#allocation2 + $0x20] sm:$0xff]  ;;  %v2338_v9 = vstv %s5199_s10  ;;  %v5275_v45 = vld [vmem:[#allocation2 + $0x28] sm:$0x3f]  ;;  %s6098_s10 = sld [smem:[#allocation5 + $0x35]] }
 0x203   :  { %7004 = vst [vmem:[#allocation123_spill] sm:$0xff] %v5206_v18  ;;  %7005 = vst [vmem:[#allocation124_spill] sm:$0xff] %v5208_v34  ;;  %v7006_v18 = vrot.slane %v5015_v42, 1  ;;  %v5237_v42 = vld [vmem:[#allocation2 + $0x18] sm:$0xff]  ;;  %v201_v31 = vmul.f32 %v5256_v17, %v4991_v61  ;;  %v2339_v1 = vmul.f32 %v2338_v9, %v5059_v62  ;;  %v2340_v2 = vmul.f32 %v2338_v9, %v5064_v44 }
 0x204   :  { %2247 = vrot.lane.b32.xlu1 %v2240_v20, %s4095_s25  ;;  %2281 = vrot.lane.b32.xlu0 %v2273_v52, %s4095_s25  ;;  %v189_v26 = vmul.f32 %v5237_v42, %v5011_v22  ;;  %v5243_v12 = vmul.f32 %v5237_v42, %v4991_v61  ;;  %v2279_v20 = vrot.slane %v2264_v46, 2  ;;  %v2311_v52 = vrot.slane %v2299_v14, 3 }
 0x205   :  { %v214_v35 = vsel %vm209_vm4, %v7006_v18, %v213_v63  ;;  %v2278_v18 = vsel %vm242_vm5, %v2276_v40, %v2277_v19  ;;  %v5262_v21 = vmul.f32 %v5237_v42, %v5020_v37  ;;  %v5273_v14 = vmul.f32 %v5256_v17, %v5020_v37 }
 0x206   :  { %v5247_v60 = vpop.permute.xlu1 %1513  ;;  %v5249_v63 = vpop.permute.xlu0 %1547  ;;  %v225_v49 = vadd.f32 %v214_v35, %v192_v50  ;;  %v5268_v40 = vadd.f32 %v189_v26, %v5036_v0  ;;  %v215_v46 = vrot.slane %v5243_v12, 1  ;;  %v202_v50 = vmul.f32 %v5275_v45, %v4991_v61 }
 0x207   :  { %7010 = vst [vmem:[#allocation125_spill] sm:$0xff] %v5247_v60  ;;  %7011 = vst [vmem:[#allocation126_spill] sm:$0xff] %v5249_v63  ;;  %v2316_v63 = vrot.slane %v2302_v57, 3  ;;  %v2317_v26 = vrot.slane %v2303_v24, 3  ;;  %v2304_v60 = vmul.f32 %v2298_v56, %v5121_v15  ;;  %v2280_v12 = vsel %vm242_vm5, %v2277_v19, %v2279_v20 }
 0x208   :  { %2283 = vrot.lane.b32.xlu1 %v2275_v32, %s4095_s25  ;;  %2285 = vrot.lane.b32.xlu0 %v2278_v18, %s4095_s25  ;;  %v2314_v18 = vrot.slane %v2301_v47, 3  ;;  %v2313_v34 = vsel %vm275_vm6, %v2311_v52, %v2312_v11  ;;  %v216_v55 = vrot.slane %v201_v31, 1  ;;  %v248_v61 = vrot.slane %v5262_v21, 2 }
 0x209   :  { %v5295_v47 = vmul.f32 %v5256_v17, %v5044_v6  ;;  %v258_v19 = vadd.f32 %v247_v30, %v225_v49  ;;  %v190_v56 = vmul.f32 %v5256_v17, %v5011_v22  ;;  %v218_v57 = vrot.slane %v202_v50, 1 }
 0x20a   :  { %v5279_v35 = vpop.permute.xlu1 %1549  ;;  %v5281_v32 = vpop.permute.xlu0 %1551  ;;  %v5302_v31 = vstv %s5245_s11  ;;  %v2315_v52 = vsel %vm275_vm6, %v2312_v11, %v2314_v18  ;;  %v2318_v21 = vsel %vm275_vm6, %v2316_v63, %v2317_v26  ;;  %v2351_v54 = vrot.slane %v2339_v1, 4  ;;  %s6109_s11 = sld [smem:[#allocation5 + $0x3c]] }
 0x20b   :  { %7012 = vst [vmem:[#allocation127_spill] sm:$0xff] %v5279_v35  ;;  %7013 = vst [vmem:[#allocation128_spill] sm:$0xff] %v5281_v32  ;;  %v5291_v35 = vmul.f32 %v5237_v42, %v5044_v6  ;;  %v2319_v32 = vrot.slane %v2304_v60, 3  ;;  %v2342_v30 = vmul.f32 %v2338_v9, %v5099_v43  ;;  %v2343_v22 = vmul.f32 %v2338_v9, %v5106_v58 }
 0x20c   :  { %2287 = vrot.lane.b32.xlu1 %v2280_v12, %s4095_s25  ;;  %2321 = vrot.lane.b32.xlu0 %v2313_v34, %s4095_s25  ;;  %v2341_v12 = vmul.f32 %v2338_v9, %v5097_v29  ;;  %v2352_v34 = vrot.slane %v2340_v2, 4  ;;  %v249_v49 = vrot.slane %v5273_v14, 2  ;;  %v5316_v50 = vmul.f32 %v5237_v42, %v5051_v51 }
 0x20d   :  { %v5320_v11 = vmul.f32 %v5256_v17, %v5051_v51  ;;  %v235_v60 = vmul.f32 %v5275_v45, %v5020_v37  ;;  %v217_v1 = vsel %vm209_vm4, %v215_v46, %v216_v55  ;;  %v281_v2 = vrot.slane %v5291_v35, 3 }
 0x20e   :  { %v5304_v24 = vpop.permute.xlu1 %1553  ;;  %v5306_v20 = vpop.permute.xlu0 %1587  ;;  %v194_v63 = vadd.f32 %v190_v56, %v5036_v0  ;;  %v219_v14 = vsel %vm209_vm4, %v216_v55, %v218_v57  ;;  %v2320_v37 = vsel %vm275_vm6, %v2317_v26, %v2319_v32  ;;  %v2353_v46 = vsel %vm308_vm7, %v2351_v54, %v2352_v34 }
 0x20f   :  { %7014 = vst [vmem:[#allocation129_spill] sm:$0xff] %v5304_v24  ;;  %7015 = vst [vmem:[#allocation130_spill] sm:$0xff] %v5306_v20  ;;  %v2354_v24 = vrot.slane %v2341_v12, 4  ;;  %v2356_v41 = vrot.slane %v2342_v30, 4  ;;  %v2357_v35 = vrot.slane %v2343_v22, 4  ;;  %v2380_v0 = vmul.f32 %v5302_v31, %v5064_v44 }
 0x210   :  { %2323 = vrot.lane.b32.xlu1 %v2315_v52, %s4095_s25  ;;  %2325 = vrot.lane.b32.xlu0 %v2318_v21, %s4095_s25  ;;  %v2344_v52 = vmul.f32 %v2338_v9, %v5121_v15  ;;  %v2379_v21 = vmul.f32 %v5302_v31, %v5059_v62  ;;  %v282_v55 = vrot.slane %v5295_v47, 3  ;;  %v5346_v56 = vmul.f32 %v5237_v42, %v5073_v59 }
 0x211   :  { %v251_v32 = vrot.slane %v235_v60, 2  ;;  %v268_v9 = vmul.f32 %v5275_v45, %v5044_v6  ;;  %v291_v54 = vadd.f32 %v5230_v10, %v258_v19  ;;  %v226_v26 = vadd.f32 %v217_v1, %v5268_v40 }
 0x212   :  { %v5332_v18 = vpop.permute.xlu1 %1589  ;;  %v5334_v20 = vpop.permute.xlu0 %1591  ;;  %v250_v57 = vsel %vm242_vm5, %v248_v61, %v249_v49  ;;  %v227_v12 = vadd.f32 %v219_v14, %v194_v63  ;;  %v2355_v22 = vsel %vm308_vm7, %v2352_v34, %v2354_v24  ;;  %v2381_v6 = vmul.f32 %v5302_v31, %v5097_v29 }
 0x213   :  { %7016 = vst [vmem:[#allocation131_spill] sm:$0xff] %v5332_v18  ;;  %v2382_v60 = vmul.f32 %v5302_v31, %v5099_v43  ;;  %v5366_v10 = vmul.f32 %v5302_v31, %v5106_v58  ;;  %v2358_v40 = vsel %vm308_vm7, %v2356_v41, %v2357_v35  ;;  %v2359_v61 = vrot.slane %v2344_v52, 4 }
 0x214   :  { %2327 = vrot.lane.b32.xlu1 %v2320_v37, %s4095_s25  ;;  %2361 = vrot.lane.b32.xlu0 %v2353_v46, %s4095_s25  ;;  %v2391_v19 = vrot.slane %v2379_v21, 5  ;;  %v2392_v1 = vrot.slane %v2380_v0, 5  ;;  %v314_v63 = vrot.slane %v5316_v50, 4  ;;  %v252_v14 = vsel %vm242_vm5, %v249_v49, %v251_v32 }
 0x215   :  { %v284_v24 = vrot.slane %v268_v9, 3  ;;  %v2418_v34 = vstv %s5326_s12  ;;  %v259_v37 = vadd.f32 %v250_v57, %v226_v26  ;;  %v283_v46 = vsel %vm275_vm6, %v281_v2, %v282_v55  ;;  %s6140_s12 = sld [smem:[#allocation5 + $0x43]] }
 0x216   :  { %v5355_v47 = vpop.permute.xlu1 %1593  ;;  %v5357_v30 = vpop.permute.xlu0 %1627  ;;  %v260_v18 = vadd.f32 %v252_v14, %v227_v12  ;;  %v301_v41 = vmul.f32 %v5275_v45, %v5051_v51  ;;  %v2394_v50 = vrot.slane %v2381_v6, 5  ;;  %v2396_v0 = vrot.slane %v2382_v60, 5 }
 0x217   :  { %v2397_v49 = vrot.slane %v5366_v10, 5  ;;  %v2384_v32 = vmul.f32 %v5302_v31, %v5121_v15  ;;  %v2360_v9 = vsel %vm308_vm7, %v2357_v35, %v2359_v61  ;;  %v2393_v26 = vsel %vm341_vm8, %v2391_v19, %v2392_v1 }
 0x218   :  { %2363 = vrot.lane.b32.xlu1 %v2355_v22, %s4095_s25  ;;  %2365 = vrot.lane.b32.xlu0 %v2358_v40, %s4095_s25  ;;  %v2419_v2 = vmul.f32 %v2418_v34, %v5059_v62  ;;  %v2420_v57 = vmul.f32 %v2418_v34, %v5064_v44  ;;  %v324_v51 = vadd.f32 %v5235_v48, %v291_v54  ;;  %v315_v12 = vrot.slane %v5320_v11, 4 }
 0x219   :  { %v333_v22 = vmul.f32 %v5256_v17, %v5073_v59  ;;  %v285_v6 = vsel %vm275_vm6, %v282_v55, %v284_v24  ;;  %v292_v31 = vadd.f32 %v283_v46, %v259_v37  ;;  %v317_v60 = vrot.slane %v301_v41, 4 }
 0x21a   :  { %v5377_v52 = vpop.permute.xlu1 %1629  ;;  %v5379_v21 = vpop.permute.xlu0 %1631  ;;  %v293_v35 = vadd.f32 %v285_v6, %v260_v18  ;;  %v334_v10 = vmul.f32 %v5275_v45, %v5073_v59  ;;  %v2395_v11 = vsel %vm341_vm8, %v2392_v1, %v2394_v50  ;;  %v2398_v54 = vsel %vm341_vm8, %v2396_v0, %v2397_v49 }
 0x21b   :  { %v2399_v61 = vrot.slane %v2384_v32, 5  ;;  %v2421_v55 = vmul.f32 %v2418_v34, %v5097_v29  ;;  %v2431_v19 = vrot.slane %v2419_v2, 6  ;;  %v2432_v14 = vrot.slane %v2420_v57, 6 }
 0x21c   :  { %2367 = vrot.lane.b32.xlu1 %v2360_v9, %s4095_s25  ;;  %2401 = vrot.lane.b32.xlu0 %v2393_v26, %s4095_s25  ;;  %v2422_v24 = vmul.f32 %v2418_v34, %v5099_v43  ;;  %v2423_v18 = vmul.f32 %v2418_v34, %v5106_v58  ;;  %v316_v59 = vsel %vm308_vm7, %v314_v63, %v315_v12  ;;  %v347_v37 = vrot.slane %v5346_v56, 5 }
 0x21d   :  { %v365_v1 = vmul.f32 %v5237_v42, %v5090_v7  ;;  %v366_v46 = vmul.f32 %v5256_v17, %v5090_v7  ;;  %v348_v41 = vrot.slane %v333_v22, 5  ;;  %v318_v50 = vsel %vm308_vm7, %v315_v12, %v317_v60 }
 0x21e   :  { %v5397_v40 = vpop.permute.xlu1 %1633  ;;  %v5399_v48 = vpop.permute.xlu0 %1667  ;;  %v350_v0 = vrot.slane %v334_v10, 5  ;;  %v367_v63 = vmul.f32 %v5275_v45, %v5090_v7  ;;  %v325_v56 = vadd.f32 %v316_v59, %v292_v31  ;;  %v326_v32 = vadd.f32 %v318_v50, %v293_v35 }
 0x21f   :  { %v2400_v17 = vsel %vm341_vm8, %v2397_v49, %v2399_v61  ;;  %v2424_v26 = vmul.f32 %v2418_v34, %v5121_v15  ;;  %v2433_v2 = vsel %vm374_vm9, %v2431_v19, %v2432_v14  ;;  %v2434_v57 = vrot.slane %v2421_v55, 6 }
 0x220   :  { %2403 = vrot.lane.b32.xlu1 %v2395_v11, %s4095_s25  ;;  %2405 = vrot.lane.b32.xlu0 %v2398_v54, %s4095_s25  ;;  %v2436_v22 = vrot.slane %v2422_v24, 6  ;;  %v2437_v6 = vrot.slane %v2423_v18, 6  ;;  %v356_v12 = vadd.f32 %v5169_v4, %v5201_v8  ;;  %v378_v7 = vrot.slane %v5204_v53, 6 }
 0x221   :  { %v7017_v45 = vrot.slane %v5193_v33, 5  ;;  %v7018_v31 = vrot.slane %v5113_v28, 5  ;;  %v380_v60 = vrot.slane %v365_v1, 6  ;;  %v349_v34 = vsel %vm341_vm8, %v347_v37, %v348_v41 }
 0x222   :  { %v5421_v9 = vpop.permute.xlu1 %1669  ;;  %v5423_v42 = vpop.permute.xlu0 %1671  ;;  %v381_v49 = vrot.slane %v366_v46, 6  ;;  %v351_v10 = vsel %vm341_vm8, %v348_v41, %v350_v0  ;;  %v383_v4 = vrot.slane %v367_v63, 6  ;;  %v375_v8 = vrot.slane %v5148_v39, 6 }
 0x223   :  { %v346_v35 = vsel %vm341_vm8, %v7018_v31, %v7017_v45  ;;  %v358_v53 = vadd.f32 %v349_v34, %v325_v56  ;;  %v359_v28 = vadd.f32 %v351_v10, %v326_v32  ;;  %v2435_v61 = vsel %vm374_vm9, %v2432_v14, %v2434_v57 }
 0x224   :  { %2407 = vrot.lane.b32.xlu1 %v2400_v17, %s4095_s25  ;;  %2441 = vrot.lane.b32.xlu0 %v2433_v2, %s4095_s25  ;;  %v357_v33 = vadd.f32 %v346_v35, %v324_v51  ;;  %v2438_v55 = vsel %vm374_vm9, %v2436_v22, %v2437_v6  ;;  %v2439_v19 = vrot.slane %v2424_v26, 6  ;;  %v2458_v24 = vstv %s5406_s13  ;;  %s6155_s13 = sld [smem:[#allocation5 + $0x4a]] }
 0x225   :  { %v7019_v18 = vrot.slane %v5151_v36, 6  ;;  %v2484_v39 = vstv %s5416_s14  ;;  %v382_v1 = vsel %vm374_vm9, %v380_v60, %v381_v49  ;;  %v384_v46 = vsel %vm374_vm9, %v381_v49, %v383_v4  ;;  %v7021_v4 = vld [vmem:[#allocation22_spill] sm:$0xff]  ;;  %s6310_s14 = sld [smem:[#allocation5 + $0x58]] }
 0x226   :  { %v5441_v11 = vpop.permute.xlu1 %1673  ;;  %v5443_v54 = vpop.permute.xlu0 %1707  ;;  %v391_v50 = vadd.f32 %v382_v1, %v358_v53  ;;  %v392_v0 = vadd.f32 %v384_v46, %v359_v28  ;;  %v2459_v32 = vmul.f32 %v2458_v24, %v5059_v62  ;;  %v2440_v26 = vsel %vm374_vm9, %v2437_v6, %v2439_v19  ;;  %v7026_v46 = vld [vmem:[#allocation25_spill] sm:$0xff] }
 0x227   :  { %v377_v59 = vsel %vm374_vm9, %v375_v8, %v7019_v18  ;;  %v7020_v37 = vmov %v7019_v18  ;;  %v2485_v36 = vmul.f32 %v2484_v39, %v5059_v62  ;;  %v2486_v2 = vmul.f32 %v2484_v39, %v5064_v44 }
 0x228   :  { %2443 = vrot.lane.b32.xlu1 %v2435_v61, %s4095_s25  ;;  %2445 = vrot.lane.b32.xlu0 %v2438_v55, %s4095_s25  ;;  %v389_v51 = vadd.f32 %v377_v59, %v356_v12  ;;  %v379_v14 = vsel %vm374_vm9, %v7020_v37, %v378_v7  ;;  %v417_v22 = vadd.f32 %v4430_v16, %v391_v50  ;;  %v2524_v34 = vstv %s5448_s16  ;;  %v7024_v59 = vld [vmem:[#allocation24_spill] sm:$0xff]  ;;  %v7025_v37 = vld [vmem:[#allocation26_spill] sm:$0xff]  ;;  %s6335_s16 = sld [smem:[#allocation5 + $0x5f]] }
 0x229   :  { %v390_v41 = vadd.f32 %v379_v14, %v357_v33  ;;  %v418_v12 = vadd.f32 %v4439_v27, %v392_v0  ;;  %v2487_v31 = vmul.f32 %v2484_v39, %v5097_v29  ;;  %v2488_v35 = vmul.f32 %v2484_v39, %v5099_v43  ;;  %v7022_v33 = vld [vmem:[#allocation23_spill] sm:$0xff]  ;;  %v7028_v0 = vld [vmem:[#allocation28_spill] sm:$0xff] }
 0x22a   :  { %v5461_v63 = vpop.permute.xlu1 %1709  ;;  %v5463_v56 = vpop.permute.xlu0 %1711  ;;  %v415_v17 = vadd.f32 %v4419_v5, %v389_v51  ;;  %v2460_v5 = vmul.f32 %v2458_v24, %v5064_v44  ;;  %v2489_v16 = vmul.f32 %v2484_v39, %v5106_v58  ;;  %v2497_v60 = vrot.slane %v2485_v36, 1 }
 0x22b   :  { %v416_v57 = vadd.f32 %v4428_v13, %v390_v41  ;;  %v2461_v13 = vmul.f32 %v2458_v24, %v5099_v43  ;;  %v457_v49 = vadd.f32 %v4496_v25, %v417_v22  ;;  %v458_v10 = vadd.f32 %v4505_v38, %v418_v12  ;;  %v7027_v41 = vld [vmem:[#allocation27_spill] sm:$0xff] }
 0x22c   :  { %2447 = vrot.lane.b32.xlu1 %v2440_v26, %s4095_s25  ;;  %2467 = vrot.lane.b32.xlu0 %v2459_v32, %s4096_s28  ;;  %v455_v7 = vadd.f32 %v4485_v3, %v415_v17  ;;  %v2498_v3 = vrot.slane %v2486_v2, 1  ;;  %v2462_v28 = vmul.f32 %v2458_v24, %v5106_v58  ;;  %v2490_v61 = vmul.f32 %v2484_v39, %v5121_v15  ;;  %v7029_v17 = vld [vmem:[#allocation30_spill] sm:$0xff]  ;;  %s5525_s25 = sld [smem:[#allocation5 + $0x4f]] }
 0x22d   :  { %v456_v27 = vadd.f32 %v4494_v23, %v416_v57  ;;  %v2500_v25 = vrot.slane %v2487_v31, 1  ;;  %v2502_v19 = vrot.slane %v2488_v35, 1  ;;  %v2503_v38 = vrot.slane %v2489_v16, 1 }
 0x22e   :  { %v5479_v6 = vpop.permute.xlu1 %1713  ;;  %v5481_v45 = vpop.permute.xlu0 %1733  ;;  %v495_v8 = vadd.f32 %v7021_v4, %v455_v7  ;;  %v2525_v18 = vmul.f32 %v2524_v34, %v5059_v62  ;;  %v497_v51 = vadd.f32 %v7024_v59, %v457_v49  ;;  %v2499_v1 = vsel %vm209_vm4, %v2497_v60, %v2498_v3 }
 0x22f   :  { %v496_v53 = vadd.f32 %v7022_v33, %v456_v27  ;;  %v2526_v24 = vmul.f32 %v2524_v34, %v5064_v44  ;;  %v498_v39 = vadd.f32 %v7026_v46, %v458_v10  ;;  %v2564_v36 = vstv %s5477_s17  ;;  %v7031_v27 = vld [vmem:[#allocation31_spill] sm:$0xff]  ;;  %v7033_v10 = vld [vmem:[#allocation32_spill] sm:$0xff]  ;;  %v7037_v46 = vld [vmem:[#allocation33_spill] sm:$0xff]  ;;  %s6431_s17 = sld [smem:[#allocation5 + $0x36]] }
 0x230   :  { %2469 = vrot.lane.b32.xlu1 %v2460_v5, %s4096_s28  ;;  %2471 = vrot.lane.b32.xlu0 %v2461_v13, %s4096_s28  ;;  %v535_v14 = vadd.f32 %v7025_v37, %v495_v8  ;;  %v537_v32 = vadd.f32 %v7028_v0, %v497_v51  ;;  %v2501_v22 = vsel %vm209_vm4, %v2498_v3, %v2500_v25  ;;  %v2505_v7 = vrot.slane %v2490_v61, 1  ;;  %v7032_v3 = vld [vmem:[#allocation29_spill] sm:$0xff]  ;;  %v7034_v8 = vld [vmem:[#allocation34_spill] sm:$0xff]  ;;  %v7040_v0 = vld [vmem:[#allocation39_spill] sm:$0xff] }
 0x231   :  { %v536_v50 = vadd.f32 %v7027_v41, %v496_v53  ;;  %v2504_v12 = vsel %vm209_vm4, %v2502_v19, %v2503_v38  ;;  %v2537_v5 = vrot.slane %v2525_v18, 2  ;;  %v2538_v13 = vrot.slane %v2526_v24, 2 }
 0x232   :  { %v5497_v23 = vpop.permute.xlu1 %1735  ;;  %v5499_v55 = vpop.permute.xlu0 %1737  ;;  %v575_v26 = vadd.f32 %v7029_v17, %v535_v14  ;;  %v2527_v31 = vmul.f32 %v2524_v34, %v5097_v29  ;;  %v2528_v35 = vmul.f32 %v2524_v34, %v5099_v43  ;;  %v2529_v16 = vmul.f32 %v2524_v34, %v5106_v58 }
 0x233   :  { %7023 = vst [vmem:[#allocation22_spill] sm:$0xff] %v5497_v23  ;;  %v576_v60 = vadd.f32 %v7031_v27, %v536_v50  ;;  %v538_v49 = vadd.f32 %v7032_v3, %v498_v39  ;;  %v577_v4 = vadd.f32 %v7033_v10, %v537_v32  ;;  %v2530_v53 = vmul.f32 %v2524_v34, %v5121_v15  ;;  %v7038_v34 = vld [vmem:[#allocation36_spill] sm:$0xff]  ;;  %v7039_v50 = vld [vmem:[#allocation38_spill] sm:$0xff] }
 0x234   :  { %2473 = vrot.lane.b32.xlu1 %v2462_v28, %s4096_s28  ;;  %2507 = vrot.lane.b32.xlu0 %v2499_v1, %s4096_s28  ;;  %v615_v33 = vadd.f32 %v7034_v8, %v575_v26  ;;  %v7035_v28 = vld [vmem:[#allocation35_spill] sm:$0xff]  ;;  %v2506_v18 = vsel %vm209_vm4, %v2503_v38, %v2505_v7  ;;  %v2565_v59 = vmul.f32 %v2564_v36, %v5059_v62  ;;  %v2540_v14 = vrot.slane %v2527_v31, 2  ;;  %v7044_v10 = vld [vmem:[#allocation14_spill] sm:$0xff] }
 0x235   :  { %v616_v61 = vadd.f32 %v7035_v28, %v576_v60  ;;  %v2566_v51 = vmul.f32 %v2564_v36, %v5064_v44  ;;  %v2539_v37 = vsel %vm242_vm5, %v2537_v5, %v2538_v13  ;;  %v2542_v1 = vrot.slane %v2528_v35, 2  ;;  %v7043_v35 = vld [vmem:[#allocation37_spill] sm:$0xff]  ;;  %v7045_v8 = vld [vmem:[#allocation15_spill] sm:$0xff] }
 0x236   :  { %v5513_v2 = vpop.permute.xlu1 %1739  ;;  %v5515_v57 = vpop.permute.xlu0 %1773  ;;  %v2543_v24 = vrot.slane %v2529_v16, 2  ;;  %v578_v39 = vadd.f32 %v7037_v46, %v538_v49  ;;  %v617_v41 = vadd.f32 %v7038_v34, %v577_v4  ;;  %v655_v38 = vadd.f32 %v7039_v50, %v615_v33 }
 0x237   :  { %7030 = vst [vmem:[#allocation23_spill] sm:$0xff] %v5515_v57  ;;  %v656_v32 = vadd.f32 %v7040_v0, %v616_v61  ;;  %v2545_v17 = vrot.slane %v2530_v53, 2  ;;  %v2578_v7 = vrot.slane %v2566_v51, 3  ;;  %v2567_v5 = vmul.f32 %v2564_v36, %v5097_v29  ;;  %v7046_v53 = vld [vmem:[#allocation40_spill] sm:$0xff]  ;;  %v7047_v61 = vld [vmem:[#allocation41_spill] sm:$0xff] }
 0x238   :  { %2509 = vrot.lane.b32.xlu1 %v2501_v22, %s4096_s28  ;;  %2511 = vrot.lane.b32.xlu0 %v2504_v12, %s4096_s28  ;;  %v2577_v12 = vrot.slane %v2565_v59, 3  ;;  %v2568_v31 = vmul.f32 %v2564_v36, %v5099_v43  ;;  %v618_v16 = vadd.f32 %v7043_v35, %v578_v39  ;;  %v2541_v27 = vsel %vm242_vm5, %v2538_v13, %v2540_v14  ;;  %v7051_v0 = vld [vmem:[#allocation17_spill] sm:$0xff] }
 0x239   :  { %v2544_v60 = vsel %vm242_vm5, %v2542_v1, %v2543_v24  ;;  %v2569_v3 = vmul.f32 %v2564_v36, %v5106_v58  ;;  %v2604_v49 = vstv %s5525_s25  ;;  %v681_v4 = vadd.f32 %v7044_v10, %v655_v38  ;;  %s6440_s25 = sld [smem:[#allocation5 + $0x3d]] }
 0x23a   :  { %v5532_v25 = vpop.permute.xlu1 %1775  ;;  %v5534_v19 = vpop.permute.xlu0 %1777  ;;  %v682_v33 = vadd.f32 %v7045_v8, %v656_v32  ;;  %v657_v28 = vadd.f32 %v7046_v53, %v617_v41  ;;  %v2546_v51 = vsel %vm242_vm5, %v2543_v24, %v2545_v17  ;;  %v2580_v14 = vrot.slane %v2567_v5, 3  ;;  %v7050_v41 = vld [vmem:[#allocation16_spill] sm:$0xff]  ;;  %v7052_v24 = vld [vmem:[#allocation42_spill] sm:$0xff] }
 0x23b   :  { %7036 = vst [vmem:[#allocation24_spill] sm:$0xff] %v5532_v25  ;;  %v2582_v1 = vrot.slane %v2568_v31, 3  ;;  %v2583_v46 = vrot.slane %v2569_v3, 3  ;;  %v2570_v39 = vmul.f32 %v2564_v36, %v5121_v15  ;;  %v2605_v34 = vmul.f32 %v2604_v49, %v5059_v62  ;;  %v7056_v53 = vld [vmem:[#allocation44_spill] sm:$0xff] }
 0x23c   :  { %2513 = vrot.lane.b32.xlu1 %v2506_v18, %s4096_s28  ;;  %2547 = vrot.lane.b32.xlu0 %v2539_v37, %s4096_s28  ;;  %v658_v18 = vadd.f32 %v7047_v61, %v618_v16  ;;  %v2579_v37 = vsel %vm275_vm6, %v2577_v12, %v2578_v7  ;;  %v2606_v50 = vmul.f32 %v2604_v49, %v5064_v44  ;;  %v7053_v12 = vld [vmem:[#allocation43_spill] sm:$0xff]  ;;  %v7057_v61 = vld [vmem:[#allocation45_spill] sm:$0xff] }
 0x23d   :  { %v683_v38 = vadd.f32 %v7050_v41, %v657_v28  ;;  %v721_v17 = vadd.f32 %v7052_v24, %v681_v4  ;;  %v722_v5 = vadd.f32 %v7053_v12, %v682_v33  ;;  %v2581_v35 = vsel %vm275_vm6, %v2578_v7, %v2580_v14  ;;  %v7062_v12 = vld [vmem:[#allocation48_spill] sm:$0xff] }
 0x23e   :  { %v5546_v26 = vpop.permute.xlu1 %1779  ;;  %v5548_v22 = vpop.permute.xlu0 %1813  ;;  %v684_v32 = vadd.f32 %v7051_v0, %v658_v18  ;;  %v2607_v16 = vmul.f32 %v2604_v49, %v5097_v29  ;;  %v2584_v3 = vsel %vm275_vm6, %v2582_v1, %v2583_v46  ;;  %v2585_v10 = vrot.slane %v2570_v39, 3  ;;  %v7058_v18 = vld [vmem:[#allocation46_spill] sm:$0xff] }
 0x23f   :  { %7041 = vst [vmem:[#allocation26_spill] sm:$0xff] %v5546_v26  ;;  %7042 = vst [vmem:[#allocation25_spill] sm:$0xff] %v5548_v22  ;;  %v2617_v4 = vrot.slane %v2605_v34, 4  ;;  %v2618_v8 = vrot.slane %v2606_v50, 4  ;;  %v2644_v33 = vstv %s5559_s18  ;;  %v723_v28 = vadd.f32 %v7056_v53, %v683_v38  ;;  %v7114_v22 = vld [vmem:[#allocation75_spill] sm:$0xff]  ;;  %s6508_s18 = sld [smem:[#allocation5 + $0x44]] }
 0x240   :  { %2549 = vrot.lane.b32.xlu1 %v2541_v27, %s4096_s28  ;;  %2551 = vrot.lane.b32.xlu0 %v2544_v60, %s4096_s28  ;;  %v2608_v27 = vmul.f32 %v2604_v49, %v5099_v43  ;;  %v2609_v60 = vmul.f32 %v2604_v49, %v5106_v58  ;;  %v724_v7 = vadd.f32 %v7057_v61, %v684_v32  ;;  %v2620_v39 = vrot.slane %v2607_v16, 4 }
 0x241   :  { %v2610_v0 = vmul.f32 %v2604_v49, %v5121_v15  ;;  %v2586_v24 = vsel %vm275_vm6, %v2583_v46, %v2585_v10  ;;  %v2619_v38 = vsel %vm308_vm7, %v2617_v4, %v2618_v8  ;;  %v2645_v32 = vmul.f32 %v2644_v33, %v5059_v62 }
 0x242   :  { %v5565_v13 = vpop.permute.xlu1 %1815  ;;  %v5567_v59 = vpop.permute.xlu0 %1817  ;;  %v2622_v34 = vrot.slane %v2608_v27, 4  ;;  %v2623_v50 = vrot.slane %v2609_v60, 4  ;;  %v7064_v27 = vld [vmem:[#allocation50_spill] sm:$0xff]  ;;  %v5614_v53 = vstv %s5580_s19  ;;  %v2621_v4 = vsel %vm308_vm7, %v2618_v8, %v2620_v39  ;;  %s6529_s19 = sld [smem:[#allocation5 + $0x4b]] }
 0x243   :  { %7048 = vst [vmem:[#allocation27_spill] sm:$0xff] %v5565_v13  ;;  %7049 = vst [vmem:[#allocation28_spill] sm:$0xff] %v5567_v59  ;;  %v2625_v61 = vrot.slane %v2610_v0, 4  ;;  %v7070_v8 = vld [vmem:[#allocation54_spill] sm:$0xff]  ;;  %v5818_v13 = vld [vmem:[#allocation3 + $0x28] sm:$0x3f] }
 0x244   :  { %2553 = vrot.lane.b32.xlu1 %v2546_v51, %s4096_s28  ;;  %2587 = vrot.lane.b32.xlu0 %v2579_v37, %s4096_s28  ;;  %v761_v51 = vadd.f32 %v7058_v18, %v721_v17  ;;  %v7059_v37 = vld [vmem:[#allocation47_spill] sm:$0xff]  ;;  %v2646_v17 = vmul.f32 %v2644_v33, %v5064_v44  ;;  %v2647_v18 = vmul.f32 %v2644_v33, %v5097_v29 }
 0x245   :  { %v762_v14 = vadd.f32 %v7059_v37, %v722_v5  ;;  %v763_v5 = vadd.f32 %v7062_v12, %v723_v28  ;;  %v2624_v28 = vsel %vm308_vm7, %v2622_v34, %v2623_v50  ;;  %v2657_v37 = vrot.slane %v2645_v32, 5  ;;  %v7069_v12 = vld [vmem:[#allocation53_spill] sm:$0xff]  ;;  %v7071_v34 = vld [vmem:[#allocation55_spill] sm:$0xff] }
 0x246   :  { %v5582_v36 = vpop.permute.xlu1 %1819  ;;  %v5584_v31 = vpop.permute.xlu0 %1853  ;;  %v801_v60 = vadd.f32 %v7064_v27, %v761_v51  ;;  %v2649_v51 = vmul.f32 %v2644_v33, %v5106_v58 }
 0x247   :  { %7054 = vst [vmem:[#allocation30_spill] sm:$0xff] %v5582_v36  ;;  %7055 = vst [vmem:[#allocation31_spill] sm:$0xff] %v5584_v31 }
 0x248   :  { %2589 = vrot.lane.b32.xlu1 %v2581_v35, %s4096_s28  ;;  %2591 = vrot.lane.b32.xlu0 %v2584_v3, %s4096_s28  ;;  %v7063_v35 = vld [vmem:[#allocation49_spill] sm:$0xff]  ;;  %v7065_v3 = vld [vmem:[#allocation51_spill] sm:$0xff]  ;;  %v841_v39 = vadd.f32 %v7070_v8, %v801_v60  ;;  %v7076_v8 = vld [vmem:[#allocation58_spill] sm:$0xff] }
 0x249   :  { %v764_v16 = vadd.f32 %v7063_v35, %v724_v7  ;;  %v802_v49 = vadd.f32 %v7065_v3, %v762_v14  ;;  %v2648_v7 = vmul.f32 %v2644_v33, %v5099_v43  ;;  %v7068_v14 = vld [vmem:[#allocation52_spill] sm:$0xff]  ;;  %v2650_v3 = vmul.f32 %v2644_v33, %v5121_v15 }
 0x24a   :  { %v5598_v41 = vpop.permute.xlu1 %1855  ;;  %v5600_v1 = vpop.permute.xlu0 %1857 }
 0x24b   :  { %7060 = vst [vmem:[#allocation29_spill] sm:$0xff] %v5598_v41  ;;  %7061 = vst [vmem:[#allocation32_spill] sm:$0xff] %v5600_v1  ;;  %v804_v35 = vadd.f32 %v7069_v12, %v764_v16  ;;  %v842_v0 = vadd.f32 %v7071_v34, %v802_v49  ;;  %v2662_v60 = vrot.slane %v2648_v7, 5  ;;  %v7074_v49 = vld [vmem:[#allocation56_spill] sm:$0xff]  ;;  %v7075_v12 = vld [vmem:[#allocation57_spill] sm:$0xff]  ;;  %v881_v34 = vadd.f32 %v7076_v8, %v841_v39 }
 0x24c   :  { %2593 = vrot.lane.b32.xlu1 %v2586_v24, %s4096_s28  ;;  %2627 = vrot.lane.b32.xlu0 %v2619_v38, %s4096_s28  ;;  %v2658_v24 = vrot.slane %v2646_v17, 5  ;;  %v803_v38 = vadd.f32 %v7068_v14, %v763_v5  ;;  %v2660_v17 = vrot.slane %v2647_v18, 5  ;;  %v2626_v5 = vsel %vm308_vm7, %v2623_v50, %v2625_v61 }
 0x24d   :  { %v2663_v14 = vrot.slane %v2649_v51, 5  ;;  %v844_v33 = vadd.f32 %v7075_v12, %v804_v35  ;;  %v2687_v35 = vmul.f32 %v5614_v53, %v5097_v29  ;;  %v2688_v39 = vmul.f32 %v5614_v53, %v5099_v43  ;;  %v7083_v29 = vld [vmem:[#allocation63_spill] sm:$0xff]  ;;  %v7084_v43 = vld [vmem:[#allocation64_spill] sm:$0xff] }
 0x24e   :  { %v5616_v46 = vpop.permute.xlu1 %1859  ;;  %v5618_v10 = vpop.permute.xlu0 %1893  ;;  %v2659_v16 = vsel %vm341_vm8, %v2657_v37, %v2658_v24  ;;  %v843_v18 = vadd.f32 %v7074_v49, %v803_v38  ;;  %v2661_v61 = vsel %vm341_vm8, %v2658_v24, %v2660_v17  ;;  %v2665_v37 = vrot.slane %v2650_v3, 5  ;;  %v7081_v17 = vld [vmem:[#allocation61_spill] sm:$0xff] }
 0x24f   :  { %7066 = vst [vmem:[#allocation34_spill] sm:$0xff] %v5616_v46  ;;  %7067 = vst [vmem:[#allocation35_spill] sm:$0xff] %v5618_v10  ;;  %v2664_v38 = vsel %vm341_vm8, %v2662_v60, %v2663_v14  ;;  %v884_v3 = vadd.f32 %v7081_v17, %v844_v33  ;;  %v7085_v60 = vld [vmem:[#allocation65_spill] sm:$0xff]  ;;  %v5700_v17 = vstv %s5648_s21  ;;  %v2790_v10 = vstv %s5715_s4  ;;  %s6641_s21 = sld [smem:[#allocation5 + $0x59]] }
 0x250   :  { %2629 = vrot.lane.b32.xlu1 %v2621_v4, %s4096_s28  ;;  %2631 = vrot.lane.b32.xlu0 %v2624_v28, %s4096_s28  ;;  %v2685_v4 = vmul.f32 %v5614_v53, %v5059_v62  ;;  %v2686_v28 = vmul.f32 %v5614_v53, %v5064_v44  ;;  %v7077_v62 = vld [vmem:[#allocation59_spill] sm:$0xff]  ;;  %v2666_v33 = vsel %vm341_vm8, %v2663_v14, %v2665_v37  ;;  %s3957_s4 = sld [smem:[#allocation5 + $0x61]] }
 0x251   :  { %v924_v49 = vadd.f32 %v7085_v60, %v884_v3  ;;  %v7089_v14 = vld [vmem:[#allocation19_spill] sm:$0xff] }
 0x252   :  { %v5631_v27 = vpop.permute.xlu1 %1895  ;;  %v5633_v32 = vpop.permute.xlu0 %1897  ;;  %v2697_v7 = vrot.slane %v2685_v4, 6  ;;  %v2698_v51 = vrot.slane %v2686_v28, 6  ;;  %v7082_v4 = vld [vmem:[#allocation62_spill] sm:$0xff] }
 0x253   :  { %7072 = vst [vmem:[#allocation33_spill] sm:$0xff] %v5631_v27  ;;  %7073 = vst [vmem:[#allocation36_spill] sm:$0xff] %v5633_v32  ;;  %v882_v27 = vadd.f32 %v7077_v62, %v842_v0  ;;  %v2689_v0 = vmul.f32 %v5614_v53, %v5106_v58  ;;  %v921_v28 = vadd.f32 %v7082_v4, %v881_v34  ;;  %v2700_v34 = vrot.slane %v2687_v35, 6 }
 0x254   :  { %2633 = vrot.lane.b32.xlu1 %v2626_v5, %s4096_s28  ;;  %2667 = vrot.lane.b32.xlu0 %v2659_v16, %s4096_s28  ;;  %v7080_v5 = vld [vmem:[#allocation60_spill] sm:$0xff]  ;;  %v2699_v8 = vsel %vm374_vm9, %v2697_v7, %v2698_v51  ;;  %v2702_v62 = vrot.slane %v2688_v39, 6  ;;  %v7091_v39 = vld [vmem:[#allocation21_spill] sm:$0xff] }
 0x255   :  { %v883_v24 = vadd.f32 %v7080_v5, %v843_v18  ;;  %v922_v16 = vadd.f32 %v7083_v29, %v882_v27  ;;  %v2690_v27 = vmul.f32 %v5614_v53, %v5121_v15  ;;  %v7090_v7 = vld [vmem:[#allocation20_spill] sm:$0xff]  ;;  %v7092_v15 = vld [vmem:[#allocation66_spill] sm:$0xff]  ;;  %v2701_v4 = vsel %vm374_vm9, %v2698_v51, %v2700_v34 }
 0x256   :  { %v5650_v44 = vpop.permute.xlu1 %1899  ;;  %v5652_v50 = vpop.permute.xlu0 %1933  ;;  %v7098_v51 = vld [vmem:[#allocation70_spill] sm:$0xff] }
 0x257   :  { %7078 = vst [vmem:[#allocation38_spill] sm:$0xff] %v5650_v44  ;;  %7079 = vst [vmem:[#allocation39_spill] sm:$0xff] %v5652_v50  ;;  %v923_v58 = vadd.f32 %v7084_v43, %v883_v24  ;;  %v948_v37 = vadd.f32 %v7089_v14, %v922_v16  ;;  %v2705_v29 = vrot.slane %v2690_v27, 6  ;;  %v2724_v16 = vstv %s5664_s2  ;;  %v7095_v43 = vld [vmem:[#allocation67_spill] sm:$0xff]  ;;  %v5790_v50 = vld [vmem:[#allocation3 + $0x20] sm:$0xff]  ;;  %s3951_s2 = sld [smem:[#allocation5 + $0x37]] }
 0x258   :  { %2669 = vrot.lane.b32.xlu1 %v2661_v61, %s4096_s28  ;;  %2671 = vrot.lane.b32.xlu0 %v2664_v38, %s4096_s28  ;;  %v2703_v61 = vrot.slane %v2689_v0, 6  ;;  %v7088_v38 = vld [vmem:[#allocation18_spill] sm:$0xff]  ;;  %v950_v0 = vadd.f32 %v7091_v39, %v924_v49  ;;  %v5710_v49 = vstv %s5655_s22  ;;  %v7100_v27 = vld [vmem:[#allocation71_spill] sm:$0xff]  ;;  %v2728_v44 = vmul.f32 %v5790_v50, %v2724_v16  ;;  %s6681_s22 = sld [smem:[#allocation5 + $0x60]] }
 0x259   :  { %v947_v5 = vadd.f32 %v7088_v38, %v921_v28  ;;  %v949_v35 = vadd.f32 %v7090_v7, %v923_v58  ;;  %v988_v60 = vadd.f32 %v7095_v43, %v948_v37  ;;  %v7096_v58 = vld [vmem:[#allocation68_spill] sm:$0xff]  ;;  %v7097_v38 = vld [vmem:[#allocation69_spill] sm:$0xff] }
 0x25a   :  { %v5678_v12 = vpop.permute.xlu1 %1935  ;;  %v5680_v18 = vpop.permute.xlu0 %1937  ;;  %v2704_v28 = vsel %vm374_vm9, %v2702_v62, %v2703_v61  ;;  %v5720_v62 = vstv %s5674_s26  ;;  %v7101_v37 = vld [vmem:[#allocation72_spill] sm:$0xff]  ;;  %s3953_s26 = sld [smem:[#allocation5 + $0x45]] }
 0x25b   :  { %7086 = vst [vmem:[#allocation37_spill] sm:$0xff] %v5678_v12  ;;  %7087 = vst [vmem:[#allocation14_spill] sm:$0xff] %v5680_v18  ;;  %v987_v53 = vadd.f32 %v7092_v15, %v947_v5  ;;  %v990_v5 = vadd.f32 %v7097_v38, %v950_v0  ;;  %v1028_v14 = vadd.f32 %v7100_v27, %v988_v60  ;;  %v5741_v60 = vld [vmem:[#allocation3 + $0x8] sm:$0xff] }
 0x25c   :  { %2673 = vrot.lane.b32.xlu1 %v2666_v33, %s4096_s28  ;;  %2707 = vrot.lane.b32.xlu0 %v2699_v8, %s4096_s28  ;;  %v989_v33 = vadd.f32 %v7096_v58, %v949_v35  ;;  %v2750_v8 = vstv %s5671_s24  ;;  %7099 = vst [vmem:[#allocation41_spill] sm:$0xff] %v5720_v62  ;;  %v5724_v35 = vld [vmem:[#allocation3] sm:$0xff]  ;;  %v2792_v1 = vmul.f32 %v5741_v60, %v2790_v10  ;;  %s3952_s24 = sld [smem:[#allocation5 + $0x3e]] }
 0x25d   :  { %v1027_v34 = vadd.f32 %v7098_v51, %v987_v53  ;;  %v5728_v39 = vmul.f32 %v5724_v35, %v5700_v17  ;;  %v2725_v0 = vmul.f32 %v5724_v35, %v2724_v16  ;;  %v5737_v53 = vmul.f32 %v5724_v35, %v5710_v49 }
 0x25e   :  { %v5697_v24 = vpop.permute.xlu1 %1939  ;;  %v5702_v3 = vpop.permute.xlu0 %1973  ;;  %v1029_v7 = vadd.f32 %v7101_v37, %v989_v33  ;;  %v2751_v43 = vmul.f32 %v5724_v35, %v2750_v8  ;;  %v5744_v58 = vmul.f32 %v5741_v60, %v2750_v8  ;;  %v7105_v33 = vld [vmem:[#allocation73_spill] sm:$0xff]  ;;  %v5751_v51 = vmul.f32 %v5741_v60, %v5710_v49 }
 0x25f   :  { %7093 = vst [vmem:[#allocation15_spill] sm:$0xff] %v5697_v24  ;;  %7094 = vst [vmem:[#allocation40_spill] sm:$0xff] %v5702_v3  ;;  %v5747_v38 = vadd.f32 %v7105_v33, %v990_v5  ;;  %v5755_v27 = vmul.f32 %v5724_v35, %v5720_v62  ;;  %v5766_v5 = vmul.f32 %v5741_v60, %v5720_v62  ;;  %v5769_v37 = vstv %s5689_s27  ;;  %s3955_s27 = sld [smem:[#allocation5 + $0x53]] }
 0x260   :  { %2709 = vrot.lane.b32.xlu1 %v2701_v4, %s4096_s28  ;;  %2711 = vrot.lane.b32.xlu0 %v2704_v28, %s4096_s28  ;;  %7102 = vst [vmem:[#allocation16_spill] sm:$0xff] %v5728_v39  ;;  %v2706_v28 = vsel %vm374_vm9, %v2703_v61, %v2705_v29  ;;  %v7106_v61 = vld [vmem:[#allocation74_spill] sm:$0xff]  ;;  %7107 = vst [vmem:[#allocation43_spill] sm:$0xff] %v5769_v37  ;;  %v5772_v33 = vstv %s5692_s29  ;;  %v2013_v24 = vrot.slane %v5737_v53, 1  ;;  %v7119_v23 = vrot.slane %v5751_v51, 1  ;;  %s6794_s29 = sld [smem:[#allocation5 + $0x5a]] }
 0x261   :  { %v5762_v29 = vadd.f32 %v7106_v61, %v1027_v34  ;;  %7108 = vst [vmem:[#allocation44_spill] sm:$0xff] %v5772_v33  ;;  %v5784_v61 = vld [vmem:[#allocation3 + $0x10] sm:$0x3f]  ;;  %v2045_v41 = vrot.slane %v5755_v27, 2  ;;  %v2065_v18 = vmul.f32 %v5724_v35, %v5769_v37  ;;  %v5811_v27 = vmul.f32 %v5741_v60, %v5772_v33 }
 0x262   :  { %v5730_v15 = vpop.permute.xlu1 %1975  ;;  %v5732_v4 = vpop.permute.xlu0 %1977  ;;  %v2753_v12 = vmul.f32 %v5784_v61, %v2750_v8  ;;  %v2756_v32 = vmul.f32 %v5818_v13, %v2750_v8  ;;  %v2791_v25 = vmul.f32 %v5724_v35, %v2790_v10  ;;  %v5854_v59 = vsel %vm209_vm4, %v2013_v24, %v7119_v23 }
 0x263   :  { %7103 = vst [vmem:[#allocation17_spill] sm:$0xff] %v5730_v15  ;;  %7104 = vst [vmem:[#allocation42_spill] sm:$0xff] %v5732_v4  ;;  %v2763_v4 = vrot.slane %v2751_v43, 1  ;;  %v5805_v43 = vmul.f32 %v5741_v60, %v5769_v37  ;;  %v7125_v23 = vrot.slane %v5811_v27, 4 }
 0x264   :  { %2713 = vrot.lane.b32.xlu1 %v2706_v28, %s4096_s28  ;;  %2733 = vrot.lane.b32.xlu0 %v2725_v0, %s4097_s30  ;;  %v2726_v28 = vmul.f32 %v5741_v60, %v2724_v16  ;;  %v5781_v0 = vld [vmem:[#allocation3 + $0x18] sm:$0xff]  ;;  %s5800_s28 = sld [smem:[#allocation5 + $0x49]]  ;;  %7111 = vst [vmem:[#allocation47_spill] sm:$0xff] %v5811_v27  ;;  %v2766_v46 = vrot.slane %v2753_v12, 1  ;;  %v2077_v12 = vrot.slane %v2065_v18, 3  ;;  %v2771_v18 = vrot.slane %v2756_v32, 1 }
 0x265   :  { %v2727_v34 = vmul.f32 %v5781_v0, %v2724_v16  ;;  %v2754_v3 = vmul.f32 %v5781_v0, %v2750_v8  ;;  %v2804_v16 = vrot.slane %v2792_v1, 2  ;;  %7120 = vst [vmem:[#allocation53_spill] sm:$0xff] %v5854_v59  ;;  %v5943_v59 = vmul.f32 %v5784_v61, %v5772_v33 }
 0x266   :  { %v5776_v15 = vpop.permute.xlu1 %1979  ;;  %v5778_v39 = vpop.permute.xlu0 %2201 }
 0x267   :  { %7109 = vst [vmem:[#allocation45_spill] sm:$0xff] %v5776_v15  ;;  %7110 = vst [vmem:[#allocation46_spill] sm:$0xff] %v5778_v39  ;;  %v2764_v15 = vrot.slane %v5744_v58, 1  ;;  %v2755_v39 = vmul.f32 %v5790_v50, %v2750_v8  ;;  %v2097_v58 = vmul.f32 %v5724_v35, %v5772_v33  ;;  %v2768_v53 = vrot.slane %v2754_v3, 1 }
 0x268   :  { %2735 = vrot.lane.b32.xlu1 %v2726_v28, %s4097_s30  ;;  %2737 = vrot.lane.b32.xlu0 %v2727_v34, %s4097_s30  ;;  %v5831_v3 = vstv %s5757_s5  ;;  %7139 = vst [vmem:[#allocation65_spill] sm:$0xff] %v5943_v59  ;;  %v6060_v59 = vmul.f32 %v5781_v0, %v5769_v37 }
 0x269   :  { %v2765_v31 = vsel %vm209_vm4, %v2763_v4, %v2764_v15  ;;  %v2769_v36 = vrot.slane %v2755_v39, 1  ;;  %7116 = vst [vmem:[#allocation50_spill] sm:$0xff] %v5831_v3  ;;  %v2109_v8 = vrot.slane %v2097_v58, 4  ;;  %v5838_v4 = vstv %s5774_s6 }
 0x26a   :  { %v5813_v28 = vpop.permute.xlu1 %2203  ;;  %v5815_v34 = vpop.permute.xlu0 %2205  ;;  %v2767_v58 = vsel %vm209_vm4, %v2764_v15, %v2766_v46  ;;  %v2803_v39 = vrot.slane %v2791_v25, 2  ;;  %v2830_v46 = vstv %s5800_s28  ;;  %v7123_v25 = vrot.slane %v5805_v43, 3 }
 0x26b   :  { %7112 = vst [vmem:[#allocation48_spill] sm:$0xff] %v5813_v28  ;;  %7113 = vst [vmem:[#allocation49_spill] sm:$0xff] %v5815_v34  ;;  %v5825_v28 = vadd.f32 %v7114_v22, %v1028_v14  ;;  %v7115_v34 = vld [vmem:[#allocation76_spill] sm:$0xff]  ;;  %v5874_v24 = vsel %vm308_vm7, %v2109_v8, %v7125_v23  ;;  %v5882_v15 = vmul.f32 %v5724_v35, %v5838_v4 }
 0x26c   :  { %v5828_v26 = vadd.f32 %v7115_v34, %v1029_v7  ;;  %2739 = vrot.lane.b32.xlu1 %v2728_v44, %s4097_s30  ;;  %2773 = vrot.lane.b32.xlu0 %v2765_v31, %s4097_s30  ;;  %v2793_v7 = vmul.f32 %v5784_v61, %v2790_v10  ;;  %v2794_v44 = vmul.f32 %v5781_v0, %v2790_v10 }
 0x26d   :  { %v2795_v31 = vmul.f32 %v5790_v50, %v2790_v10  ;;  %v2770_v34 = vsel %vm209_vm4, %v2768_v53, %v2769_v36  ;;  %v5869_v1 = vsel %vm275_vm6, %v2077_v12, %v7123_v25  ;;  %7126 = vst [vmem:[#allocation56_spill] sm:$0xff] %v5874_v24  ;;  %7128 = vst [vmem:[#allocation58_spill] sm:$0xff] %v5882_v15 }
 0x26e   :  { %v5842_v22 = vpop.permute.xlu1 %2207  ;;  %v5844_v14 = vpop.permute.xlu0 %2241  ;;  %7124 = vst [vmem:[#allocation55_spill] sm:$0xff] %v5869_v1  ;;  %v2808_v12 = vrot.slane %v2794_v44, 2  ;;  %v2796_v25 = vmul.f32 %v5818_v13, %v2790_v10  ;;  %v2772_v8 = vsel %vm209_vm4, %v2769_v36, %v2771_v18  ;;  %v2805_v23 = vsel %vm242_vm5, %v2803_v39, %v2804_v16  ;;  %v7131_v1 = vld [vmem:[#allocation77_spill] sm:$0xff] }
 0x26f   :  { %7117 = vst [vmem:[#allocation51_spill] sm:$0xff] %v5842_v22  ;;  %7118 = vst [vmem:[#allocation52_spill] sm:$0xff] %v5844_v14  ;;  %v7121_v14 = vrot.slane %v5766_v5, 2  ;;  %v2129_v22 = vmul.f32 %v5724_v35, %v5831_v3  ;;  %v2831_v27 = vmul.f32 %v5724_v35, %v2830_v46  ;;  %v2832_v24 = vmul.f32 %v5741_v60, %v2830_v46 }
 0x270   :  { %2775 = vrot.lane.b32.xlu1 %v2767_v58, %s4097_s30  ;;  %2777 = vrot.lane.b32.xlu0 %v2770_v34, %s4097_s30  ;;  %v2806_v58 = vrot.slane %v2793_v7, 2  ;;  %v2809_v34 = vrot.slane %v2795_v31, 2  ;;  %v5903_v44 = vmul.f32 %v5741_v60, %v5838_v4  ;;  %v2003_v39 = vmul.f32 %v5784_v61, %v5710_v49 }
 0x271   :  { %v5859_v32 = vsel %vm242_vm5, %v2045_v41, %v7121_v14  ;;  %v5878_v41 = vmul.f32 %v5741_v60, %v5831_v3  ;;  %v2141_v36 = vrot.slane %v2129_v22, 5  ;;  %v2844_v22 = vrot.slane %v2832_v24, 3 }
 0x272   :  { %7122 = vst [vmem:[#allocation54_spill] sm:$0xff] %v5859_v32  ;;  %v5884_v53 = vpop.permute.xlu1 %2243  ;;  %v5886_v14 = vpop.permute.xlu0 %2245  ;;  %v5895_v32 = vadd.f32 %v7131_v1, %v5747_v38  ;;  %7133 = vst [vmem:[#allocation61_spill] sm:$0xff] %v5903_v44  ;;  %v5911_v38 = vstv %s5840_s8  ;;  %v2807_v31 = vsel %vm242_vm5, %v2804_v16, %v2806_v58  ;;  %v2810_v1 = vsel %vm242_vm5, %v2808_v12, %v2809_v34 }
 0x273   :  { %7127 = vst [vmem:[#allocation57_spill] sm:$0xff] %v5878_v41  ;;  %7129 = vst [vmem:[#allocation59_spill] sm:$0xff] %v5884_v53  ;;  %v7132_v53 = vld [vmem:[#allocation78_spill] sm:$0xff]  ;;  %v2834_v10 = vmul.f32 %v5781_v0, %v2830_v46  ;;  %v2067_v16 = vmul.f32 %v5784_v61, %v5769_v37  ;;  %v7137_v58 = vrot.slane %v5878_v41, 5  ;;  %v7142_v41 = vld [vmem:[#allocation80_spill] sm:$0xff] }
 0x274   :  { %7130 = vst [vmem:[#allocation60_spill] sm:$0xff] %v5886_v14  ;;  %v5899_v7 = vadd.f32 %v7132_v53, %v5762_v29  ;;  %2779 = vrot.lane.b32.xlu1 %v2772_v8, %s4097_s30  ;;  %2813 = vrot.lane.b32.xlu0 %v2805_v23, %s4097_s30  ;;  %v2811_v53 = vrot.slane %v2796_v25, 2  ;;  %v2833_v8 = vmul.f32 %v5784_v61, %v2830_v46  ;;  %v2843_v23 = vrot.slane %v2831_v27, 3  ;;  %v7136_v27 = vld [vmem:[#allocation79_spill] sm:$0xff] }
 0x275   :  { %v2835_v14 = vmul.f32 %v5790_v50, %v2830_v46  ;;  %v5934_v24 = vadd.f32 %v7136_v27, %v5825_v28  ;;  %v5939_v12 = vsel %vm341_vm8, %v2141_v36, %v7137_v58  ;;  %v2016_v25 = vrot.slane %v2003_v39, 1 }
 0x276   :  { %v5913_v18 = vpop.permute.xlu1 %2247  ;;  %v5915_v29 = vpop.permute.xlu0 %2281  ;;  %7138 = vst [vmem:[#allocation64_spill] sm:$0xff] %v5939_v12  ;;  %v2871_v28 = vmul.f32 %v5724_v35, %v5911_v38  ;;  %v2872_v36 = vmul.f32 %v5741_v60, %v5911_v38  ;;  %v2845_v39 = vsel %vm275_vm6, %v2843_v23, %v2844_v22  ;;  %v2846_v27 = vrot.slane %v2833_v8, 3 }
 0x277   :  { %7134 = vst [vmem:[#allocation62_spill] sm:$0xff] %v5913_v18  ;;  %7135 = vst [vmem:[#allocation63_spill] sm:$0xff] %v5915_v29  ;;  %v2035_v29 = vmul.f32 %v5784_v61, %v5720_v62  ;;  %v2836_v18 = vmul.f32 %v5818_v13, %v2830_v46  ;;  %v2848_v58 = vrot.slane %v2834_v10, 3  ;;  %v2849_v12 = vrot.slane %v2835_v14, 3 }
 0x278   :  { %2815 = vrot.lane.b32.xlu1 %v2807_v31, %s4097_s30  ;;  %2817 = vrot.lane.b32.xlu0 %v2810_v1, %s4097_s30  ;;  %v2812_v1 = vsel %vm242_vm5, %v2809_v34, %v2811_v53  ;;  %v5960_v34 = vmul.f32 %v5784_v61, %v5831_v3  ;;  %v5967_v53 = vmul.f32 %v5784_v61, %v5838_v4  ;;  %v2883_v23 = vrot.slane %v2871_v28, 4 }
 0x279   :  { %v2048_v15 = vrot.slane %v2035_v29, 2  ;;  %v5971_v14 = vmul.f32 %v5741_v60, %v5700_v17  ;;  %v2851_v8 = vrot.slane %v2836_v18, 3  ;;  %v2850_v46 = vsel %vm275_vm6, %v2848_v58, %v2849_v12 }
 0x27a   :  { %v5945_v57 = vpop.permute.xlu1 %2283  ;;  %v5947_v31 = vpop.permute.xlu0 %2285  ;;  %7143 = vst [vmem:[#allocation20_spill] sm:$0xff] %v5960_v34  ;;  %7144 = vst [vmem:[#allocation21_spill] sm:$0xff] %v5967_v53  ;;  %v7152_v28 = vrot.slane %v5805_v43, 3  ;;  %v6013_v43 = vmul.f32 %v5781_v0, %v5710_v49 }
 0x27b   :  { %7140 = vst [vmem:[#allocation18_spill] sm:$0xff] %v5945_v57  ;;  %7141 = vst [vmem:[#allocation19_spill] sm:$0xff] %v5947_v31  ;;  %v1109_v57 = vadd.f32 %v7142_v41, %v5828_v26  ;;  %v2080_v31 = vrot.slane %v2067_v16, 3  ;;  %v7146_v26 = vrot.slane %v5751_v51, 1  ;;  %v2884_v16 = vrot.slane %v2872_v36, 4 }
 0x27c   :  { %2819 = vrot.lane.b32.xlu1 %v2812_v1, %s4097_s30  ;;  %2853 = vrot.lane.b32.xlu0 %v2845_v39, %s4097_s30  ;;  %7145 = vst [vmem:[#allocation66_spill] sm:$0xff] %v5971_v14  ;;  %v2873_v1 = vmul.f32 %v5784_v61, %v5911_v38  ;;  %v2847_v39 = vsel %vm275_vm6, %v2844_v22, %v2846_v27  ;;  %v2910_v22 = vstv %s5930_s1  ;;  %v7154_v27 = vld [vmem:[#allocation81_spill] sm:$0xff] }
 0x27d   :  { %v5976_v41 = vsel %vm209_vm4, %v7146_v26, %v2016_v25  ;;  %v2874_v51 = vmul.f32 %v5781_v0, %v5911_v38  ;;  %v2875_v25 = vmul.f32 %v5790_v50, %v5911_v38  ;;  %v5999_v36 = vsel %vm275_vm6, %v7152_v28, %v2080_v31 }
 0x27e   :  { %7147 = vst [vmem:[#allocation67_spill] sm:$0xff] %v5976_v41  ;;  %v5978_v10 = vpop.permute.xlu1 %2287  ;;  %v5980_v29 = vpop.permute.xlu0 %2321  ;;  %7153 = vst [vmem:[#allocation71_spill] sm:$0xff] %v5999_v36  ;;  %v1110_v58 = vadd.f32 %v7154_v27, %v5895_v32  ;;  %v2885_v28 = vsel %vm308_vm7, %v2883_v23, %v2884_v16  ;;  %v2876_v32 = vmul.f32 %v5818_v13, %v5911_v38  ;;  %v7161_v38 = vld [vmem:[#allocation85_spill] sm:$0xff]  ;;  %v7169_v36 = vld [vmem:[#allocation92_spill] sm:$0xff] }
 0x27f   :  { %7148 = vst [vmem:[#allocation68_spill] sm:$0xff] %v5978_v10  ;;  %7149 = vst [vmem:[#allocation69_spill] sm:$0xff] %v5980_v29  ;;  %v7150_v29 = vrot.slane %v5766_v5, 2  ;;  %v7155_v5 = vld [vmem:[#allocation82_spill] sm:$0xff]  ;;  %v2886_v10 = vrot.slane %v2873_v1, 4  ;;  %v2888_v27 = vrot.slane %v2874_v51, 4 }
 0x280   :  { %2855 = vrot.lane.b32.xlu1 %v2847_v39, %s4097_s30  ;;  %2857 = vrot.lane.b32.xlu0 %v2850_v46, %s4097_s30  ;;  %v1147_v26 = vadd.f32 %v7155_v5, %v5899_v7  ;;  %v2852_v46 = vsel %vm275_vm6, %v2849_v12, %v2851_v8  ;;  %v2889_v7 = vrot.slane %v2875_v25, 4  ;;  %v2912_v5 = vmul.f32 %v5741_v60, %v2910_v22  ;;  %v7162_v1 = vld [vmem:[#allocation88_spill] sm:$0xff] }
 0x281   :  { %v5994_v18 = vsel %vm242_vm5, %v7150_v29, %v2048_v15  ;;  %v7156_v15 = vld [vmem:[#allocation84_spill] sm:$0xff]  ;;  %v6032_v12 = vmul.f32 %v5790_v50, %v5710_v49  ;;  %v6036_v8 = vmul.f32 %v5781_v0, %v5720_v62  ;;  %v1150_v23 = vadd.f32 %v7161_v38, %v1110_v58 }
 0x282   :  { %7151 = vst [vmem:[#allocation70_spill] sm:$0xff] %v5994_v18  ;;  %v1149_v29 = vadd.f32 %v7156_v15, %v1109_v57  ;;  %v6015_v31 = vpop.permute.xlu1 %2323  ;;  %v6017_v39 = vpop.permute.xlu0 %2325  ;;  %v2911_v57 = vmul.f32 %v5724_v35, %v2910_v22  ;;  %v2018_v25 = vrot.slane %v6013_v43, 1  ;;  %v6045_v15 = vmul.f32 %v5790_v50, %v5720_v62 }
 0x283   :  { %7157 = vst [vmem:[#allocation72_spill] sm:$0xff] %v6015_v31  ;;  %7158 = vst [vmem:[#allocation73_spill] sm:$0xff] %v6017_v39  ;;  %v6028_v31 = vmul.f32 %v5781_v0, %v5700_v17  ;;  %v2887_v34 = vsel %vm308_vm7, %v2884_v16, %v2886_v10  ;;  %v2914_v58 = vmul.f32 %v5781_v0, %v2910_v22  ;;  %v2924_v43 = vrot.slane %v2912_v5, 5 }
 0x284   :  { %7160 = vst [vmem:[#allocation75_spill] sm:$0xff] %v6032_v12  ;;  %2859 = vrot.lane.b32.xlu1 %v2852_v46, %s4097_s30  ;;  %2893 = vrot.lane.b32.xlu0 %v2885_v28, %s4097_s30  ;;  %v1189_v51 = vadd.f32 %v7162_v1, %v1149_v29  ;;  %v2891_v46 = vrot.slane %v2876_v32, 4  ;;  %v2913_v28 = vmul.f32 %v5784_v61, %v2910_v22  ;;  %v2923_v38 = vrot.slane %v2911_v57, 5  ;;  %v7166_v32 = vld [vmem:[#allocation83_spill] sm:$0xff]  ;;  %v7167_v57 = vld [vmem:[#allocation86_spill] sm:$0xff] }
 0x285   :  { %7159 = vst [vmem:[#allocation74_spill] sm:$0xff] %v6028_v31  ;;  %v2890_v29 = vsel %vm308_vm7, %v2888_v27, %v2889_v7  ;;  %v6056_v1 = vmul.f32 %v5790_v50, %v2910_v22  ;;  %v6068_v10 = vmul.f32 %v5781_v0, %v5772_v33  ;;  %v2950_v16 = vstv %s6004_s9 }
 0x286   :  { %v6047_v39 = vpop.permute.xlu1 %2327  ;;  %v6049_v53 = vpop.permute.xlu0 %2361  ;;  %v1148_v27 = vadd.f32 %v7166_v32, %v5934_v24  ;;  %v1187_v5 = vadd.f32 %v7167_v57, %v1147_v26  ;;  %v1215_v18 = vadd.f32 %v7169_v36, %v1189_v51  ;;  %v2892_v14 = vsel %vm308_vm7, %v2889_v7, %v2891_v46  ;;  %v7175_v32 = vld [vmem:[#allocation96_spill] sm:$0xff] }
 0x287   :  { %7163 = vst [vmem:[#allocation76_spill] sm:$0xff] %v6047_v39  ;;  %7164 = vst [vmem:[#allocation77_spill] sm:$0xff] %v6049_v53  ;;  %v6064_v53 = vmul.f32 %v5790_v50, %v5769_v37  ;;  %v7168_v39 = vld [vmem:[#allocation89_spill] sm:$0xff]  ;;  %v2926_v62 = vrot.slane %v2913_v28, 5  ;;  %v2925_v31 = vsel %vm341_vm8, %v2923_v38, %v2924_v43  ;;  %v2929_v24 = vrot.slane %v6056_v1, 5  ;;  %v7173_v28 = vld [vmem:[#allocation90_spill] sm:$0xff] }
 0x288   :  { %2895 = vrot.lane.b32.xlu1 %v2887_v34, %s4097_s30  ;;  %2897 = vrot.lane.b32.xlu0 %v2890_v29, %s4097_s30  ;;  %v1190_v44 = vadd.f32 %v7168_v39, %v1150_v23  ;;  %v2928_v34 = vrot.slane %v2914_v58, 5  ;;  %v2916_v29 = vmul.f32 %v5818_v13, %v2910_v22  ;;  %v2951_v26 = vmul.f32 %v5724_v35, %v2950_v16  ;;  %v7172_v22 = vld [vmem:[#allocation87_spill] sm:$0xff]  ;;  %v7174_v38 = vld [vmem:[#allocation93_spill] sm:$0xff] }
 0x289   :  { %7165 = vst [vmem:[#allocation78_spill] sm:$0xff] %v6064_v53  ;;  %v2952_v39 = vmul.f32 %v5741_v60, %v2950_v16  ;;  %v2050_v23 = vrot.slane %v6036_v8, 2  ;;  %v1188_v46 = vadd.f32 %v7172_v22, %v1148_v27  ;;  %v1213_v58 = vadd.f32 %v7173_v28, %v1187_v5 }
 0x28a   :  { %v6078_v41 = vpop.permute.xlu1 %2363  ;;  %v6080_v37 = vpop.permute.xlu0 %2365  ;;  %v1216_v1 = vadd.f32 %v7174_v38, %v1190_v44  ;;  %v1255_v57 = vadd.f32 %v7175_v32, %v1215_v18  ;;  %v2931_v51 = vrot.slane %v2916_v29, 5  ;;  %v2953_v7 = vmul.f32 %v5784_v61, %v2950_v16 }
 0x28b   :  { %7170 = vst [vmem:[#allocation79_spill] sm:$0xff] %v6078_v41  ;;  %7171 = vst [vmem:[#allocation80_spill] sm:$0xff] %v6080_v37  ;;  %v2927_v27 = vsel %vm341_vm8, %v2924_v43, %v2926_v62  ;;  %v2930_v5 = vsel %vm341_vm8, %v2928_v34, %v2929_v24  ;;  %v2963_v44 = vrot.slane %v2951_v26, 6  ;;  %v2964_v22 = vrot.slane %v2952_v39, 6  ;;  %v7180_v43 = vld [vmem:[#allocation91_spill] sm:$0xff]  ;;  %v7181_v26 = vld [vmem:[#allocation94_spill] sm:$0xff] }
 0x28c   :  { %2899 = vrot.lane.b32.xlu1 %v2892_v14, %s4097_s30  ;;  %2933 = vrot.lane.b32.xlu0 %v2925_v31, %s4097_s30  ;;  %v2954_v14 = vmul.f32 %v5781_v0, %v2950_v16  ;;  %v2955_v31 = vmul.f32 %v5790_v50, %v2950_v16  ;;  %v7178_v18 = vrot.slane %v6032_v12, 1  ;;  %v6119_v38 = vmul.f32 %v5790_v50, %v5772_v33 }
 0x28d   :  { %v6123_v62 = vmul.f32 %v5781_v0, %v5831_v3  ;;  %v1214_v34 = vadd.f32 %v7180_v43, %v1188_v46  ;;  %v1253_v39 = vadd.f32 %v7181_v26, %v1213_v58  ;;  %v2956_v12 = vmul.f32 %v5818_v13, %v2950_v16  ;;  %v7197_v16 = vld [vmem:[#allocation106_spill] sm:$0xff] }
 0x28e   :  { %v6100_v36 = vpop.permute.xlu1 %2367  ;;  %v6102_v8 = vpop.permute.xlu0 %2401  ;;  %v6114_v28 = vsel %vm209_vm4, %v2018_v25, %v7178_v18  ;;  %v7182_v25 = vld [vmem:[#allocation97_spill] sm:$0xff]  ;;  %v7183_v18 = vld [vmem:[#allocation100_spill] sm:$0xff]  ;;  %v2968_v37 = vrot.slane %v2954_v14, 6  ;;  %v2969_v33 = vrot.slane %v2955_v31, 6  ;;  %v2932_v58 = vsel %vm341_vm8, %v2929_v24, %v2931_v51  ;;  %v7191_v31 = vld [vmem:[#allocation102_spill] sm:$0xff] }
 0x28f   :  { %7176 = vst [vmem:[#allocation81_spill] sm:$0xff] %v6100_v36  ;;  %7177 = vst [vmem:[#allocation82_spill] sm:$0xff] %v6102_v8  ;;  %v1256_v32 = vadd.f32 %v7182_v25, %v1216_v1  ;;  %v1295_v29 = vadd.f32 %v7183_v18, %v1255_v57  ;;  %v2966_v36 = vrot.slane %v2953_v7, 6  ;;  %v2965_v1 = vsel %vm374_vm9, %v2963_v44, %v2964_v22  ;;  %v7188_v57 = vld [vmem:[#allocation95_spill] sm:$0xff]  ;;  %v7190_v24 = vld [vmem:[#allocation101_spill] sm:$0xff] }
 0x290   :  { %7179 = vst [vmem:[#allocation84_spill] sm:$0xff] %v6114_v28  ;;  %2935 = vrot.lane.b32.xlu1 %v2927_v27, %s4097_s30  ;;  %2937 = vrot.lane.b32.xlu0 %v2930_v5, %s4097_s30  ;;  %v7186_v27 = vld [vmem:[#allocation98_spill] sm:$0xff]  ;;  %v7187_v28 = vld [vmem:[#allocation104_spill] sm:$0xff]  ;;  %v1254_v43 = vadd.f32 %v7188_v57, %v1214_v34  ;;  %v7189_v26 = vrot.slane %v6045_v15, 2  ;;  %v6151_v14 = vmul.f32 %v5790_v50, %v5831_v3  ;;  %v7193_v34 = vld [vmem:[#allocation99_spill] sm:$0xff] }
 0x291   :  { %v1293_v5 = vadd.f32 %v7186_v27, %v1253_v39  ;;  %v1335_v46 = vadd.f32 %v7187_v28, %v1295_v29  ;;  %v1296_v51 = vadd.f32 %v7190_v24, %v1256_v32  ;;  %v7192_v28 = vld [vmem:[#allocation108_spill] sm:$0xff]  ;;  %v2990_v29 = vstv %s6098_s10  ;;  %v7196_v57 = vld [vmem:[#allocation105_spill] sm:$0xff] }
 0x292   :  { %v6131_v41 = vpop.permute.xlu1 %2403  ;;  %v6133_v8 = vpop.permute.xlu0 %2405  ;;  %v6146_v7 = vsel %vm242_vm5, %v2050_v23, %v7189_v26  ;;  %v1294_v39 = vadd.f32 %v7193_v34, %v1254_v43  ;;  %v2967_v27 = vsel %vm374_vm9, %v2964_v22, %v2966_v36  ;;  %v7198_v24 = vld [vmem:[#allocation112_spill] sm:$0xff]  ;;  %v7200_v43 = vrot.slane %v6064_v53, 3  ;;  %v7219_v3 = vld [vmem:[#allocation121_spill] sm:$0xff] }
 0x293   :  { %7184 = vst [vmem:[#allocation85_spill] sm:$0xff] %v6131_v41  ;;  %7185 = vst [vmem:[#allocation88_spill] sm:$0xff] %v6133_v8  ;;  %v1333_v44 = vadd.f32 %v7191_v31, %v1293_v5  ;;  %v1375_v23 = vadd.f32 %v7192_v28, %v1335_v46  ;;  %v1336_v26 = vadd.f32 %v7196_v57, %v1296_v51  ;;  %v3016_v31 = vstv %s6109_s11  ;;  %v7199_v46 = vld [vmem:[#allocation103_spill] sm:$0xff] }
 0x294   :  { %2939 = vrot.lane.b32.xlu1 %v2932_v58, %s4097_s30  ;;  %2973 = vrot.lane.b32.xlu0 %v2965_v1, %s4097_s30  ;;  %v2970_v58 = vsel %vm374_vm9, %v2968_v37, %v2969_v33  ;;  %v2971_v1 = vrot.slane %v2956_v12, 6  ;;  %v1334_v28 = vadd.f32 %v7199_v46, %v1294_v39  ;;  %v7201_v34 = vrot.slane %v6060_v59, 3  ;;  %v7203_v12 = vld [vmem:[#allocation109_spill] sm:$0xff]  ;;  %v7208_v46 = vld [vmem:[#allocation107_spill] sm:$0xff] }
 0x295   :  { %v1373_v32 = vadd.f32 %v7197_v16, %v1333_v44  ;;  %v1415_v5 = vadd.f32 %v7198_v24, %v1375_v23  ;;  %v2991_v37 = vmul.f32 %v5724_v35, %v2990_v29  ;;  %v1376_v22 = vadd.f32 %v7203_v12, %v1336_v26  ;;  %v7204_v16 = vld [vmem:[#allocation110_spill] sm:$0xff]  ;;  %v7205_v44 = vld [vmem:[#allocation116_spill] sm:$0xff]  ;;  %v7218_v8 = vld [vmem:[#allocation115_spill] sm:$0xff] }
 0x296   :  { %v6162_v25 = vpop.permute.xlu1 %2407  ;;  %v6164_v18 = vpop.permute.xlu0 %2441  ;;  %v6178_v41 = vsel %vm275_vm6, %v7201_v34, %v7200_v43  ;;  %v2992_v59 = vmul.f32 %v5741_v60, %v2990_v29  ;;  %v3017_v24 = vmul.f32 %v5724_v35, %v3016_v31  ;;  %v3018_v26 = vmul.f32 %v5741_v60, %v3016_v31  ;;  %v7209_v43 = vld [vmem:[#allocation113_spill] sm:$0xff]  ;;  %v7210_v34 = vld [vmem:[#allocation114_spill] sm:$0xff] }
 0x297   :  { %7194 = vst [vmem:[#allocation83_spill] sm:$0xff] %v6162_v25  ;;  %7195 = vst [vmem:[#allocation86_spill] sm:$0xff] %v6164_v18  ;;  %v1413_v51 = vadd.f32 %v7204_v16, %v1373_v32  ;;  %v1455_v23 = vadd.f32 %v7205_v44, %v1415_v5  ;;  %v1374_v32 = vadd.f32 %v7208_v46, %v1334_v28  ;;  %v7211_v16 = vld [vmem:[#allocation120_spill] sm:$0xff]  ;;  %v3056_v36 = vstv %s6140_s12  ;;  %v7212_v18 = vld [vmem:[#allocation111_spill] sm:$0xff] }
 0x298   :  { %7202 = vst [vmem:[#allocation89_spill] sm:$0xff] %v6178_v41  ;;  %2975 = vrot.lane.b32.xlu1 %v2967_v27, %s4097_s30  ;;  %2977 = vrot.lane.b32.xlu0 %v2970_v58, %s4097_s30  ;;  %v2972_v27 = vsel %vm374_vm9, %v2969_v33, %v2971_v1  ;;  %v2993_v58 = vmul.f32 %v5781_v0, %v2990_v29  ;;  %v7213_v28 = vld [vmem:[#allocation117_spill] sm:$0xff] }
 0x299   :  { %v1416_v5 = vadd.f32 %v7209_v43, %v1376_v22  ;;  %v1453_v12 = vadd.f32 %v7210_v34, %v1413_v51  ;;  %v1481_v44 = vadd.f32 %v7211_v16, %v1455_v23  ;;  %v2994_v33 = vmul.f32 %v5790_v50, %v2990_v29  ;;  %v7214_v22 = vld [vmem:[#allocation118_spill] sm:$0xff]  ;;  %v7215_v51 = vld [vmem:[#allocation124_spill] sm:$0xff]  ;;  %v7226_v41 = vld [vmem:[#allocation129_spill] sm:$0xff] }
 0x29a   :  { %v6188_v39 = vpop.permute.xlu1 %2443  ;;  %v6190_v57 = vpop.permute.xlu0 %2445  ;;  %v3019_v1 = vmul.f32 %v5784_v61, %v3016_v31  ;;  %v1414_v25 = vadd.f32 %v7212_v18, %v1374_v32  ;;  %v3030_v16 = vrot.slane %v3018_v26, 1  ;;  %v3020_v29 = vmul.f32 %v5781_v0, %v3016_v31  ;;  %v7220_v32 = vld [vmem:[#allocation122_spill] sm:$0xff] }
 0x29b   :  { %7206 = vst [vmem:[#allocation92_spill] sm:$0xff] %v6188_v39  ;;  %7207 = vst [vmem:[#allocation87_spill] sm:$0xff] %v6190_v57  ;;  %v6206_v39 = vstv %s6155_s13  ;;  %v1456_v46 = vadd.f32 %v7213_v28, %v1416_v5  ;;  %v1479_v43 = vadd.f32 %v7214_v22, %v1453_v12  ;;  %v1521_v34 = vadd.f32 %v7215_v51, %v1481_v44  ;;  %v7221_v28 = vld [vmem:[#allocation128_spill] sm:$0xff]  ;;  %v7222_v51 = vld [vmem:[#allocation119_spill] sm:$0xff] }
 0x29c   :  { %2979 = vrot.lane.b32.xlu1 %v2972_v27, %s4097_s30  ;;  %2999 = vrot.lane.b32.xlu0 %v2991_v37, %s4098_s23  ;;  %v3029_v37 = vrot.slane %v3017_v24, 1  ;;  %v3021_v57 = vmul.f32 %v5790_v50, %v3016_v31  ;;  %v1454_v53 = vadd.f32 %v7218_v8, %v1414_v25  ;;  %v3032_v44 = vrot.slane %v3019_v1, 1  ;;  %v7223_v8 = vld [vmem:[#allocation125_spill] sm:$0xff]  ;;  %s6255_s30 = sld [smem:[#allocation5 + $0x51]] }
 0x29d   :  { %v1482_v18 = vadd.f32 %v7219_v3, %v1456_v46  ;;  %v1519_v5 = vadd.f32 %v7220_v32, %v1479_v43  ;;  %v1561_v12 = vadd.f32 %v7221_v28, %v1521_v34  ;;  %v3022_v24 = vmul.f32 %v5818_v13, %v3016_v31  ;;  %v7224_v3 = vld [vmem:[#allocation126_spill] sm:$0xff]  ;;  %v7225_v28 = vld [vmem:[#allocation123_spill] sm:$0xff] }
 0x29e   :  { %v6212_v23 = vpop.permute.xlu1 %2447  ;;  %v6214_v27 = vpop.permute.xlu0 %2467  ;;  %v3057_v26 = vmul.f32 %v5724_v35, %v3056_v36  ;;  %v3058_v22 = vmul.f32 %v5741_v60, %v3056_v36  ;;  %v3034_v1 = vrot.slane %v3020_v29, 1  ;;  %v3035_v31 = vrot.slane %v3021_v57, 1  ;;  %v7228_v29 = vld [vmem:[#allocation127_spill] sm:$0xff] }
 0x29f   :  { %7216 = vst [vmem:[#allocation90_spill] sm:$0xff] %v6212_v23  ;;  %7217 = vst [vmem:[#allocation93_spill] sm:$0xff] %v6214_v27  ;;  %v1480_v27 = vadd.f32 %v7222_v51, %v1454_v53  ;;  %v1522_v25 = vadd.f32 %v7223_v8, %v1482_v18  ;;  %v1559_v46 = vadd.f32 %v7224_v3, %v1519_v5  ;;  %v7227_v51 = vld [vmem:[#allocation130_spill] sm:$0xff] }
 0x2a0   :  { %3001 = vrot.lane.b32.xlu1 %v2992_v59, %s4098_s23  ;;  %3003 = vrot.lane.b32.xlu0 %v2993_v58, %s4098_s23  ;;  %v1601_v43 = vadd.f32 %v5334_v20, %v1561_v12  ;;  %v3031_v58 = vsel %vm209_vm4, %v3029_v37, %v3030_v16  ;;  %v3059_v32 = vmul.f32 %v5784_v61, %v3056_v36  ;;  %v3037_v20 = vrot.slane %v3022_v24, 1 }
 0x2a1   :  { %v1520_v23 = vadd.f32 %v7225_v28, %v1480_v27  ;;  %v1562_v53 = vadd.f32 %v7226_v41, %v1522_v25  ;;  %v1599_v18 = vadd.f32 %v7227_v51, %v1559_v46  ;;  %v3069_v12 = vrot.slane %v3057_v26, 2 }
 0x2a2   :  { %v6231_v34 = vpop.permute.xlu1 %2469  ;;  %v6233_v59 = vpop.permute.xlu0 %2471  ;;  %v1641_v5 = vadd.f32 %v5379_v21, %v1601_v43  ;;  %v3060_v37 = vmul.f32 %v5781_v0, %v3056_v36  ;;  %v3061_v57 = vmul.f32 %v5790_v50, %v3056_v36  ;;  %v3036_v24 = vsel %vm209_vm4, %v3034_v1, %v3035_v31  ;;  %v7229_v43 = vld [vmem:[#allocation131_spill] sm:$0xff] }
 0x2a3   :  { %v1560_v8 = vadd.f32 %v7228_v29, %v1520_v23  ;;  %v1602_v27 = vadd.f32 %v5355_v47, %v1562_v53  ;;  %v1639_v41 = vadd.f32 %v5357_v30, %v1599_v18  ;;  %v3070_v26 = vrot.slane %v3058_v22, 2 }
 0x2a4   :  { %3005 = vrot.lane.b32.xlu1 %v2994_v33, %s4098_s23  ;;  %3039 = vrot.lane.b32.xlu0 %v3031_v58, %s4098_s23  ;;  %v1681_v25 = vadd.f32 %v5423_v42, %v1641_v5  ;;  %v3033_v33 = vsel %vm209_vm4, %v3030_v16, %v3032_v44  ;;  %v3072_v46 = vrot.slane %v3059_v32, 2  ;;  %v3038_v16 = vsel %vm209_vm4, %v3035_v31, %v3037_v20 }
 0x2a5   :  { %v1600_v23 = vadd.f32 %v7229_v43, %v1560_v8  ;;  %v1642_v47 = vadd.f32 %v5397_v40, %v1602_v27  ;;  %v1679_v30 = vadd.f32 %v5399_v48, %v1639_v41  ;;  %v3074_v44 = vrot.slane %v3060_v37, 2  ;;  %v7231_v37 = vld [vmem:[#allocation28_spill] sm:$0xff]  ;;  %v7234_v43 = vld [vmem:[#allocation25_spill] sm:$0xff] }
 0x2a6   :  { %v6249_v3 = vpop.permute.xlu1 %2473  ;;  %v6251_v21 = vpop.permute.xlu0 %2507  ;;  %v1721_v42 = vadd.f32 %v5463_v56, %v1681_v25  ;;  %v3075_v58 = vrot.slane %v3061_v57, 2  ;;  %v3062_v22 = vmul.f32 %v5818_v13, %v3056_v36  ;;  %v3071_v53 = vsel %vm242_vm5, %v3069_v12, %v3070_v26  ;;  %v7230_v12 = vld [vmem:[#allocation23_spill] sm:$0xff] }
 0x2a7   :  { %v1640_v1 = vadd.f32 %v5377_v52, %v1600_v23  ;;  %v1682_v32 = vadd.f32 %v5441_v11, %v1642_v47  ;;  %v1719_v40 = vadd.f32 %v5443_v54, %v1679_v30  ;;  %v3073_v31 = vsel %vm242_vm5, %v3070_v26, %v3072_v46  ;;  %v7233_v46 = vld [vmem:[#allocation26_spill] sm:$0xff]  ;;  %v7235_v23 = vld [vmem:[#allocation32_spill] sm:$0xff] }
 0x2a8   :  { %3041 = vrot.lane.b32.xlu1 %v3033_v33, %s4098_s23  ;;  %3043 = vrot.lane.b32.xlu0 %v3036_v24, %s4098_s23  ;;  %v1747_v48 = vadd.f32 %v5499_v55, %v1721_v42  ;;  %v3097_v51 = vmul.f32 %v5724_v35, %v6206_v39  ;;  %v3098_v52 = vmul.f32 %v5741_v60, %v6206_v39  ;;  %v3077_v5 = vrot.slane %v3062_v22, 2  ;;  %v7232_v24 = vld [vmem:[#allocation22_spill] sm:$0xff]  ;;  %v7236_v22 = vld [vmem:[#allocation24_spill] sm:$0xff] }
 0x2a9   :  { %v1680_v11 = vadd.f32 %v5421_v9, %v1640_v1  ;;  %v1722_v54 = vadd.f32 %v5479_v6, %v1682_v32  ;;  %v1745_v55 = vadd.f32 %v5481_v45, %v1719_v40  ;;  %v3076_v18 = vsel %vm242_vm5, %v3074_v44, %v3075_v58  ;;  %v7237_v32 = vld [vmem:[#allocation30_spill] sm:$0xff] }
 0x2aa   :  { %v6269_v28 = vpop.permute.xlu1 %2509  ;;  %v6271_v56 = vpop.permute.xlu0 %2511  ;;  %v1787_v36 = vadd.f32 %v5534_v19, %v1747_v48  ;;  %v3099_v20 = vmul.f32 %v5784_v61, %v6206_v39  ;;  %v3100_v9 = vmul.f32 %v5781_v0, %v6206_v39  ;;  %v3109_v27 = vrot.slane %v3097_v51, 3  ;;  %v7238_v48 = vld [vmem:[#allocation31_spill] sm:$0xff]  ;;  %v7239_v51 = vld [vmem:[#allocation36_spill] sm:$0xff] }
 0x2ab   :  { %v1720_v6 = vadd.f32 %v5461_v63, %v1680_v11  ;;  %v1748_v45 = vadd.f32 %v5513_v2, %v1722_v54  ;;  %v1785_v19 = vadd.f32 %v7230_v12, %v1745_v55  ;;  %v3110_v41 = vrot.slane %v3098_v52, 3 }
 0x2ac   :  { %3045 = vrot.lane.b32.xlu1 %v3038_v16, %s4098_s23  ;;  %3079 = vrot.lane.b32.xlu0 %v3071_v53, %s4098_s23  ;;  %v1827_v57 = vadd.f32 %v7231_v37, %v1787_v36  ;;  %v3101_v25 = vmul.f32 %v5790_v50, %v6206_v39  ;;  %v3136_v33 = vstv %s6255_s30  ;;  %v3078_v30 = vsel %vm242_vm5, %v3075_v58, %v3077_v5  ;;  %v7240_v36 = vld [vmem:[#allocation27_spill] sm:$0xff]  ;;  %v7241_v5 = vld [vmem:[#allocation34_spill] sm:$0xff] }
 0x2ad   :  { %v1746_v26 = vadd.f32 %v7232_v24, %v1720_v6  ;;  %v1788_v63 = vadd.f32 %v7233_v46, %v1748_v45  ;;  %v1825_v2 = vadd.f32 %v7234_v43, %v1785_v19  ;;  %v3112_v42 = vrot.slane %v3099_v20, 3  ;;  %v7243_v45 = vld [vmem:[#allocation14_spill] sm:$0xff] }
 0x2ae   :  { %v6294_v29 = vpop.permute.xlu1 %2513  ;;  %v6296_v8 = vpop.permute.xlu0 %2547  ;;  %v1867_v47 = vadd.f32 %v7235_v23, %v1827_v57  ;;  %v3114_v16 = vrot.slane %v3100_v9, 3  ;;  %v3102_v44 = vmul.f32 %v5818_v13, %v6206_v39  ;;  %v3111_v58 = vsel %vm275_vm6, %v3109_v27, %v3110_v41  ;;  %v7242_v9 = vld [vmem:[#allocation35_spill] sm:$0xff] }
 0x2af   :  { %v1786_v1 = vadd.f32 %v7236_v22, %v1746_v26  ;;  %v1828_v40 = vadd.f32 %v7237_v32, %v1788_v63  ;;  %v1865_v53 = vadd.f32 %v7238_v48, %v1825_v2  ;;  %v3115_v54 = vrot.slane %v3101_v25, 3  ;;  %v7244_v25 = vld [vmem:[#allocation29_spill] sm:$0xff]  ;;  %v7245_v26 = vld [vmem:[#allocation38_spill] sm:$0xff]  ;;  %v7246_v63 = vld [vmem:[#allocation39_spill] sm:$0xff] }
 0x2b0   :  { %3081 = vrot.lane.b32.xlu1 %v3073_v31, %s4098_s23  ;;  %3083 = vrot.lane.b32.xlu0 %v3076_v18, %s4098_s23  ;;  %v1907_v52 = vadd.f32 %v7239_v51, %v1867_v47  ;;  %v3137_v55 = vmul.f32 %v5724_v35, %v3136_v33  ;;  %v3138_v39 = vmul.f32 %v5741_v60, %v3136_v33  ;;  %v3117_v57 = vrot.slane %v3102_v44, 3  ;;  %v7247_v2 = vld [vmem:[#allocation42_spill] sm:$0xff] }
 0x2b1   :  { %v1826_v18 = vadd.f32 %v7240_v36, %v1786_v1  ;;  %v1868_v20 = vadd.f32 %v7241_v5, %v1828_v40  ;;  %v1905_v6 = vadd.f32 %v7242_v9, %v1865_v53  ;;  %v6329_v19 = vmul.f32 %v5781_v0, %v5838_v4  ;;  %v7248_v1 = vld [vmem:[#allocation33_spill] sm:$0xff]  ;;  %v7249_v40 = vld [vmem:[#allocation15_spill] sm:$0xff]  ;;  %v7250_v53 = vld [vmem:[#allocation40_spill] sm:$0xff] }
 0x2b2   :  { %v6316_v31 = vpop.permute.xlu1 %2549  ;;  %v6318_v11 = vpop.permute.xlu0 %2551  ;;  %v1947_v12 = vadd.f32 %v7243_v45, %v1907_v52  ;;  %v3113_v37 = vsel %vm275_vm6, %v3110_v41, %v3112_v42  ;;  %v3139_v27 = vmul.f32 %v5784_v61, %v3136_v33  ;;  %v3149_v22 = vrot.slane %v3137_v55, 4 }
 0x2b3   :  { %v1866_v24 = vadd.f32 %v7244_v25, %v1826_v18  ;;  %v1908_v46 = vadd.f32 %v7245_v26, %v1868_v20  ;;  %v1945_v43 = vadd.f32 %v7246_v63, %v1905_v6  ;;  %v3150_v41 = vrot.slane %v3138_v39, 4  ;;  %v7251_v18 = vld [vmem:[#allocation37_spill] sm:$0xff]  ;;  %v7252_v20 = vld [vmem:[#allocation74_spill] sm:$0xff] }
 0x2b4   :  { %3085 = vrot.lane.b32.xlu1 %v3078_v30, %s4098_s23  ;;  %3119 = vrot.lane.b32.xlu0 %v3111_v58, %s4098_s23  ;;  %v1987_v23 = vadd.f32 %v7247_v2, %v1947_v12  ;;  %v3140_v42 = vmul.f32 %v5781_v0, %v3136_v33  ;;  %v6347_v44 = vmul.f32 %v5790_v50, %v3136_v33  ;;  %v3176_v36 = vstv %s6310_s14  ;;  %v7253_v6 = vld [vmem:[#allocation45_spill] sm:$0xff] }
 0x2b5   :  { %v1906_v32 = vadd.f32 %v7248_v1, %v1866_v24  ;;  %v1948_v48 = vadd.f32 %v7249_v40, %v1908_v46  ;;  %v1985_v51 = vadd.f32 %v7250_v53, %v1945_v43  ;;  %v3116_v52 = vsel %vm275_vm6, %v3114_v16, %v3115_v54  ;;  %v7255_v26 = vld [vmem:[#allocation17_spill] sm:$0xff] }
 0x2b6   :  { %v6341_v47 = vpop.permute.xlu1 %2553  ;;  %v6343_v30 = vpop.permute.xlu0 %2587  ;;  %v2006_v58 = vmul.f32 %v5818_v13, %v5710_v49  ;;  %v1994_v55 = vmul.f32 %v5790_v50, %v5700_v17  ;;  %v3118_v39 = vsel %vm275_vm6, %v3115_v54, %v3117_v57  ;;  %v1997_v9 = vadd.f32 %v7252_v20, %v1987_v23  ;;  %v7254_v57 = vld [vmem:[#allocation16_spill] sm:$0xff]  ;;  %v7256_v23 = vld [vmem:[#allocation41_spill] sm:$0xff]  ;;  %v7259_v20 = vld [vmem:[#allocation66_spill] sm:$0xff] }
 0x2b7   :  { %v1946_v5 = vadd.f32 %v7251_v18, %v1906_v32  ;;  %v1988_v45 = vadd.f32 %v7253_v6, %v1948_v48  ;;  %v3152_v16 = vrot.slane %v3139_v27, 4  ;;  %v3151_v17 = vsel %vm308_vm7, %v3149_v22, %v3150_v41  ;;  %v7258_v18 = vld [vmem:[#allocation53_spill] sm:$0xff] }
 0x2b8   :  { %3121 = vrot.lane.b32.xlu1 %v3113_v37, %s4098_s23  ;;  %3123 = vrot.lane.b32.xlu0 %v3116_v52, %s4098_s23  ;;  %v3154_v37 = vrot.slane %v3140_v42, 4  ;;  %v3155_v25 = vrot.slane %v6347_v44, 4  ;;  %v3142_v54 = vmul.f32 %v5818_v13, %v3136_v33  ;;  %v1995_v24 = vadd.f32 %v7254_v57, %v1985_v51  ;;  %v7257_v33 = vld [vmem:[#allocation84_spill] sm:$0xff]  ;;  %v7261_v57 = vld [vmem:[#allocation75_spill] sm:$0xff] }
 0x2b9   :  { %v1986_v46 = vadd.f32 %v7255_v26, %v1946_v5  ;;  %v3177_v63 = vmul.f32 %v5724_v35, %v3176_v36  ;;  %v3178_v27 = vmul.f32 %v5741_v60, %v3176_v36  ;;  %v2146_v43 = vrot.slane %v6123_v62, 5 }
 0x2ba   :  { %v6364_v12 = vpop.permute.xlu1 %2589  ;;  %v6366_v49 = vpop.permute.xlu0 %2591  ;;  %v2021_v2 = vrot.slane %v2006_v58, 1  ;;  %v2038_v1 = vmul.f32 %v5818_v13, %v7256_v23  ;;  %v6381_v22 = vstv %s6335_s16  ;;  %v2029_v42 = vadd.f32 %v7257_v33, %v1997_v9 }
 0x2bb   :  { %v1998_v44 = vadd.f32 %v1994_v55, %v1988_v45  ;;  %v3153_v32 = vsel %vm308_vm7, %v3150_v41, %v3152_v16  ;;  %v3179_v40 = vmul.f32 %v5784_v61, %v3176_v36  ;;  %v3156_v51 = vsel %vm308_vm7, %v3154_v37, %v3155_v25  ;;  %v7260_v16 = vld [vmem:[#allocation43_spill] sm:$0xff] }
 0x2bc   :  { %3125 = vrot.lane.b32.xlu1 %v3118_v39, %s4098_s23  ;;  %3159 = vrot.lane.b32.xlu0 %v3151_v17, %s4098_s23  ;;  %v3157_v52 = vrot.slane %v3142_v54, 4  ;;  %v3180_v58 = vmul.f32 %v5781_v0, %v3176_v36  ;;  %v3181_v39 = vmul.f32 %v5790_v50, %v3176_v36  ;;  %v2027_v5 = vadd.f32 %v7258_v18, %v1995_v24 }
 0x2bd   :  { %v1996_v9 = vadd.f32 %v7259_v20, %v1986_v46  ;;  %v3189_v55 = vrot.slane %v3177_v63, 5  ;;  %v3190_v6 = vrot.slane %v3178_v27, 5  ;;  %v2147_v41 = vrot.slane %v6151_v14, 5  ;;  %v7264_v20 = vld [vmem:[#allocation67_spill] sm:$0xff] }
 0x2be   :  { %v6386_v48 = vpop.permute.xlu1 %2593  ;;  %v6388_v53 = vpop.permute.xlu0 %2627  ;;  %v2053_v45 = vrot.slane %v2038_v1, 2  ;;  %v2070_v17 = vmul.f32 %v5818_v13, %v7260_v16  ;;  %v7262_v26 = vrot.slane %v7261_v57, 1  ;;  %v2061_v54 = vadd.f32 %v6146_v7, %v2029_v42  ;;  %v7267_v16 = vld [vmem:[#allocation44_spill] sm:$0xff] }
 0x2bf   :  { %v3192_v46 = vrot.slane %v3179_v40, 5  ;;  %v3182_v63 = vmul.f32 %v5818_v13, %v3176_v36  ;;  %v3194_v1 = vrot.slane %v3180_v58, 5  ;;  %v3195_v33 = vrot.slane %v3181_v39, 5 }
 0x2c0   :  { %v2022_v37 = vsel %vm209_vm4, %v7262_v26, %v2021_v2  ;;  %3161 = vrot.lane.b32.xlu1 %v3153_v32, %s4098_s23  ;;  %3163 = vrot.lane.b32.xlu0 %v3156_v51, %s4098_s23  ;;  %v3217_v18 = vmul.f32 %v5724_v35, %v6381_v22  ;;  %v3218_v2 = vmul.f32 %v5741_v60, %v6381_v22  ;;  %v7263_v32 = vld [vmem:[#allocation54_spill] sm:$0xff]  ;;  %v7266_v40 = vrot.slane %v6068_v10, 4 }
 0x2c1   :  { %v2030_v24 = vadd.f32 %v2022_v37, %v1998_v44  ;;  %v2059_v51 = vadd.f32 %v7263_v32, %v2027_v5  ;;  %v2028_v7 = vadd.f32 %v7264_v20, %v1996_v9  ;;  %v3158_v42 = vsel %vm308_vm7, %v3155_v25, %v3157_v52  ;;  %v7269_v25 = vld [vmem:[#allocation89_spill] sm:$0xff]  ;;  %v7271_v32 = vld [vmem:[#allocation70_spill] sm:$0xff] }
 0x2c2   :  { %v6405_v27 = vpop.permute.xlu1 %2629  ;;  %v6407_v23 = vpop.permute.xlu0 %2631  ;;  %v3191_v36 = vsel %vm341_vm8, %v3189_v55, %v3190_v6  ;;  %v7265_v44 = vrot.slane %v6119_v38, 4  ;;  %v2085_v39 = vrot.slane %v2070_v17, 3  ;;  %v2102_v35 = vmul.f32 %v5818_v13, %v7267_v16  ;;  %v7273_v20 = vld [vmem:[#allocation78_spill] sm:$0xff] }
 0x2c3   :  { %v7268_v60 = vrot.slane %v6045_v15, 2  ;;  %v2093_v52 = vadd.f32 %v7269_v25, %v2061_v54  ;;  %v3193_v55 = vsel %vm341_vm8, %v3190_v6, %v3192_v46  ;;  %v3197_v10 = vrot.slane %v3182_v63, 5  ;;  %v7270_v54 = vld [vmem:[#allocation55_spill] sm:$0xff] }
 0x2c4   :  { %v2116_v58 = vsel %vm308_vm7, %v7266_v40, %v7265_v44  ;;  %3165 = vrot.lane.b32.xlu1 %v3158_v42, %s4098_s23  ;;  %3199 = vrot.lane.b32.xlu0 %v3191_v36, %s4098_s23  ;;  %v3196_v15 = vsel %vm341_vm8, %v3194_v1, %v3195_v33  ;;  %v3229_v26 = vrot.slane %v3217_v18, 6  ;;  %v3219_v37 = vmul.f32 %v5784_v61, %v6381_v22  ;;  %v7276_v25 = vld [vmem:[#allocation71_spill] sm:$0xff] }
 0x2c5   :  { %v2054_v5 = vsel %vm242_vm5, %v7268_v60, %v2053_v45  ;;  %v3230_v45 = vrot.slane %v3218_v2, 6  ;;  %v2060_v6 = vadd.f32 %v7271_v32, %v2028_v7  ;;  %v3220_v46 = vmul.f32 %v5781_v0, %v6381_v22  ;;  %v7272_v2 = vld [vmem:[#allocation50_spill] sm:$0xff] }
 0x2c6   :  { %v2062_v9 = vadd.f32 %v2054_v5, %v2030_v24  ;;  %v6433_v17 = vpop.permute.xlu1 %2633  ;;  %v6435_v57 = vpop.permute.xlu0 %2667  ;;  %v2091_v24 = vadd.f32 %v7270_v54, %v2059_v51  ;;  %v6448_v63 = vmul.f32 %v5790_v50, %v6381_v22  ;;  %v6452_v1 = vmul.f32 %v5790_v50, %v5838_v4  ;;  %v7275_v5 = vld [vmem:[#allocation56_spill] sm:$0xff] }
 0x2c7   :  { %v2117_v18 = vrot.slane %v2102_v35, 4  ;;  %v2134_v61 = vmul.f32 %v5818_v13, %v7272_v2  ;;  %v7274_v42 = vrot.slane %v7273_v20, 3  ;;  %v2148_v0 = vsel %vm341_vm8, %v2146_v43, %v2147_v41 }
 0x2c8   :  { %3201 = vrot.lane.b32.xlu1 %v3193_v55, %s4098_s23  ;;  %3203 = vrot.lane.b32.xlu0 %v3196_v15, %s4098_s23  ;;  %v2178_v50 = vrot.slane %v6329_v19, 6  ;;  %v2125_v7 = vadd.f32 %v2116_v58, %v2093_v52  ;;  %v3231_v16 = vsel %vm374_vm9, %v3229_v26, %v3230_v45  ;;  %v3232_v35 = vrot.slane %v3219_v37, 6  ;;  %v7280_v26 = vld [vmem:[#allocation58_spill] sm:$0xff] }
 0x2c9   :  { %v2086_v51 = vsel %vm275_vm6, %v7274_v42, %v2085_v39  ;;  %v3198_v39 = vsel %vm341_vm8, %v3195_v33, %v3197_v10  ;;  %v3222_v60 = vmul.f32 %v5818_v13, %v6381_v22  ;;  %v2123_v62 = vadd.f32 %v7275_v5, %v2091_v24  ;;  %v7278_v22 = vld [vmem:[#allocation61_spill] sm:$0xff]  ;;  %v7290_v5 = vld [vmem:[#allocation64_spill] sm:$0xff] }
 0x2ca   :  { %v2094_v36 = vadd.f32 %v2086_v51, %v2062_v9  ;;  %v6467_v44 = vpop.permute.xlu1 %2669  ;;  %v6469_v40 = vpop.permute.xlu0 %2671  ;;  %v2092_v43 = vadd.f32 %v7276_v25, %v2060_v6  ;;  %v3234_v55 = vrot.slane %v3220_v46, 6  ;;  %v3235_v19 = vrot.slane %v6448_v63, 6  ;;  %v7282_v24 = vld [vmem:[#allocation65_spill] sm:$0xff]  ;;  %v7284_v6 = vld [vmem:[#allocation47_spill] sm:$0xff]  ;;  %v7286_v63 = vld [vmem:[#allocation20_spill] sm:$0xff] }
 0x2cb   :  { %v2179_v58 = vrot.slane %v6452_v1, 6  ;;  %v2149_v52 = vrot.slane %v2134_v61, 5  ;;  %v2166_v33 = vmul.f32 %v5818_v13, %v5838_v4  ;;  %v7277_v9 = vrot.slane %v6119_v38, 4 }
 0x2cc   :  { %3205 = vrot.lane.b32.xlu1 %v3198_v39, %s4098_s23  ;;  %3239 = vrot.lane.b32.xlu0 %v3231_v16, %s4098_s23  ;;  %v7279_v15 = vrot.slane %v7278_v22, 6  ;;  %v7281_v37 = vrot.slane %v7280_v26, 6  ;;  %v7283_v32 = vrot.slane %v7282_v24, 4  ;;  %v7285_v46 = vrot.slane %v7284_v6, 4 }
 0x2cd   :  { %v2118_v10 = vsel %vm308_vm7, %v7277_v9, %v2117_v18  ;;  %v2157_v4 = vadd.f32 %v2148_v0, %v2125_v7  ;;  %v7287_v1 = vrot.slane %v7286_v63, 5  ;;  %v7288_v18 = vld [vmem:[#allocation57_spill] sm:$0xff]  ;;  %v3233_v51 = vsel %vm374_vm9, %v3230_v45, %v3232_v35 }
 0x2ce   :  { %v2175_v54 = vsel %vm374_vm9, %v7281_v37, %v7279_v15  ;;  %v2113_v13 = vsel %vm308_vm7, %v7285_v46, %v7283_v32  ;;  %v2126_v38 = vadd.f32 %v2118_v10, %v2094_v36  ;;  %v7289_v2 = vrot.slane %v7288_v18, 5  ;;  %v6501_v20 = vpop.permute.xlu1 %2673  ;;  %v6503_v42 = vpop.permute.xlu0 %2707  ;;  %v7291_v9 = vld [vmem:[#allocation21_spill] sm:$0xff]  ;;  %v6539_v32 = vld [vmem:[#allocation3 + $0x18] sm:$0xff]  ;;  %v6542_v46 = vld [vmem:[#allocation3 + $0x20] sm:$0xff] }
 0x2cf   :  { %v3256_v39 = vstv %s6431_s17  ;;  %v3282_v16 = vstv %s6440_s25  ;;  %v2155_v25 = vadd.f32 %v7290_v5, %v2123_v62  ;;  %v2124_v0 = vadd.f32 %v2113_v13, %v2092_v43 }
 0x2d0   :  { %v2145_v61 = vsel %vm341_vm8, %v7289_v2, %v7287_v1  ;;  %v3236_v7 = vsel %vm374_vm9, %v3234_v55, %v3235_v19  ;;  %v3237_v36 = vrot.slane %v3222_v60, 6  ;;  %v7292_v10 = vrot.slane %v7291_v9, 6  ;;  %3241 = vrot.lane.b32.xlu1 %v3233_v51, %s4098_s23  ;;  %v6523_v60 = vld [vmem:[#allocation3] sm:$0xff]  ;;  %v6526_v55 = vld [vmem:[#allocation3 + $0x8] sm:$0xff] }
 0x2d1   :  { %v2180_v37 = vsel %vm374_vm9, %v2178_v50, %v2179_v58  ;;  %v2181_v24 = vrot.slane %v2166_v33, 6  ;;  %v2150_v45 = vsel %vm341_vm8, %v2147_v41, %v2149_v52  ;;  %3243 = vrot.lane.b32.xlu0 %v3236_v7, %s4098_s23  ;;  %v3283_v43 = vmul.f32 %v6523_v60, %v3282_v16  ;;  %v6536_v52 = vld [vmem:[#allocation3 + $0x10] sm:$0x3f]  ;;  %v6546_v1 = vld [vmem:[#allocation3 + $0x28] sm:$0x3f] }
 0x2d2   :  { %v2177_v26 = vsel %vm374_vm9, %v7279_v15, %v7292_v10  ;;  %v2189_v35 = vadd.f32 %v2180_v37, %v2157_v4  ;;  %v2158_v62 = vadd.f32 %v2150_v45, %v2126_v38  ;;  %v3284_v22 = vmul.f32 %v6526_v55, %v3282_v16  ;;  %v6531_v50 = vpop.permute.xlu1 %2709  ;;  %v6533_v14 = vpop.permute.xlu0 %2711  ;;  %v7297_v37 = vld [vmem:[#allocation46_spill] sm:$0xff] }
 0x2d3   :  { %7293 = vst [vmem:[#allocation96_spill] sm:$0xff] %v6531_v50  ;;  %v3257_v41 = vmul.f32 %v6523_v60, %v3256_v39  ;;  %v3285_v33 = vmul.f32 %v6536_v52, %v3282_v16  ;;  %v3286_v6 = vmul.f32 %v6539_v32, %v3282_v16  ;;  %v3287_v13 = vmul.f32 %v6542_v46, %v3282_v16 }
 0x2d4   :  { %v2187_v4 = vadd.f32 %v2175_v54, %v2155_v25  ;;  %v2156_v38 = vadd.f32 %v2145_v61, %v2124_v0  ;;  %v3238_v63 = vsel %vm374_vm9, %v3235_v19, %v3237_v36  ;;  %v3288_v18 = vmul.f32 %v6546_v1, %v3282_v16  ;;  %v7294_v54 = vld [vmem:[#allocation49_spill] sm:$0xff] }
 0x2d5   :  { %v2182_v2 = vsel %vm374_vm9, %v2179_v58, %v2181_v24  ;;  %3245 = vrot.lane.b32.xlu1 %v3238_v63, %s4098_s23  ;;  %3265 = vrot.lane.b32.xlu0 %v3257_v41, %s4099_s7  ;;  %v3258_v51 = vmul.f32 %v6526_v55, %v3256_v39  ;;  %v3259_v5 = vmul.f32 %v6539_v32, %v3256_v39  ;;  %v3295_v25 = vrot.slane %v3283_v43, 1  ;;  %s6587_s23 = sld [smem:[#allocation5 + $0x52]] }
 0x2d6   :  { %v2190_v7 = vadd.f32 %v2182_v2, %v2158_v62  ;;  %v2215_v61 = vadd.f32 %v7294_v54, %v2189_v35  ;;  %v3296_v19 = vrot.slane %v3284_v22, 1  ;;  %v6555_v0 = vpop.permute.xlu1 %2713  ;;  %v6557_v36 = vpop.permute.xlu0 %2733  ;;  %v3298_v16 = vrot.slane %v3285_v33, 1  ;;  %v7298_v62 = vld [vmem:[#allocation51_spill] sm:$0xff]  ;;  %v7299_v22 = vld [vmem:[#allocation60_spill] sm:$0xff] }
 0x2d7   :  { %7295 = vst [vmem:[#allocation91_spill] sm:$0xff] %v6555_v0  ;;  %7296 = vst [vmem:[#allocation94_spill] sm:$0xff] %v6557_v36  ;;  %v3300_v58 = vrot.slane %v3286_v6, 1  ;;  %v3301_v9 = vrot.slane %v3287_v13, 1  ;;  %v3322_v10 = vstv %s6508_s18  ;;  %v2188_v15 = vadd.f32 %v2177_v26, %v2156_v38  ;;  %v7314_v36 = vld [vmem:[#allocation76_spill] sm:$0xff]  ;;  %v7318_v0 = vld [vmem:[#allocation81_spill] sm:$0xff] }
 0x2d8   :  { %v2213_v24 = vadd.f32 %v7297_v37, %v2187_v4  ;;  %v3303_v45 = vrot.slane %v3288_v18, 1  ;;  %v3260_v35 = vmul.f32 %v6542_v46, %v3256_v39  ;;  %v2216_v43 = vadd.f32 %v7298_v62, %v2190_v7  ;;  %v7301_v18 = vld [vmem:[#allocation48_spill] sm:$0xff]  ;;  %v7303_v7 = vld [vmem:[#allocation19_spill] sm:$0xff]  ;;  %v7306_v62 = vld [vmem:[#allocation73_spill] sm:$0xff] }
 0x2d9   :  { %3267 = vrot.lane.b32.xlu1 %v3258_v51, %s4099_s7  ;;  %3269 = vrot.lane.b32.xlu0 %v3259_v5, %s4099_s7  ;;  %v2255_v41 = vadd.f32 %v7299_v22, %v2215_v61  ;;  %v3323_v63 = vmul.f32 %v6523_v60, %v3322_v10  ;;  %v6568_v33 = vstv %s6529_s19  ;;  %v3297_v13 = vsel %vm209_vm4, %v3295_v25, %v3296_v19  ;;  %v7302_v51 = vld [vmem:[#allocation52_spill] sm:$0xff]  ;;  %v7305_v37 = vld [vmem:[#allocation63_spill] sm:$0xff] }
 0x2da   :  { %v6570_v6 = vpop.permute.xlu1 %2735  ;;  %v6572_v26 = vpop.permute.xlu0 %2737  ;;  %v3299_v4 = vsel %vm209_vm4, %v3296_v19, %v3298_v16  ;;  %v3302_v38 = vsel %vm209_vm4, %v3300_v58, %v3301_v9  ;;  %v3324_v39 = vmul.f32 %v6526_v55, %v3322_v10  ;;  %v2214_v2 = vadd.f32 %v7301_v18, %v2188_v15  ;;  %v7304_v58 = vld [vmem:[#allocation62_spill] sm:$0xff] }
 0x2db   :  { %7300 = vst [vmem:[#allocation97_spill] sm:$0xff] %v6570_v6  ;;  %v2253_v5 = vadd.f32 %v7302_v51, %v2213_v24  ;;  %v2295_v54 = vadd.f32 %v7303_v7, %v2255_v41  ;;  %v3304_v61 = vsel %vm209_vm4, %v3301_v9, %v3303_v45  ;;  %v3325_v25 = vmul.f32 %v6536_v52, %v3322_v10  ;;  %v7309_v7 = vld [vmem:[#allocation59_spill] sm:$0xff] }
 0x2dc   :  { %v3326_v19 = vmul.f32 %v6539_v32, %v3322_v10  ;;  %v3327_v16 = vmul.f32 %v6542_v46, %v3322_v10  ;;  %v2256_v15 = vadd.f32 %v7304_v58, %v2216_v43  ;;  %v3335_v41 = vrot.slane %v3323_v63, 2  ;;  %v7310_v58 = vld [vmem:[#allocation68_spill] sm:$0xff] }
 0x2dd   :  { %3271 = vrot.lane.b32.xlu1 %v3260_v35, %s4099_s7  ;;  %3305 = vrot.lane.b32.xlu0 %v3297_v13, %s4099_s7  ;;  %v2293_v24 = vadd.f32 %v7305_v37, %v2253_v5  ;;  %v2335_v22 = vadd.f32 %v7306_v62, %v2295_v54  ;;  %v3336_v35 = vrot.slane %v3324_v39, 2  ;;  %v3328_v13 = vmul.f32 %v6546_v1, %v3322_v10  ;;  %v7311_v37 = vld [vmem:[#allocation69_spill] sm:$0xff]  ;;  %v7312_v63 = vld [vmem:[#allocation80_spill] sm:$0xff] }
 0x2de   :  { %v6592_v9 = vpop.permute.xlu1 %2739  ;;  %v6594_v45 = vpop.permute.xlu0 %2773  ;;  %v3363_v18 = vmul.f32 %v6523_v60, %v6568_v33  ;;  %v3364_v51 = vmul.f32 %v6526_v55, %v6568_v33  ;;  %v2254_v43 = vadd.f32 %v7309_v7, %v2214_v2  ;;  %v2296_v5 = vadd.f32 %v7310_v58, %v2256_v15  ;;  %v7315_v7 = vld [vmem:[#allocation77_spill] sm:$0xff]  ;;  %v7316_v58 = vld [vmem:[#allocation88_spill] sm:$0xff] }
 0x2df   :  { %7307 = vst [vmem:[#allocation100_spill] sm:$0xff] %v6592_v9  ;;  %7308 = vst [vmem:[#allocation98_spill] sm:$0xff] %v6594_v45  ;;  %v2333_v54 = vadd.f32 %v7311_v37, %v2293_v24  ;;  %v2375_v62 = vadd.f32 %v7312_v63, %v2335_v22  ;;  %v3338_v39 = vrot.slane %v3325_v25, 2  ;;  %v3340_v10 = vrot.slane %v3326_v19, 2  ;;  %v7313_v9 = vld [vmem:[#allocation18_spill] sm:$0xff]  ;;  %v7317_v37 = vld [vmem:[#allocation72_spill] sm:$0xff] }
 0x2e0   :  { %v3341_v6 = vrot.slane %v3327_v16, 2  ;;  %v3365_v45 = vmul.f32 %v6536_v52, %v6568_v33  ;;  %v2294_v50 = vadd.f32 %v7313_v9, %v2254_v43  ;;  %v2336_v2 = vadd.f32 %v7314_v36, %v2296_v5  ;;  %v7319_v43 = vld [vmem:[#allocation82_spill] sm:$0xff]  ;;  %v7320_v5 = vld [vmem:[#allocation87_spill] sm:$0xff] }
 0x2e1   :  { %3307 = vrot.lane.b32.xlu1 %v3299_v4, %s4099_s7  ;;  %3309 = vrot.lane.b32.xlu0 %v3302_v38, %s4099_s7  ;;  %v2373_v15 = vadd.f32 %v7315_v7, %v2333_v54  ;;  %v2415_v24 = vadd.f32 %v7316_v58, %v2375_v62  ;;  %v3337_v38 = vsel %vm242_vm5, %v3335_v41, %v3336_v35  ;;  %v3343_v25 = vrot.slane %v3328_v13, 2  ;;  %v7322_v58 = vld [vmem:[#allocation83_spill] sm:$0xff] }
 0x2e2   :  { %v6613_v22 = vpop.permute.xlu1 %2775  ;;  %v6615_v4 = vpop.permute.xlu0 %2777  ;;  %v3375_v19 = vrot.slane %v3363_v18, 3  ;;  %v3376_v16 = vrot.slane %v3364_v51, 3  ;;  %v2334_v63 = vadd.f32 %v7317_v37, %v2294_v50  ;;  %v2376_v9 = vadd.f32 %v7318_v0, %v2336_v2  ;;  %v7321_v18 = vld [vmem:[#allocation79_spill] sm:$0xff]  ;;  %v7323_v37 = vld [vmem:[#allocation86_spill] sm:$0xff] }
 0x2e3   :  { %v2413_v36 = vadd.f32 %v7319_v43, %v2373_v15  ;;  %v2455_v54 = vadd.f32 %v7320_v5, %v2415_v24  ;;  %v3339_v62 = vsel %vm242_vm5, %v3336_v35, %v3338_v39  ;;  %v3342_v7 = vsel %vm242_vm5, %v3340_v10, %v3341_v6  ;;  %v7324_v10 = vld [vmem:[#allocation85_spill] sm:$0xff]  ;;  %v7327_v5 = vld [vmem:[#allocation92_spill] sm:$0xff] }
 0x2e4   :  { %v3378_v41 = vrot.slane %v3365_v45, 3  ;;  %v3402_v13 = vstv %s6587_s23  ;;  %v2374_v51 = vadd.f32 %v7321_v18, %v2334_v63  ;;  %v2416_v50 = vadd.f32 %v7322_v58, %v2376_v9  ;;  %v7325_v63 = vld [vmem:[#allocation90_spill] sm:$0xff]  ;;  %v7326_v9 = vld [vmem:[#allocation93_spill] sm:$0xff] }
 0x2e5   :  { %3311 = vrot.lane.b32.xlu1 %v3304_v61, %s4099_s7  ;;  %3345 = vrot.lane.b32.xlu0 %v3337_v38, %s4099_s7  ;;  %v2453_v0 = vadd.f32 %v7323_v37, %v2413_v36  ;;  %v2481_v2 = vadd.f32 %v6233_v59, %v2455_v54  ;;  %v3344_v61 = vsel %vm242_vm5, %v3341_v6, %v3343_v25 }
 0x2e6   :  { %v6631_v15 = vpop.permute.xlu1 %2779  ;;  %v6633_v24 = vpop.permute.xlu0 %2813  ;;  %v3377_v35 = vsel %vm275_vm6, %v3375_v19, %v3376_v16  ;;  %v3366_v45 = vmul.f32 %v6539_v32, %v6568_v33  ;;  %v3367_v39 = vmul.f32 %v6542_v46, %v6568_v33  ;;  %v2414_v38 = vadd.f32 %v7324_v10, %v2374_v51 }
 0x2e7   :  { %v2456_v59 = vadd.f32 %v7325_v63, %v2416_v50  ;;  %v2479_v43 = vadd.f32 %v7326_v9, %v2453_v0  ;;  %v2521_v36 = vadd.f32 %v6271_v56, %v2481_v2  ;;  %v3368_v6 = vmul.f32 %v6546_v1, %v6568_v33 }
 0x2e8   :  { %v3403_v25 = vmul.f32 %v6523_v60, %v3402_v13  ;;  %v3404_v19 = vmul.f32 %v6526_v55, %v3402_v13  ;;  %v2454_v54 = vadd.f32 %v7327_v5, %v2414_v38  ;;  %v3380_v50 = vrot.slane %v3366_v45, 3 }
 0x2e9   :  { %3347 = vrot.lane.b32.xlu1 %v3339_v62, %s4099_s7  ;;  %3349 = vrot.lane.b32.xlu0 %v3342_v7, %s4099_s7  ;;  %v2482_v18 = vadd.f32 %v6249_v3, %v2456_v59  ;;  %v2519_v51 = vadd.f32 %v6251_v21, %v2479_v43  ;;  %v2561_v58 = vadd.f32 %v6318_v11, %v2521_v36  ;;  %v3381_v33 = vrot.slane %v3367_v39, 3 }
 0x2ea   :  { %v6657_v56 = vpop.permute.xlu1 %2815  ;;  %v6659_v62 = vpop.permute.xlu0 %2817  ;;  %v3379_v7 = vsel %vm275_vm6, %v3376_v16, %v3378_v41  ;;  %v3405_v37 = vmul.f32 %v6536_v52, %v3402_v13  ;;  %v2480_v0 = vadd.f32 %v6231_v34, %v2454_v54  ;;  %v3383_v11 = vrot.slane %v3368_v6, 3 }
 0x2eb   :  { %v2522_v2 = vadd.f32 %v6294_v29, %v2482_v18  ;;  %v2559_v3 = vadd.f32 %v6296_v8, %v2519_v51  ;;  %v2601_v21 = vadd.f32 %v6366_v49, %v2561_v58  ;;  %v3415_v10 = vrot.slane %v3403_v25, 4 }
 0x2ec   :  { %v3416_v16 = vrot.slane %v3404_v19, 4  ;;  %v3406_v41 = vmul.f32 %v6539_v32, %v3402_v13  ;;  %v2520_v45 = vadd.f32 %v6269_v28, %v2480_v0  ;;  %v3407_v38 = vmul.f32 %v6542_v46, %v3402_v13 }
 0x2ed   :  { %3351 = vrot.lane.b32.xlu1 %v3344_v61, %s4099_s7  ;;  %3385 = vrot.lane.b32.xlu0 %v3377_v35, %s4099_s7  ;;  %v2562_v34 = vadd.f32 %v6341_v47, %v2522_v2  ;;  %v2599_v29 = vadd.f32 %v6343_v30, %v2559_v3  ;;  %v2641_v8 = vadd.f32 %v6407_v23, %v2601_v21  ;;  %v3418_v35 = vrot.slane %v3405_v37, 4 }
 0x2ee   :  { %v6674_v39 = vpop.permute.xlu1 %2819  ;;  %v6676_v49 = vpop.permute.xlu0 %2853  ;;  %v3382_v61 = vsel %vm275_vm6, %v3380_v50, %v3381_v33  ;;  %v3442_v63 = vstv %s6641_s21  ;;  %v2560_v28 = vadd.f32 %v6316_v31, %v2520_v45  ;;  %v3384_v59 = vsel %vm275_vm6, %v3381_v33, %v3383_v11  ;;  %v7328_v50 = vld [vmem:[#allocation91_spill] sm:$0xff]  ;;  %v7329_v33 = vld [vmem:[#allocation94_spill] sm:$0xff] }
 0x2ef   :  { %v2602_v47 = vadd.f32 %v6386_v48, %v2562_v34  ;;  %v2639_v30 = vadd.f32 %v6388_v53, %v2599_v29  ;;  %v2681_v23 = vadd.f32 %v6469_v40, %v2641_v8  ;;  %v3417_v9 = vsel %vm308_vm7, %v3415_v10, %v3416_v16  ;;  %v7330_v10 = vld [vmem:[#allocation96_spill] sm:$0xff]  ;;  %v7332_v34 = vld [vmem:[#allocation98_spill] sm:$0xff] }
 0x2f0   :  { %v3420_v43 = vrot.slane %v3406_v41, 4  ;;  %v3408_v36 = vmul.f32 %v6546_v1, %v3402_v13  ;;  %v2600_v6 = vadd.f32 %v6364_v12, %v2560_v28  ;;  %v3419_v19 = vsel %vm308_vm7, %v3416_v16, %v3418_v35  ;;  %v7331_v41 = vld [vmem:[#allocation100_spill] sm:$0xff] }
 0x2f1   :  { %3387 = vrot.lane.b32.xlu1 %v3379_v7, %s4099_s7  ;;  %3389 = vrot.lane.b32.xlu0 %v3382_v61, %s4099_s7  ;;  %v2642_v31 = vadd.f32 %v6433_v17, %v2602_v47  ;;  %v2679_v48 = vadd.f32 %v6435_v57, %v2639_v30  ;;  %v2721_v53 = vadd.f32 %v6533_v14, %v2681_v23  ;;  %v3421_v5 = vrot.slane %v3407_v38, 4  ;;  %v7333_v38 = vld [vmem:[#allocation97_spill] sm:$0xff] }
 0x2f2   :  { %v6696_v40 = vpop.permute.xlu1 %2855  ;;  %v2858_v25 = vpop.permute.xlu0 %2857  ;;  %v3443_v54 = vmul.f32 %v6523_v60, %v3442_v63  ;;  %v3444_v18 = vmul.f32 %v6526_v55, %v3442_v63  ;;  %v2640_v13 = vadd.f32 %v6405_v27, %v2600_v6  ;;  %v3423_v14 = vrot.slane %v3408_v36, 4 }
 0x2f3   :  { %v2682_v12 = vadd.f32 %v6501_v20, %v2642_v31  ;;  %v2719_v17 = vadd.f32 %v6503_v42, %v2679_v48  ;;  %v2747_v57 = vadd.f32 %v6572_v26, %v2721_v53  ;;  %v3445_v51 = vmul.f32 %v6536_v52, %v3442_v63 }
 0x2f4   :  { %v3446_v58 = vmul.f32 %v6539_v32, %v3442_v63  ;;  %v3447_v7 = vmul.f32 %v6542_v46, %v3442_v63  ;;  %v2680_v27 = vadd.f32 %v6467_v44, %v2640_v13  ;;  %v3422_v2 = vsel %vm308_vm7, %v3420_v43, %v3421_v5 }
 0x2f5   :  { %3391 = vrot.lane.b32.xlu1 %v3384_v59, %s4099_s7  ;;  %3425 = vrot.lane.b32.xlu0 %v3417_v9, %s4099_s7  ;;  %v2722_v20 = vadd.f32 %v7328_v50, %v2682_v12  ;;  %v2745_v42 = vadd.f32 %v7329_v33, %v2719_v17  ;;  %v2787_v26 = vadd.f32 %v6615_v4, %v2747_v57  ;;  %v3455_v3 = vrot.slane %v3443_v54, 5 }
 0x2f6   :  { %v2860_v37 = vpop.permute.xlu1 %2859  ;;  %v2894_v0 = vpop.permute.xlu0 %2893  ;;  %v3456_v21 = vrot.slane %v3444_v18, 5  ;;  %v3482_v11 = vstv %s6681_s22  ;;  %v2720_v16 = vadd.f32 %v7330_v10, %v2680_v27  ;;  %v3458_v4 = vrot.slane %v3445_v51, 5 }
 0x2f7   :  { %v2748_v45 = vadd.f32 %v7331_v41, %v2722_v20  ;;  %v2785_v29 = vadd.f32 %v7332_v34, %v2745_v42  ;;  %v2827_v44 = vadd.f32 %v6659_v62, %v2787_v26  ;;  %v3460_v8 = vrot.slane %v3446_v58, 5 }
 0x2f8   :  { %v3461_v61 = vrot.slane %v3447_v7, 5  ;;  %v3448_v35 = vmul.f32 %v6546_v1, %v3442_v63  ;;  %v2746_v28 = vadd.f32 %v7333_v38, %v2720_v16  ;;  %v3424_v62 = vsel %vm308_vm7, %v3421_v5, %v3423_v14 }
 0x2f9   :  { %3427 = vrot.lane.b32.xlu1 %v3419_v19, %s4099_s7  ;;  %3429 = vrot.lane.b32.xlu0 %v3422_v2, %s4099_s7  ;;  %v2788_v47 = vadd.f32 %v6631_v15, %v2748_v45  ;;  %v2825_v30 = vadd.f32 %v6633_v24, %v2785_v29  ;;  %v2867_v23 = vadd.f32 %v2858_v25, %v2827_v44  ;;  %v3548_v10 = vstv %s3952_s24 }
 0x2fa   :  { %v2896_v59 = vpop.permute.xlu1 %2895  ;;  %v2898_v9 = vpop.permute.xlu0 %2897  ;;  %v3457_v43 = vsel %vm341_vm8, %v3455_v3, %v3456_v21  ;;  %v3483_v36 = vmul.f32 %v6523_v60, %v3482_v11  ;;  %v3484_v6 = vmul.f32 %v6526_v55, %v3482_v11  ;;  %v2786_v31 = vadd.f32 %v6613_v22, %v2746_v28 }
 0x2fb   :  { %v2828_v63 = vadd.f32 %v6674_v39, %v2788_v47  ;;  %v2865_v48 = vadd.f32 %v6676_v49, %v2825_v30  ;;  %v2907_v15 = vadd.f32 %v2898_v9, %v2867_v23  ;;  %v3459_v24 = vsel %vm341_vm8, %v3456_v21, %v3458_v4 }
 0x2fc   :  { %v3462_v53 = vsel %vm341_vm8, %v3460_v8, %v3461_v61  ;;  %v2826_v25 = vadd.f32 %v6657_v56, %v2786_v31  ;;  %v3463_v54 = vrot.slane %v3448_v35, 5  ;;  %v3495_v39 = vrot.slane %v3483_v36, 6 }
 0x2fd   :  { %3431 = vrot.lane.b32.xlu1 %v3424_v62, %s4099_s7  ;;  %3465 = vrot.lane.b32.xlu0 %v3457_v43, %s4099_s7  ;;  %v2868_v19 = vadd.f32 %v2860_v37, %v2828_v63  ;;  %v2905_v5 = vadd.f32 %v2894_v0, %v2865_v48  ;;  %v3485_v49 = vmul.f32 %v6536_v52, %v3482_v11  ;;  %v3496_v51 = vrot.slane %v3484_v6, 6 }
 0x2fe   :  { %v2900_v22 = vpop.permute.xlu1 %2899  ;;  %v2934_v18 = vpop.permute.xlu0 %2933  ;;  %v3486_v13 = vmul.f32 %v6539_v32, %v3482_v11  ;;  %v3487_v12 = vmul.f32 %v6542_v46, %v3482_v11  ;;  %v2866_v17 = vadd.f32 %v6696_v40, %v2826_v25  ;;  %v3464_v27 = vsel %vm341_vm8, %v3461_v61, %v3463_v54 }
 0x2ff   :  { %v2908_v57 = vadd.f32 %v2900_v22, %v2868_v19  ;;  %v2945_v14 = vadd.f32 %v2934_v18, %v2905_v5  ;;  %v3498_v50 = vrot.slane %v3485_v49, 6  ;;  %v3488_v33 = vmul.f32 %v6546_v1, %v3482_v11 }
 0x300   :  { %v2906_v56 = vadd.f32 %v2896_v59, %v2866_v17  ;;  %v3500_v20 = vrot.slane %v3486_v13, 6  ;;  %v3497_v40 = vsel %vm374_vm9, %v3495_v39, %v3496_v51  ;;  %v3501_v37 = vrot.slane %v3487_v12, 6 }
 0x301   :  { %3467 = vrot.lane.b32.xlu1 %v3459_v24, %s4099_s7  ;;  %3469 = vrot.lane.b32.xlu0 %v3462_v53, %s4099_s7  ;;  %v3499_v3 = vsel %vm374_vm9, %v3496_v51, %v3498_v50  ;;  %v3522_v21 = vstv %s3951_s2  ;;  %v3503_v11 = vrot.slane %v3488_v33, 6  ;;  %v3549_v4 = vmul.f32 %v6523_v60, %v3548_v10 }
 0x302   :  { %v2936_v58 = vpop.permute.xlu1 %2935  ;;  %v2938_v7 = vpop.permute.xlu0 %2937  ;;  %v3502_v45 = vsel %vm374_vm9, %v3500_v20, %v3501_v37  ;;  %v3523_v44 = vmul.f32 %v6523_v60, %v3522_v21  ;;  %v3550_v38 = vmul.f32 %v6526_v55, %v3548_v10  ;;  %v3524_v28 = vmul.f32 %v6526_v55, %v3522_v21 }
 0x303   :  { %v2946_v42 = vadd.f32 %v2936_v58, %v2906_v56  ;;  %v2947_v26 = vadd.f32 %v2938_v7, %v2907_v15  ;;  %v3504_v35 = vsel %vm374_vm9, %v3501_v37, %v3503_v11  ;;  %v3551_v47 = vmul.f32 %v6536_v52, %v3548_v10 }
 0x304   :  { %v3525_v59 = vmul.f32 %v6539_v32, %v3522_v21  ;;  %v3561_v9 = vrot.slane %v3549_v4, 1  ;;  %v3552_v62 = vmul.f32 %v6539_v32, %v3548_v10  ;;  %v3553_v43 = vmul.f32 %v6542_v46, %v3548_v10 }
 0x305   :  { %3471 = vrot.lane.b32.xlu1 %v3464_v27, %s4099_s7  ;;  %3505 = vrot.lane.b32.xlu0 %v3497_v40, %s4099_s7  ;;  %v3562_v31 = vrot.slane %v3550_v38, 1  ;;  %v3588_v63 = vstv %s3953_s26  ;;  %v3564_v48 = vrot.slane %v3551_v47, 1  ;;  %v3554_v15 = vmul.f32 %v6546_v1, %v3548_v10 }
 0x306   :  { %v2940_v0 = vpop.permute.xlu1 %2939  ;;  %v2974_v2 = vpop.permute.xlu0 %2973  ;;  %v3526_v25 = vmul.f32 %v6542_v46, %v3522_v21  ;;  %v3566_v19 = vrot.slane %v3552_v62, 1  ;;  %v3567_v5 = vrot.slane %v3553_v43, 1  ;;  %v3589_v54 = vmul.f32 %v6523_v60, %v3588_v63 }
 0x307   :  { %v2948_v16 = vadd.f32 %v2940_v0, %v2908_v57  ;;  %v2985_v41 = vadd.f32 %v2974_v2, %v2945_v14  ;;  %v3563_v39 = vsel %vm209_vm4, %v3561_v9, %v3562_v31  ;;  %v3590_v49 = vmul.f32 %v6526_v55, %v3588_v63 }
 0x308   :  { %v3565_v13 = vsel %vm209_vm4, %v3562_v31, %v3564_v48  ;;  %v3569_v12 = vrot.slane %v3554_v15, 1  ;;  %v3591_v17 = vmul.f32 %v6536_v52, %v3588_v63  ;;  %v3568_v51 = vsel %vm209_vm4, %v3566_v19, %v3567_v5 }
 0x309   :  { %3507 = vrot.lane.b32.xlu1 %v3499_v3, %s4099_s7  ;;  %3509 = vrot.lane.b32.xlu0 %v3502_v45, %s4099_s7  ;;  %v3601_v56 = vrot.slane %v3589_v54, 2  ;;  %v3592_v58 = vmul.f32 %v6539_v32, %v3588_v63  ;;  %v3593_v7 = vmul.f32 %v6542_v46, %v3588_v63  ;;  %v3602_v20 = vrot.slane %v3590_v49, 2 }
 0x30a   :  { %v2976_v34 = vpop.permute.xlu1 %2975  ;;  %v2978_v29 = vpop.permute.xlu0 %2977 }
 0x30b   :  { %v2986_v8 = vadd.f32 %v2976_v34, %v2946_v42  ;;  %v2987_v61 = vadd.f32 %v2978_v29, %v2947_v26  ;;  %v3604_v42 = vrot.slane %v3591_v17, 2  ;;  %v3594_v26 = vmul.f32 %v6546_v1, %v3588_v63 }
 0x30c   :  { %v3606_v0 = vrot.slane %v3592_v58, 2  ;;  %v3607_v2 = vrot.slane %v3593_v7, 2  ;;  %v3603_v45 = vsel %vm242_vm5, %v3601_v56, %v3602_v20 }
 0x30d   :  { %3511 = vrot.lane.b32.xlu1 %v3504_v35, %s4099_s7  ;;  %3531 = vrot.lane.b32.xlu0 %v3523_v44, %s4100_s15  ;;  %s3954_s7 = sld [smem:[#allocation5 + $0x4c]]  ;;  %v3605_v11 = vsel %vm242_vm5, %v3602_v20, %v3604_v42  ;;  %v3609_v34 = vrot.slane %v3594_v26, 2 }
 0x30e   :  { %v2980_v30 = vpop.permute.xlu1 %2979  ;;  %v3000_v23 = vpop.permute.xlu0 %2999 }
 0x30f   :  { %v2988_v36 = vadd.f32 %v2980_v30, %v2948_v16  ;;  %v3011_v6 = vadd.f32 %v3000_v23, %v2985_v41  ;;  %v3570_v41 = vsel %vm209_vm4, %v3567_v5, %v3569_v12  ;;  %v3668_v23 = vstv %s3955_s27 }
 0x310   :  { %v3669_v31 = vmul.f32 %v6523_v60, %v3668_v23  ;;  %v3670_v63 = vmul.f32 %v6526_v55, %v3668_v23  ;;  %v3671_v19 = vmul.f32 %v6536_v52, %v3668_v23  ;;  %v3673_v49 = vmul.f32 %v6542_v46, %v3668_v23 }
 0x311   :  { %3533 = vrot.lane.b32.xlu1 %v3524_v28, %s4100_s15  ;;  %3535 = vrot.lane.b32.xlu0 %v3525_v59, %s4100_s15  ;;  %v3610_v59 = vsel %vm242_vm5, %v3607_v2, %v3609_v34 }
 0x312   :  { %v3002_v24 = vpop.permute.xlu1 %3001  ;;  %v3004_v53 = vpop.permute.xlu0 %3003  ;;  %v3684_v56 = vrot.slane %v3671_v19, 4  ;;  %v3687_v20 = vrot.slane %v3673_v49, 4 }
 0x313   :  { %v3012_v22 = vadd.f32 %v3002_v24, %v2986_v8  ;;  %v3013_v18 = vadd.f32 %v3004_v53, %v2987_v61  ;;  %v3628_v33 = vstv %s3954_s7  ;;  %v3608_v8 = vsel %vm242_vm5, %v3606_v0, %v3607_v2 }
 0x314   :  { %v3629_v3 = vmul.f32 %v6523_v60, %v3628_v33  ;;  %v3630_v21 = vmul.f32 %v6526_v55, %v3628_v33  ;;  %v3631_v29 = vmul.f32 %v6536_v52, %v3628_v33  ;;  %v3632_v38 = vmul.f32 %v6539_v32, %v3628_v33 }
 0x315   :  { %3537 = vrot.lane.b32.xlu1 %v3526_v25, %s4100_s15  ;;  %3571 = vrot.lane.b32.xlu0 %v3563_v39, %s4100_s15  ;;  %v3633_v30 = vmul.f32 %v6542_v46, %v3628_v33  ;;  %v3634_v9 = vmul.f32 %v6546_v1, %v3628_v33  ;;  %v3672_v39 = vmul.f32 %v6539_v32, %v3668_v23 }
 0x316   :  { %v3006_v57 = vpop.permute.xlu1 %3005  ;;  %v3040_v14 = vpop.permute.xlu0 %3039  ;;  %v3641_v61 = vrot.slane %v3629_v3, 3  ;;  %v3642_v35 = vrot.slane %v3630_v21, 3  ;;  %v3646_v24 = vrot.slane %v3632_v38, 3  ;;  %v3674_v33 = vmul.f32 %v6546_v1, %v3668_v23 }
 0x317   :  { %v3014_v27 = vadd.f32 %v3006_v57, %v2988_v36  ;;  %v3051_v50 = vadd.f32 %v3040_v14, %v3011_v6  ;;  %v3644_v6 = vrot.slane %v3631_v29, 3  ;;  %v3647_v53 = vrot.slane %v3633_v30, 3 }
 0x318   :  { %v3643_v36 = vsel %vm275_vm6, %v3641_v61, %v3642_v35  ;;  %v3649_v25 = vrot.slane %v3634_v9, 3  ;;  %v3708_v14 = vstv %s6794_s29  ;;  %v3748_v3 = vstv %s3957_s4 }
 0x319   :  { %3573 = vrot.lane.b32.xlu1 %v3565_v13, %s4100_s15  ;;  %3575 = vrot.lane.b32.xlu0 %v3568_v51, %s4100_s15  ;;  %v3645_v17 = vsel %vm275_vm6, %v3642_v35, %v3644_v6  ;;  %v3648_v57 = vsel %vm275_vm6, %v3646_v24, %v3647_v53  ;;  %v3711_v2 = vmul.f32 %v6536_v52, %v3708_v14 }
 0x31a   :  { %v3042_v40 = vpop.permute.xlu1 %3041  ;;  %v3044_v37 = vpop.permute.xlu0 %3043  ;;  %v3650_v51 = vsel %vm275_vm6, %v3647_v53, %v3649_v25  ;;  %v3714_v61 = vmul.f32 %v6546_v1, %v3708_v14  ;;  %v3749_v23 = vmul.f32 %v6523_v60, %v3748_v3  ;;  %v3752_v24 = vmul.f32 %v6539_v32, %v3748_v3 }
 0x31b   :  { %v3052_v10 = vadd.f32 %v3042_v40, %v3012_v22  ;;  %v3053_v16 = vadd.f32 %v3044_v37, %v3013_v18  ;;  %v3681_v22 = vrot.slane %v3669_v31, 4  ;;  %v3682_v18 = vrot.slane %v3670_v63, 4 }
 0x31c   :  { %v3709_v40 = vmul.f32 %v6523_v60, %v3708_v14  ;;  %v3710_v37 = vmul.f32 %v6526_v55, %v3708_v14  ;;  %v3729_v6 = vrot.slane %v3714_v61, 5  ;;  %v3751_v60 = vmul.f32 %v6536_v52, %v3748_v3 }
 0x31d   :  { %3577 = vrot.lane.b32.xlu1 %v3570_v41, %s4100_s15  ;;  %3611 = vrot.lane.b32.xlu0 %v3603_v45, %s4100_s15  ;;  %v3685_v0 = vsel %vm308_vm7, %v3682_v18, %v3684_v56  ;;  %v3689_v41 = vrot.slane %v3674_v33, 4  ;;  %v3712_v45 = vmul.f32 %v6539_v32, %v3708_v14  ;;  %v3754_v49 = vmul.f32 %v6546_v1, %v3748_v3 }
 0x31e   :  { %v3046_v44 = vpop.permute.xlu1 %3045  ;;  %v3080_v4 = vpop.permute.xlu0 %3079 }
 0x31f   :  { %v3054_v28 = vadd.f32 %v3046_v44, %v3014_v27  ;;  %v3091_v47 = vadd.f32 %v3080_v4, %v3051_v50  ;;  %v3683_v27 = vsel %vm308_vm7, %v3681_v22, %v3682_v18  ;;  %v3686_v50 = vrot.slane %v3672_v39, 4 }
 0x320   :  { %v3721_v44 = vrot.slane %v3709_v40, 5  ;;  %v3722_v4 = vrot.slane %v3710_v37, 5  ;;  %v3764_v18 = vrot.slane %v3751_v60, 6  ;;  %v3766_v39 = vrot.slane %v3752_v24, 6 }
 0x321   :  { %3613 = vrot.lane.b32.xlu1 %v3605_v11, %s4100_s15  ;;  %3615 = vrot.lane.b32.xlu0 %v3608_v8, %s4100_s15  ;;  %v3713_v11 = vmul.f32 %v6542_v46, %v3708_v14  ;;  %v3724_v8 = vrot.slane %v3711_v2, 5 }
 0x322   :  { %v3082_v62 = vpop.permute.xlu1 %3081  ;;  %v3084_v43 = vpop.permute.xlu0 %3083 }
 0x323   :  { %v3092_v48 = vadd.f32 %v3082_v62, %v3052_v10  ;;  %v3093_v15 = vadd.f32 %v3084_v43, %v3053_v16  ;;  %v3688_v16 = vsel %vm308_vm7, %v3686_v50, %v3687_v20  ;;  %v3727_v30 = vrot.slane %v3713_v11, 5 }
 0x324   :  { %v3723_v62 = vsel %vm341_vm8, %v3721_v44, %v3722_v4  ;;  %v3750_v43 = vmul.f32 %v6526_v55, %v3748_v3  ;;  %v3753_v55 = vmul.f32 %v6542_v46, %v3748_v3 }
 0x325   :  { %3617 = vrot.lane.b32.xlu1 %v3610_v59, %s4100_s15  ;;  %3651 = vrot.lane.b32.xlu0 %v3643_v36, %s4100_s15  ;;  %v3725_v36 = vsel %vm341_vm8, %v3722_v4, %v3724_v8  ;;  %v3730_v22 = vsel %vm341_vm8, %v3727_v30, %v3729_v6 }
 0x326   :  { %v3086_v5 = vpop.permute.xlu1 %3085  ;;  %v3120_v54 = vpop.permute.xlu0 %3119  ;;  %v3762_v19 = vrot.slane %v3750_v43, 6 }
 0x327   :  { %v3094_v13 = vadd.f32 %v3086_v5, %v3054_v28  ;;  %v3131_v12 = vadd.f32 %v3120_v54, %v3091_v47  ;;  %v3690_v28 = vsel %vm308_vm7, %v3687_v20, %v3689_v41  ;;  %v3726_v47 = vrot.slane %v3712_v45, 5 }
 0x328   :  { %v3765_v56 = vsel %vm374_vm9, %v3762_v19, %v3764_v18 }
 0x329   :  { %3653 = vrot.lane.b32.xlu1 %v3645_v17, %s4100_s15  ;;  %3655 = vrot.lane.b32.xlu0 %v3648_v57, %s4100_s15  ;;  %v3769_v57 = vrot.slane %v3754_v49, 6 }
 0x32a   :  { %v3122_v58 = vpop.permute.xlu1 %3121  ;;  %v3124_v7 = vpop.permute.xlu0 %3123 }
 0x32b   :  { %v3132_v42 = vadd.f32 %v3122_v58, %v3092_v48  ;;  %v3133_v26 = vadd.f32 %v3124_v7, %v3093_v15  ;;  %v3728_v48 = vsel %vm341_vm8, %v3726_v47, %v3727_v30  ;;  %v3761_v15 = vrot.slane %v3749_v23, 6 }
 0x32d   :  { %3657 = vrot.lane.b32.xlu1 %v3650_v51, %s4100_s15  ;;  %3691 = vrot.lane.b32.xlu0 %v3683_v27, %s4100_s15  ;;  %v3763_v32 = vsel %vm374_vm9, %v3761_v15, %v3762_v19 }
 0x32e   :  { %v3126_v21 = vpop.permute.xlu1 %3125  ;;  %v3160_v10 = vpop.permute.xlu0 %3159 }
 0x32f   :  { %v3134_v34 = vadd.f32 %v3126_v21, %v3094_v13  ;;  %v3171_v29 = vadd.f32 %v3160_v10, %v3131_v12  ;;  %v3767_v12 = vrot.slane %v3753_v55, 6 }
 0x331   :  { %3693 = vrot.lane.b32.xlu1 %v3685_v0, %s4100_s15  ;;  %3695 = vrot.lane.b32.xlu0 %v3688_v16, %s4100_s15  ;;  %v3768_v58 = vsel %vm374_vm9, %v3766_v39, %v3767_v12  ;;  %v3770_v20 = vsel %vm374_vm9, %v3767_v12, %v3769_v57 }
 0x332   :  { %v3162_v35 = vpop.permute.xlu1 %3161  ;;  %v3164_v38 = vpop.permute.xlu0 %3163 }
 0x333   :  { %v3172_v59 = vadd.f32 %v3162_v35, %v3132_v42  ;;  %v3173_v9 = vadd.f32 %v3164_v38, %v3133_v26 }
 0x335   :  { %3697 = vrot.lane.b32.xlu1 %v3690_v28, %s4100_s15  ;;  %3731 = vrot.lane.b32.xlu0 %v3723_v62, %s4100_s15 }
 0x336   :  { %v3166_v31 = vpop.permute.xlu1 %3165  ;;  %v3200_v63 = vpop.permute.xlu0 %3199 }
 0x337   :  { %v3174_v53 = vadd.f32 %v3166_v31, %v3134_v34  ;;  %v3211_v25 = vadd.f32 %v3200_v63, %v3171_v29 }
 0x339   :  { %3733 = vrot.lane.b32.xlu1 %v3725_v36, %s4100_s15  ;;  %3735 = vrot.lane.b32.xlu0 %v3728_v48, %s4100_s15 }
 0x33a   :  { %v3202_v5 = vpop.permute.xlu1 %3201  ;;  %v3204_v54 = vpop.permute.xlu0 %3203 }
 0x33b   :  { %v3212_v52 = vadd.f32 %v3202_v5, %v3172_v59  ;;  %v3213_v13 = vadd.f32 %v3204_v54, %v3173_v9 }
 0x33d   :  { %3737 = vrot.lane.b32.xlu1 %v3730_v22, %s4100_s15  ;;  %3771 = vrot.lane.b32.xlu0 %v3763_v32, %s4100_s15 }
 0x33e   :  { %v3206_v46 = vpop.permute.xlu1 %3205  ;;  %v3240_v17 = vpop.permute.xlu0 %3239 }
 0x33f   :  { %v3214_v14 = vadd.f32 %v3206_v46, %v3174_v53  ;;  %v3251_v51 = vadd.f32 %v3240_v17, %v3211_v25 }
 0x341   :  { %3773 = vrot.lane.b32.xlu1 %v3765_v56, %s4100_s15  ;;  %3775 = vrot.lane.b32.xlu0 %v3768_v58, %s4100_s15 }
 0x342   :  { %v3242_v1 = vpop.permute.xlu1 %3241 }
 0x343   :  { %v3244_v7 = vpop.permute.xlu0 %3243  ;;  %v3252_v27 = vadd.f32 %v3242_v1, %v3212_v52 }
 0x344   :  { %v3253_v50 = vadd.f32 %v3244_v7, %v3213_v13 }
 0x345   :  { %3777 = vrot.lane.b32.xlu1 %v3770_v20, %s4100_s15  ;;  %s4101_s15 = smov [#allocation10]  }
 0x346   :  { %s3848_s5 = sshll.u32 %s4101_s15, 4  ;;  %s3849_s5 = int_to_ptr.vmem [resolvable:$true] %s3848_s5 }
 0x347   :  { %v3246_v33 = vpop.permute.xlu1 %3245  ;;  %v3266_v42 = vpop.permute.xlu0 %3265  ;;  %s4063_s6 = scalar_lea.vmem %s3849_s5, 2048  ;;  %p4068_p11 = scmp.lt.s32.totalorder %s3849_s5, %s3849_s5 }
 0x348   :  { %v3254_v26 = vadd.f32 %v3246_v33, %v3214_v14  ;;  %v3277_v40 = vadd.f32 %v3266_v42, %v3251_v51  ;;  %p4064_p10 = scmp.ne.s32.totalorder %s3849_s5, %s4063_s6  ;;  %p4069_p12 = scmp.lt.s32.totalorder %s4063_s6, %s4063_s6 }
 0x34a   :  { %p4070_p13 = por %p4069_p12, %p4068_p11 }
 0x34b   :  { %v3268_v37 = vpop.permute.xlu1 %3267  ;;  %v3270_v0 = vpop.permute.xlu0 %3269 }
 0x34c   :  { %v3278_v2 = vadd.f32 %v3268_v37, %v3252_v27  ;;  %v3279_v3 = vadd.f32 %v3270_v0, %v3253_v50  ;;  %p4071_p0 = pnand %p4070_p13, %p4064_p10 }
 0x34f   :  { %v3272_v21 = vpop.permute.xlu1 %3271  ;;  %v3306_v10 = vpop.permute.xlu0 %3305 }
 0x350   :  { %v3280_v16 = vadd.f32 %v3272_v21, %v3254_v26  ;;  %v3317_v41 = vadd.f32 %v3306_v10, %v3277_v40 }
 0x353   :  { %v3308_v45 = vpop.permute.xlu1 %3307  ;;  %v3310_v11 = vpop.permute.xlu0 %3309 }
 0x354   :  { %v3318_v34 = vadd.f32 %v3308_v45, %v3278_v2  ;;  %v3319_v29 = vadd.f32 %v3310_v11, %v3279_v3 }
 0x357   :  { %v3312_v44 = vpop.permute.xlu1 %3311  ;;  %v3346_v4 = vpop.permute.xlu0 %3345 }
 0x358   :  { %v3320_v8 = vadd.f32 %v3312_v44, %v3280_v16  ;;  %v3357_v61 = vadd.f32 %v3346_v4, %v3317_v41 }
 0x35b   :  { %v3348_v35 = vpop.permute.xlu1 %3347  ;;  %v3350_v38 = vpop.permute.xlu0 %3349 }
 0x35c   :  { %v3358_v28 = vadd.f32 %v3348_v35, %v3318_v34  ;;  %v3359_v47 = vadd.f32 %v3350_v38, %v3319_v29 }
 0x35f   :  { %v3352_v30 = vpop.permute.xlu1 %3351  ;;  %v3386_v23 = vpop.permute.xlu0 %3385 }
 0x360   :  { %v3360_v59 = vadd.f32 %v3352_v30, %v3320_v8  ;;  %v3397_v56 = vadd.f32 %v3386_v23, %v3357_v61 }
 0x363   :  { %v3388_v9 = vpop.permute.xlu1 %3387  ;;  %v3390_v62 = vpop.permute.xlu0 %3389 }
 0x364   :  { %v3398_v27 = vadd.f32 %v3388_v9, %v3358_v28  ;;  %v3399_v50 = vadd.f32 %v3390_v62, %v3359_v47 }
 0x367   :  { %v3392_v43 = vpop.permute.xlu1 %3391  ;;  %v3426_v36 = vpop.permute.xlu0 %3425 }
 0x368   :  { %v3437_v58 = vadd.f32 %v3426_v36, %v3397_v56  ;;  %v3400_v0 = vadd.f32 %v3392_v43, %v3360_v59 }
 0x36b   :  { %v3428_v6 = vpop.permute.xlu1 %3427  ;;  %v3430_v31 = vpop.permute.xlu0 %3429 }
 0x36c   :  { %v3438_v33 = vadd.f32 %v3428_v6, %v3398_v27  ;;  %v3439_v42 = vadd.f32 %v3430_v31, %v3399_v50 }
 0x36f   :  { %v3432_v63 = vpop.permute.xlu1 %3431  ;;  %v3466_v48 = vpop.permute.xlu0 %3465 }
 0x370   :  { %v3477_v20 = vadd.f32 %v3466_v48, %v3437_v58  ;;  %v3440_v10 = vadd.f32 %v3432_v63, %v3400_v0  ;;  %v4018_v0 = vld [vmem:[#allocation9 + $0x30] sm:$0xff] }
 0x373   :  { %v3468_v15 = vpop.permute.xlu1 %3467  ;;  %v3470_v60 = vpop.permute.xlu0 %3469 }
 0x374   :  { %v3478_v2 = vadd.f32 %v3468_v15, %v3438_v33  ;;  %v3479_v3 = vadd.f32 %v3470_v60, %v3439_v42  ;;  %v4016_v42 = vld [vmem:[#allocation9 + $0x10] sm:$0xff] }
 0x377   :  { %v3472_v24 = vpop.permute.xlu1 %3471  ;;  %v3506_v53 = vpop.permute.xlu0 %3505 }
 0x378   :  { %v3517_v26 = vadd.f32 %v3506_v53, %v3477_v20  ;;  %v3480_v29 = vadd.f32 %v3472_v24, %v3440_v10  ;;  %v4015_v20 = vld [vmem:[#allocation9] sm:$0xff]  ;;  %v4019_v10 = vld [vmem:[#allocation9 + $0x8] sm:$0xff] }
 0x37b   :  { %v3508_v25 = vpop.permute.xlu1 %3507  ;;  %v3510_v19 = vpop.permute.xlu0 %3509 }
 0x37c   :  { %v3518_v16 = vadd.f32 %v3508_v25, %v3478_v2  ;;  %v3519_v41 = vadd.f32 %v3510_v19, %v3479_v3 }
 0x37f   :  { %v3512_v55 = vpop.permute.xlu1 %3511  ;;  %v3532_v5 = vpop.permute.xlu0 %3531 }
 0x380   :  { %v3543_v21 = vadd.f32 %v3532_v5, %v3517_v26  ;;  %v3520_v61 = vadd.f32 %v3512_v55, %v3480_v29  ;;  %v4022_v29 = vld [vmem:[#allocation9 + $0x38] sm:$0xff] }
 0x383   :  { %v3534_v54 = vpop.permute.xlu1 %3533  ;;  %v3536_v22 = vpop.permute.xlu0 %3535 }
 0x384   :  { %v3544_v44 = vadd.f32 %v3534_v54, %v3518_v16  ;;  %v3545_v4 = vadd.f32 %v3536_v22, %v3519_v41  ;;  %v4020_v41 = vld [vmem:[#allocation9 + $0x18] sm:$0xff] }
 0x387   :  { %v3538_v18 = vpop.permute.xlu1 %3537  ;;  %v3572_v39 = vpop.permute.xlu0 %3571 }
 0x388   :  { %v3583_v45 = vadd.f32 %v3572_v39, %v3543_v21  ;;  %v3546_v23 = vadd.f32 %v3538_v18, %v3520_v61  ;;  %v4024_v61 = vld [vmem:[#allocation9 + $0x50] sm:$0xff] }
 0x38b   :  { %v3574_v49 = vpop.permute.xlu1 %3573  ;;  %v3576_v52 = vpop.permute.xlu0 %3575 }
 0x38c   :  { %v3584_v35 = vadd.f32 %v3574_v49, %v3544_v44  ;;  %v3585_v38 = vadd.f32 %v3576_v52, %v3545_v4  ;;  %v4023_v4 = vld [vmem:[#allocation9 + $0x40] sm:$0xff] }
 0x38f   :  { %v3578_v13 = vpop.permute.xlu1 %3577  ;;  %v3612_v32 = vpop.permute.xlu0 %3611 }
 0x390   :  { %v3623_v8 = vadd.f32 %v3612_v32, %v3583_v45  ;;  %v3586_v43 = vadd.f32 %v3578_v13, %v3546_v23 }
 0x393   :  { %v3614_v12 = vpop.permute.xlu1 %3613  ;;  %v3616_v46 = vpop.permute.xlu0 %3615 }
 0x394   :  { %v3624_v59 = vadd.f32 %v3614_v12, %v3584_v35  ;;  %v3625_v9 = vadd.f32 %v3616_v46, %v3585_v38  ;;  %v4025_v38 = vld [vmem:[#allocation9 + $0x60] sm:$0xff] }
 0x397   :  { %v3618_v17 = vpop.permute.xlu1 %3617  ;;  %v3652_v57 = vpop.permute.xlu0 %3651 }
 0x398   :  { %v3663_v28 = vadd.f32 %v3652_v57, %v3623_v8  ;;  %v3626_v15 = vadd.f32 %v3618_v17, %v3586_v43 }
 0x39b   :  { %v3654_v14 = vpop.permute.xlu1 %3653  ;;  %v3656_v51 = vpop.permute.xlu0 %3655 }
 0x39c   :  { %v3664_v36 = vadd.f32 %v3654_v14, %v3624_v59  ;;  %v3665_v6 = vadd.f32 %v3656_v51, %v3625_v9  ;;  %v4027_v59 = vld [vmem:[#allocation9 + $0x48] sm:$0xff] }
 0x39f   :  { %v3658_v1 = vpop.permute.xlu1 %3657  ;;  %v3692_v7 = vpop.permute.xlu0 %3691 }
 0x3a0   :  { %v3703_v62 = vadd.f32 %v3692_v7, %v3663_v28  ;;  %v3666_v25 = vadd.f32 %v3658_v1, %v3626_v15 }
 0x3a3   :  { %v3694_v40 = vpop.permute.xlu1 %3693  ;;  %v3696_v37 = vpop.permute.xlu0 %3695 }
 0x3a4   :  { %v3704_v60 = vadd.f32 %v3694_v40, %v3664_v36  ;;  %v3705_v24 = vadd.f32 %v3696_v37, %v3665_v6  ;;  %v4017_v40 = vld [vmem:[#allocation9 + $0x20] sm:$0xff]  ;;  %v4029_v36 = vld [vmem:[#allocation9 + $0x68] sm:$0xff] }
 0x3a7   :  { %v3698_v11 = vpop.permute.xlu1 %3697  ;;  %v3732_v34 = vpop.permute.xlu0 %3731 }
 0x3a8   :  { %v3743_v31 = vadd.f32 %v3732_v34, %v3703_v62  ;;  %v3706_v18 = vadd.f32 %v3698_v11, %v3666_v25  ;;  %v4021_v11 = vld [vmem:[#allocation9 + $0x28] sm:$0xff]  ;;  %v4028_v62 = vld [vmem:[#allocation9 + $0x58] sm:$0xff] }
 0x3ab   :  { %v3734_v47 = vpop.permute.xlu1 %3733  ;;  %v3736_v30 = vpop.permute.xlu0 %3735 }
 0x3ac   :  { %v3744_v19 = vadd.f32 %v3734_v47, %v3704_v60  ;;  %v3745_v55 = vadd.f32 %v3736_v30, %v3705_v24  ;;  %v4026_v47 = vld [vmem:[#allocation9 + $0x70] sm:$0xff] }
 0x3af   :  { %v3738_v63 = vpop.permute.xlu1 %3737  ;;  %v3772_v48 = vpop.permute.xlu0 %3771 }
 0x3b0   :  { %v3783_v53 = vadd.f32 %v3772_v48, %v3743_v31  ;;  %v3746_v52 = vadd.f32 %v3738_v63, %v3706_v18  ;;  %v4030_v31 = vld [vmem:[#allocation9 + $0x78] sm:$0xff] }
 0x3b2   :  { %v3958_v5 = vmul.f32 -1.442695, %v3783_v53 }
 0x3b3   :  { %v3774_v54 = vpop.permute.xlu1 %3773  ;;  %v3776_v22 = vpop.permute.xlu0 %3775 }
 0x3b4   :  { %3975 = vpow2.f32 %v3958_v5  ;;  %v3784_v39 = vadd.f32 %v3774_v54, %v3744_v19  ;;  %v3785_v49 = vadd.f32 %v3776_v22, %v3745_v55 }
 0x3b6   :  { %v3959_v13 = vmul.f32 -1.442695, %v3784_v39  ;;  %v3960_v32 = vmul.f32 -1.442695, %v3785_v49 }
 0x3b7   :  { %v3778_v12 = vpop.permute.xlu1 %3777 }
 0x3b8   :  { %3977 = vpow2.f32 %v3959_v13  ;;  %v3786_v46 = vadd.f32 %v3778_v12, %v3746_v52 }
 0x3b9   :  { %3979 = vpow2.f32 %v3960_v32 }
 0x3ba   :  { %v3961_v17 = vmul.f32 -1.442695, %v3786_v46 }
 0x3bc   :  { %3981 = vpow2.f32 %v3961_v17 }
 0x3c1   :  { %v3976_v57 = vpop.eup %3975 }
 0x3c2   :  { %v3799_v14 = vadd.f32 1.0, %v3976_v57 }
 0x3c4   :  { %3983 = vrcp.f32 %v3799_v14 }
 0x3c5   :  { %v3978_v51 = vpop.eup %3977 }
 0x3c6   :  { %v3980_v56 = vpop.eup %3979  ;;  %v3800_v58 = vadd.f32 1.0, %v3978_v51 }
 0x3c7   :  { %v3801_v1 = vadd.f32 1.0, %v3980_v56 }
 0x3c8   :  { %3985 = vrcp.f32 %v3800_v58 }
 0x3c9   :  { %v3982_v7 = vpop.eup %3981  ;;  %3987 = vrcp.f32 %v3801_v1 }
 0x3ca   :  { %v3802_v27 = vadd.f32 1.0, %v3982_v7 }
 0x3cc   :  { %3989 = vrcp.f32 %v3802_v27 }
 0x3d1   :  { %v3984_v50 = vpop.eup %3983 }
 0x3d2   :  { %v3811_v33 = vmul.f32 %v4015_v20, %v3984_v50  ;;  %v3813_v26 = vmul.f32 %v4016_v42, %v3984_v50  ;;  %v3815_v37 = vmul.f32 %v4017_v40, %v3984_v50  ;;  %v3817_v2 = vmul.f32 %v4018_v0, %v3984_v50 }
 0x3d4   :  { %3827 = vst.msk [vmem:[#allocation10] sm:$0xff] %vm59_vm0, %v3811_v33  ;;  %3829 = vst.msk [vmem:[#allocation10 + $0x10] sm:$0xff] %vm59_vm0, %v3813_v26 }
 0x3d5   :  { %3831 = vst.msk [vmem:[#allocation10 + $0x20] sm:$0xff] %vm59_vm0, %v3815_v37  ;;  %3833 = vst.msk [vmem:[#allocation10 + $0x30] sm:$0xff] %vm59_vm0, %v3817_v2  ;;  %v3986_v3 = vpop.eup %3985 }
 0x3d6   :  { %v3988_v21 = vpop.eup %3987  ;;  %v3812_v16 = vmul.f32 %v4019_v10, %v3986_v3  ;;  %v3814_v45 = vmul.f32 %v4020_v41, %v3986_v3  ;;  %v3816_v34 = vmul.f32 %v4021_v11, %v3986_v3  ;;  %v3818_v44 = vmul.f32 %v4022_v29, %v3986_v3 }
 0x3d7   :  { %v3819_v8 = vmul.f32 %v4023_v4, %v3988_v21  ;;  %v3821_v35 = vmul.f32 %v4024_v61, %v3988_v21  ;;  %v3823_v28 = vmul.f32 %v4025_v38, %v3988_v21  ;;  %v3825_v30 = vmul.f32 %v4026_v47, %v3988_v21 }
 0x3d8   :  { %3828 = vst.msk [vmem:[#allocation10 + $0x8] sm:$0xff] %vm59_vm0, %v3812_v16  ;;  %3830 = vst.msk [vmem:[#allocation10 + $0x18] sm:$0xff] %vm59_vm0, %v3814_v45 }
 0x3d9   :  { %3832 = vst.msk [vmem:[#allocation10 + $0x28] sm:$0xff] %vm59_vm0, %v3816_v34  ;;  %3834 = vst.msk [vmem:[#allocation10 + $0x38] sm:$0xff] %vm59_vm0, %v3818_v44  ;;  %v3990_v23 = vpop.eup %3989 }
 0x3da   :  { %3835 = vst.msk [vmem:[#allocation10 + $0x40] sm:$0xff] %vm59_vm0, %v3819_v8  ;;  %3837 = vst.msk [vmem:[#allocation10 + $0x50] sm:$0xff] %vm59_vm0, %v3821_v35  ;;  %v3820_v9 = vmul.f32 %v4027_v59, %v3990_v23  ;;  %v3822_v43 = vmul.f32 %v4028_v62, %v3990_v23  ;;  %v3824_v6 = vmul.f32 %v4029_v36, %v3990_v23 }
 0x3db   :  { %3839 = vst.msk [vmem:[#allocation10 + $0x60] sm:$0xff] %vm59_vm0, %v3823_v28  ;;  %3841 = vst.msk [vmem:[#allocation10 + $0x70] sm:$0xff] %vm59_vm0, %v3825_v30  ;;  %v3826_v63 = vmul.f32 %v4030_v31, %v3990_v23 }
 0x3dc   :  { %3836 = vst.msk [vmem:[#allocation10 + $0x48] sm:$0xff] %vm59_vm0, %v3820_v9  ;;  %3838 = vst.msk [vmem:[#allocation10 + $0x58] sm:$0xff] %vm59_vm0, %v3822_v43 }
 0x3dd   :  { %3840 = vst.msk [vmem:[#allocation10 + $0x68] sm:$0xff] %vm59_vm0, %v3824_v6  ;;  %3842 = vst.msk [vmem:[#allocation10 + $0x78] sm:$0xff] %vm59_vm0, %v3826_v63 }
 0x3de   :  { %4074 = shalt.err (!%p4071_p0)
}
 0x3df   :  { %3854 = dma.vmem_to_hbm [thread:$0]  %s3849_s5, 2048, %s6875_s3, [#allocation7], %s4091_s0, %s4091_s0, %s4092_s20  }
 0x3e0   :  { %4087 = dma.done.wait [#allocation7], 2048  }
 0x3e1   :  { %4088 = vsyncadd [#allocation7], 4294965248 }
 0x3e2   :  { %3858 = vsyncpa [#allocation6], 1 }
 0x3e3   :  { %3859 = vsyncpa [#allocation7], 1 }
 0x3e4   :  { %3860 = vsyncpa [#allocation8], 1 }

</bundles_post_ra>
